<compile_context>
chip_gen: v6e
topology: v6e:2x2x1
jax: 0.10.0
libtpu: 0.0.40
codegen_flags: <defaults>
</compile_context>

<pallas_src>
import functools

import numpy as np
import jax
import jax.numpy as jnp
from jax.experimental import pallas as pl
from jax.experimental.pallas import tpu as pltpu


# ----------------------------------------------------------------------------
# Host-side operator matrices (exact PyTorch semantics), cached per (H, W, sizes).
# ----------------------------------------------------------------------------
def _avg_pool_matrix(out_size, in_size):
    """Row i averages the AdaptiveAvgPool2d bin [floor(i*L/s), ceil((i+1)*L/s))."""
    m = np.zeros((out_size, in_size), np.float32)
    for i in range(out_size):
        start = (i * in_size) // out_size
        end = -(-((i + 1) * in_size) // out_size)  # ceil division
        m[i, start:end] = 1.0 / (end - start)
    return m


def _bilinear_matrix(out_size, in_size):
    """Bilinear (align_corners=True) interpolation weights: out = M @ in."""
    m = np.zeros((out_size, in_size), np.float32)
    if in_size == 1:
        m[:, 0] = 1.0
        return m
    for y in range(out_size):
        pos = 0.0 if out_size == 1 else y * (in_size - 1) / (out_size - 1)
        i0 = min(int(np.floor(pos)), in_size - 1)
        frac = pos - i0
        m[y, i0] += 1.0 - frac
        if i0 + 1 < in_size:
            m[y, i0 + 1] += frac
    return m


@functools.lru_cache(maxsize=None)
def _stage_operators(h, w, sizes):
    """Stacked pooling (P) and upsampling (R) operators for all pyramid sizes.

    P_all[t]: (S2, H*W)  pooled_flat = P @ x_flat   (rows >= s^2 are zero)
    R_all[t]: (H*W, S2)  up_flat     = R @ conv_flat (cols >= s^2 are zero)
    S2 = max(s^2) rounded up to a multiple of 8 (sublane alignment).
    """
    hw = h * w
    s2 = max(s * s for s in sizes)
    s2 = -(-s2 // 8) * 8
    P = np.zeros((len(sizes), s2, hw), np.float32)
    R = np.zeros((len(sizes), hw, s2), np.float32)
    for t, s in enumerate(sizes):
        ph = _avg_pool_matrix(s, h)
        pw = _avg_pool_matrix(s, w)
        rh = _bilinear_matrix(h, s)
        rw = _bilinear_matrix(w, s)
        P[t, : s * s, :] = np.einsum("iy,jx->ijyx", ph, pw).reshape(s * s, hw)
        R[t, :, : s * s] = np.einsum("yi,xj->yxij", rh, rw).reshape(hw, s * s)
    return jnp.asarray(P), jnp.asarray(R)


# ----------------------------------------------------------------------------
# Pallas kernels
# ----------------------------------------------------------------------------
def _stage_kernel(x_ref, p_ref, w1_ref, r_ref, o_ref):
    # x_ref: (1, HW, C); p_ref: (1, S2, HW); w1_ref: (1, C, O); r_ref: (1, HW, S2)
    # o_ref: (1, 1, HW, O)
    x = x_ref[0]                                                           # (HW, C)
    pooled = jnp.dot(p_ref[0], x, preferred_element_type=jnp.float32)     # (S2, C)
    conv = jnp.dot(pooled, w1_ref[0], preferred_element_type=jnp.float32)  # (S2, O)
    up = jnp.dot(r_ref[0], conv, preferred_element_type=jnp.float32)      # (HW, O)
    o_ref[0, 0] = up.astype(o_ref.dtype)


def _bottleneck_kernel(priors_ref, feats_ref, w3_ref, scale_ref, bias_ref,
                       o_ref, cat_ref, acc_ref, *, H, W):
    # priors_ref: (1, T, HW, O)   feats_ref: (1, HW, C)
    # w3_ref:     (9, Cin, Oout)  (Cin = T*O + C, concat channel order [p0..p3, feats])
    # scale/bias: (1, Oout)       folded eval-mode BatchNorm
    # cat_ref:    ((H+2)*(W+2)+2, Cin) f32 scratch -- padded, channel-concatenated
    # acc_ref:    (H*(W+2), Oout) f32 scratch      -- conv accumulator
    T = priors_ref.shape[1]
    O = priors_ref.shape[3]
    C = feats_ref.shape[2]
    Wp = W + 2
    HWp = H * Wp

    # Zero scratches (border rows/cols of cat_ref implement padding=1).
    cat_ref[...] = jnp.zeros_like(cat_ref)
    acc_ref[...] = jnp.zeros_like(acc_ref)

    # Assemble the channel-concatenated, zero-padded activation in VMEM once.
    # This replaces jnp.concatenate + jnp.pad round-tripping through HBM.
    for y in range(H):
        dst = (y + 1) * Wp + 1
        for g in range(T):
            cat_ref[pl.ds(dst, W), pl.ds(g * O, O)] = (
                priors_ref[0, g, pl.ds(y * W, W), :].astype(jnp.float32))
        cat_ref[pl.ds(dst, W), pl.ds(T * O, C)] = (
            feats_ref[0, pl.ds(y * W, W), :].astype(jnp.float32))

    # 3x3 conv = 9 shifted MXU matmuls over the full Cin contraction.
    # acc[y*(W+2) + x] accumulates out[y, x]; columns x in {W, W+1} are garbage
    # (wrapped reads / padding) and are discarded by the epilogue.
    k = 0
    for dy in range(3):
        for dx in range(3):
            patch = cat_ref[pl.ds(dy * Wp + dx, HWp), :]       # (H*(W+2), Cin)
            acc_ref[...] += jnp.dot(patch, w3_ref[k],
                                    preferred_element_type=jnp.float32)
            k += 1

    # Folded BatchNorm epilogue; strip the W-padding columns row by row.
    sc = scale_ref[...]   # (1, Oout)
    bi = bias_ref[...]
    for y in range(H):
        row = acc_ref[pl.ds(y * Wp, W), :]                     # (W, Oout)
        o_ref[0, pl.ds(y * W, W), :] = (row * sc + bi).astype(o_ref.dtype)


# ----------------------------------------------------------------------------
# pallas_call wrappers
# ----------------------------------------------------------------------------
def psp_stages(feats2, P_all, W1_all, R_all):
    """All pyramid stages in one call. feats2: (N, HW, C) -> (N, T, HW, O)."""
    N, HW, C = feats2.shape
    T, S2, _ = P_all.shape
    O = W1_all.shape[2]
    return pl.pallas_call(
        _stage_kernel,
        out_shape=jax.ShapeDtypeStruct((N, T, HW, O), feats2.dtype),
        grid=(N, T),
        in_specs=[
            pl.BlockSpec((1, HW, C), lambda n, t: (n, 0, 0)),   # fetched once per n
            pl.BlockSpec((1, S2, HW), lambda n, t: (t, 0, 0)),
            pl.BlockSpec((1, C, O), lambda n, t: (t, 0, 0)),
            pl.BlockSpec((1, HW, S2), lambda n, t: (t, 0, 0)),
        ],
        out_specs=pl.BlockSpec((1, 1, HW, O), lambda n, t: (n, t, 0, 0)),
        compiler_params=pltpu.CompilerParams(
            dimension_semantics=("parallel", "parallel")),
    )(feats2, P_all, W1_all, R_all)


def psp_bottleneck(priors, feats2, w3, scale, bias, H, W):
    """3x3 conv (pad=1, no bias) over concat([priors, feats]) + folded BN."""
    N, T, HW, O = priors.shape
    C = feats2.shape[2]
    Cin, Oout = w3.shape[1], w3.shape[2]
    rows_pad = (H + 2) * (W + 2) + 2  # +2 slack so tap ref-slices never read OOB
    kernel = functools.partial(_bottleneck_kernel, H=H, W=W)
    return pl.pallas_call(
        kernel,
        out_shape=jax.ShapeDtypeStruct((N, HW, Oout), feats2.dtype),
        grid=(N,),
        in_specs=[
            pl.BlockSpec((1, T, HW, O), lambda n: (n, 0, 0, 0)),
            pl.BlockSpec((1, HW, C), lambda n: (n, 0, 0)),
            pl.BlockSpec((9, Cin, Oout), lambda n: (0, 0, 0)),
            pl.BlockSpec((1, Oout), lambda n: (0, 0)),
            pl.BlockSpec((1, Oout), lambda n: (0, 0)),
        ],
        out_specs=pl.BlockSpec((1, HW, Oout), lambda n: (n, 0, 0)),
        scratch_shapes=[
            pltpu.VMEM((rows_pad, Cin), jnp.float32),
            pltpu.VMEM((H * (W + 2), Oout), jnp.float32),
        ],
        compiler_params=pltpu.CompilerParams(dimension_semantics=("parallel",)),
    )(priors, feats2, w3, scale, bias)


def psp_module_forward(feats_nchw, params, sizes=(1, 2, 3, 6)):
    """PSPModule.forward, eval mode. Input/output are NCHW like PyTorch."""
    feats = jnp.transpose(feats_nchw, (0, 2, 3, 1))   # NCHW -> NHWC
    N, H, W, C = feats.shape
    feats2 = feats.reshape(N, H * W, C)               # channels stay on lanes

    P_all, R_all = _stage_operators(H, W, tuple(sizes))
    W1_all = jnp.stack(params["stage_w1"])            # (T, C, O)
    priors = psp_stages(feats2, P_all, W1_all, R_all)  # (N, T, HW, O)

    eps = 1e-5  # BatchNorm2d default eps; fold eval-mode BN into scale/bias
    scale = params["bn_gamma"] / jnp.sqrt(params["bn_var"] + eps)
    bias = params["bn_beta"] - params["bn_mean"] * scale
    out2 = psp_bottleneck(priors, feats2, params["w3"],
                          scale[None, :], bias[None, :], H, W)  # (N, HW, Oout)
    # TODO(synk): Dropout2d(0.1) is identity in eval mode; training-mode channel dropout omitted.
    Oout = out2.shape[-1]
    return jnp.transpose(out2.reshape(N, H, W, Oout), (0, 3, 1, 2))  # -> NCHW


# ----------------------------------------------------------------------------
# Pure-JAX reference (independent separable formulation) for a sanity check.
# ----------------------------------------------------------------------------
def reference_forward(feats_nchw, params, sizes=(1, 2, 3, 6)):
    feats = jnp.transpose(feats_nchw, (0, 2, 3, 1))
    N, H, W, C = feats.shape
    priors = []
    for s, w1 in zip(sizes, params["stage_w1"]):
        ph = jnp.asarray(_avg_pool_matrix(s, H))
        pw = jnp.asarray(_avg_pool_matrix(s, W))
        rh = jnp.asarray(_bilinear_matrix(H, s))
        rw = jnp.asarray(_bilinear_matrix(W, s))
        pooled = jnp.einsum('iy,jx,nyxc->nijc', ph, pw, feats)
        conv = jnp.einsum('nijc,co->nijo', pooled, w1)
        priors.append(jnp.einsum('yi,xj,nijo->nyxo', rh, rw, conv))
    cat = jnp.concatenate(priors + [feats], axis=-1)
    xp = jnp.pad(cat, ((0, 0), (1, 1), (1, 1), (0, 0)))
    out = 0.0
    k = 0
    for dy in range(3):
        for dx in range(3):
            out = out + jnp.einsum('nyxc,co->nyxo',
                                   xp[:, dy:dy + H, dx:dx + W, :], params["w3"][k])
            k += 1
    eps = 1e-5
    scale = params["bn_gamma"] / jnp.sqrt(params["bn_var"] + eps)
    bias = params["bn_beta"] - params["bn_mean"] * scale
    out = out * scale + bias
    return jnp.transpose(out, (0, 3, 1, 2))


# ----------------------------------------------------------------------------
# Deterministic synthetic parameters.
# ----------------------------------------------------------------------------
def init_params(key, features, out_features, sizes):
    n_stage = len(sizes)
    keys = jax.random.split(key, n_stage + 5)
    stage_w1 = [0.1 * jax.random.normal(keys[i], (features, out_features), jnp.float32)
                for i in range(n_stage)]
    cin = features + n_stage * out_features
    w3 = 0.05 * jax.random.normal(keys[n_stage], (9, cin, out_features), jnp.float32)
    bn_gamma = 1.0 + 0.1 * jax.random.normal(keys[n_stage + 1], (out_features,), jnp.float32)
    bn_beta = 0.1 * jax.random.normal(keys[n_stage + 2], (out_features,), jnp.float32)
    bn_mean = 0.1 * jax.random.normal(keys[n_stage + 3], (out_features,), jnp.float32)
    bn_var = jnp.abs(jax.random.normal(keys[n_stage + 4], (out_features,), jnp.float32)) + 0.5
    return {"stage_w1": stage_w1, "w3": w3, "bn_gamma": bn_gamma,
            "bn_beta": bn_beta, "bn_mean": bn_mean, "bn_var": bn_var}


if __name__ == "__main__":
    # Small shapes consistent with the module: batch=2, features=8,
    # out_features=8, spatial=12 (divisible by pyramid sizes 1,2,3,6).
    N, C, H, W = 2, 8, 12, 12
    OUT = 8
    SIZES = (1, 2, 3, 6)

    key = jax.random.PRNGKey(0)
    kx, kp = jax.random.split(key)
    x = jax.random.normal(kx, (N, C, H, W), jnp.float32)   # NCHW like PyTorch
    params = init_params(kp, C, OUT, SIZES)

    fwd = jax.jit(lambda xx, pp: psp_module_forward(xx, pp, SIZES))
    out = jax.block_until_ready(fwd(x, params))

    ref = jax.block_until_ready(reference_forward(x, params, SIZES))
    assert out.shape == (N, OUT, H, W), out.shape
    assert jnp.allclose(out, ref, atol=1e-3, rtol=1e-3), "Pallas output mismatch"

    print("KERNEL_OK")
</pallas_src>

<mosaic_0001>
module attributes {stable_mosaic.version = 11 : i64} {
  func.func @_stage_kernel(%arg0: i32, %arg1: i32, %arg2: memref<1x144x8xf32, #tpu.memory_space<vmem>>, %arg3: memref<1x40x144xf32, #tpu.memory_space<vmem>>, %arg4: memref<1x8x8xf32, #tpu.memory_space<vmem>>, %arg5: memref<1x144x40xf32, #tpu.memory_space<vmem>>, %arg6: memref<1x1x144x8xf32, #tpu.memory_space<vmem>>) attributes {dimension_semantics = [#tpu.dimension_semantics<parallel>, #tpu.dimension_semantics<parallel>], iteration_bounds = array<i64: 2, 4>, scalar_prefetch = 0 : i64, scratch_operands = 0 : i64, tpu.core_type = #tpu.core_type<tc>, window_params = [{transform_indices = @transform_0, window_bounds = array<i64: 1, 144, 8>}, {transform_indices = @transform_1, window_bounds = array<i64: 1, 40, 144>}, {transform_indices = @transform_2, window_bounds = array<i64: 1, 8, 8>}, {transform_indices = @transform_3, window_bounds = array<i64: 1, 144, 40>}, {transform_indices = @transform_4, window_bounds = array<i64: 1, 1, 144, 8>}]} {
    %c0 = arith.constant 0 : index
    %c0_0 = arith.constant 0 : index
    %c0_1 = arith.constant 0 : index
    %0 = vector.load %arg2[%c0, %c0_0, %c0_1] : memref<1x144x8xf32, #tpu.memory_space<vmem>>, vector<1x144x8xf32>
    %1 = vector.shape_cast %0 : vector<1x144x8xf32> to vector<144x8xf32>
    %c0_2 = arith.constant 0 : index
    %c0_3 = arith.constant 0 : index
    %c0_4 = arith.constant 0 : index
    %2 = vector.load %arg3[%c0_2, %c0_3, %c0_4] : memref<1x40x144xf32, #tpu.memory_space<vmem>>, vector<1x40x144xf32>
    %3 = vector.shape_cast %2 : vector<1x40x144xf32> to vector<40x144xf32>
    %cst = arith.constant dense<0.000000e+00> : vector<40x8xf32>
    %4 = tpu.matmul %3, %1, %cst {dimension_numbers = #tpu.dot_dimension_numbers<[1], [0], [0], [1], [0, 0, 1, 1], [], []>} : vector<40x144xf32>, vector<144x8xf32>, vector<40x8xf32> -> vector<40x8xf32>
    %c0_5 = arith.constant 0 : index
    %c0_6 = arith.constant 0 : index
    %c0_7 = arith.constant 0 : index
    %5 = vector.load %arg4[%c0_5, %c0_6, %c0_7] : memref<1x8x8xf32, #tpu.memory_space<vmem>>, vector<1x8x8xf32>
    %6 = vector.shape_cast %5 : vector<1x8x8xf32> to vector<8x8xf32>
    %cst_8 = arith.constant dense<0.000000e+00> : vector<40x8xf32>
    %7 = tpu.matmul %4, %6, %cst_8 {dimension_numbers = #tpu.dot_dimension_numbers<[1], [0], [0], [1], [0, 0, 1, 1], [], []>} : vector<40x8xf32>, vector<8x8xf32>, vector<40x8xf32> -> vector<40x8xf32>
    %c0_9 = arith.constant 0 : index
    %c0_10 = arith.constant 0 : index
    %c0_11 = arith.constant 0 : index
    %8 = vector.load %arg5[%c0_9, %c0_10, %c0_11] : memref<1x144x40xf32, #tpu.memory_space<vmem>>, vector<1x144x40xf32>
    %9 = vector.shape_cast %8 : vector<1x144x40xf32> to vector<144x40xf32>
    %cst_12 = arith.constant dense<0.000000e+00> : vector<144x8xf32>
    %10 = tpu.matmul %9, %7, %cst_12 {dimension_numbers = #tpu.dot_dimension_numbers<[1], [0], [0], [1], [0, 0, 1, 1], [], []>} : vector<144x40xf32>, vector<40x8xf32>, vector<144x8xf32> -> vector<144x8xf32>
    %c0_13 = arith.constant 0 : index
    %c0_14 = arith.constant 0 : index
    %c0_15 = arith.constant 0 : index
    %c0_16 = arith.constant 0 : index
    %11 = vector.load %arg6[%c0_13, %c0_14, %c0_15, %c0_16] : memref<1x1x144x8xf32, #tpu.memory_space<vmem>>, vector<1x1x144x8xf32>
    %12 = vector.shape_cast %11 : vector<1x1x144x8xf32> to vector<144x8xf32>
    %13 = vector.shape_cast %10 : vector<144x8xf32> to vector<1x1x144x8xf32>
    tpu.vector_store %arg6[%c0_13, %c0_14, %c0_15, %c0_16], %13 {strides = array<i32>} : memref<1x1x144x8xf32, #tpu.memory_space<vmem>>, vector<1x1x144x8xf32>,
    return
  }
  func.func @transform_0(%arg0: i32, %arg1: i32) -> (i32, i32, i32) {
    %c0_i32 = arith.constant 0 : i32
    %c0_i32_0 = arith.constant 0 : i32
    %c0_i32_1 = arith.constant 0 : i32
    return %arg0, %c0_i32, %c0_i32_0 : i32, i32, i32
  }
  func.func @transform_1(%arg0: i32, %arg1: i32) -> (i32, i32, i32) {
    %c0_i32 = arith.constant 0 : i32
    %c0_i32_0 = arith.constant 0 : i32
    %c0_i32_1 = arith.constant 0 : i32
    return %arg1, %c0_i32, %c0_i32_0 : i32, i32, i32
  }
  func.func @transform_2(%arg0: i32, %arg1: i32) -> (i32, i32, i32) {
    %c0_i32 = arith.constant 0 : i32
    %c0_i32_0 = arith.constant 0 : i32
    %c0_i32_1 = arith.constant 0 : i32
    return %arg1, %c0_i32, %c0_i32_0 : i32, i32, i32
  }
  func.func @transform_3(%arg0: i32, %arg1: i32) -> (i32, i32, i32) {
    %c0_i32 = arith.constant 0 : i32
    %c0_i32_0 = arith.constant 0 : i32
    %c0_i32_1 = arith.constant 0 : i32
    return %arg1, %c0_i32, %c0_i32_0 : i32, i32, i32
  }
  func.func @transform_4(%arg0: i32, %arg1: i32) -> (i32, i32, i32, i32) {
    %c0_i32 = arith.constant 0 : i32
    %c0_i32_0 = arith.constant 0 : i32
    %c0_i32_1 = arith.constant 0 : i32
    return %arg0, %arg1, %c0_i32, %c0_i32_0 : i32, i32, i32, i32
  }
}

module attributes {stable_mosaic.version = 11 : i64} {
  func.func @_bottleneck_kernel(%arg0: i32, %arg1: memref<1x4x144x8xf32, #tpu.memory_space<vmem>>, %arg2: memref<1x144x8xf32, #tpu.memory_space<vmem>>, %arg3: memref<9x40x8xf32, #tpu.memory_space<vmem>>, %arg4: memref<1x8xf32, #tpu.memory_space<vmem>>, %arg5: memref<1x8xf32, #tpu.memory_space<vmem>>, %arg6: memref<1x144x8xf32, #tpu.memory_space<vmem>>, %arg7: memref<198x40xf32, #tpu.memory_space<vmem>>, %arg8: memref<168x8xf32, #tpu.memory_space<vmem>>) attributes {dimension_semantics = [#tpu.dimension_semantics<parallel>], iteration_bounds = array<i64: 2>, scalar_prefetch = 0 : i64, scratch_operands = 2 : i64, tpu.core_type = #tpu.core_type<tc>, window_params = [{transform_indices = @transform_0, window_bounds = array<i64: 1, 4, 144, 8>}, {transform_indices = @transform_1, window_bounds = array<i64: 1, 144, 8>}, {pipeline_mode = #tpu.pipeline_mode<synchronous>, transform_indices = @transform_2, window_bounds = array<i64: 9, 40, 8>}, {pipeline_mode = #tpu.pipeline_mode<synchronous>, transform_indices = @transform_3, window_bounds = array<i64: 1, 8>}, {pipeline_mode = #tpu.pipeline_mode<synchronous>, transform_indices = @transform_4, window_bounds = array<i64: 1, 8>}, {transform_indices = @transform_5, window_bounds = array<i64: 1, 144, 8>}]} {
    %cst = arith.constant 0.000000e+00 : f32
    %0 = vector.broadcast %cst : f32 to vector<198x40xf32>
    %c0 = arith.constant 0 : index
    %c0_0 = arith.constant 0 : index
    %1 = vector.load %arg7[%c0, %c0_0] : memref<198x40xf32, #tpu.memory_space<vmem>>, vector<198x40xf32>
    tpu.vector_store %arg7[%c0, %c0_0], %0 {strides = array<i32>} : memref<198x40xf32, #tpu.memory_space<vmem>>, vector<198x40xf32>,
    %cst_1 = arith.constant 0.000000e+00 : f32
    %2 = vector.broadcast %cst_1 : f32 to vector<168x8xf32>
    %c0_2 = arith.constant 0 : index
    %c0_3 = arith.constant 0 : index
    %3 = vector.load %arg8[%c0_2, %c0_3] : memref<168x8xf32, #tpu.memory_space<vmem>>, vector<168x8xf32>
    tpu.vector_store %arg8[%c0_2, %c0_3], %2 {strides = array<i32>} : memref<168x8xf32, #tpu.memory_space<vmem>>, vector<168x8xf32>,
    %c0_4 = arith.constant 0 : index
    %c0_5 = arith.constant 0 : index
    %c0_6 = arith.constant 0 : index
    %c0_7 = arith.constant 0 : index
    %4 = vector.load %arg1[%c0_4, %c0_5, %c0_6, %c0_7] : memref<1x4x144x8xf32, #tpu.memory_space<vmem>>, vector<1x1x12x8xf32>
    %5 = vector.shape_cast %4 : vector<1x1x12x8xf32> to vector<12x8xf32>
    %c15 = arith.constant 15 : index
    %c0_8 = arith.constant 0 : index
    %6 = vector.load %arg7[%c15, %c0_8] : memref<198x40xf32, #tpu.memory_space<vmem>>, vector<12x8xf32>
    tpu.vector_store %arg7[%c15, %c0_8], %5 {strides = array<i32>} : memref<198x40xf32, #tpu.memory_space<vmem>>, vector<12x8xf32>,
    %c0_9 = arith.constant 0 : index
    %c1 = arith.constant 1 : index
    %c0_10 = arith.constant 0 : index
    %c0_11 = arith.constant 0 : index
    %7 = vector.load %arg1[%c0_9, %c1, %c0_10, %c0_11] : memref<1x4x144x8xf32, #tpu.memory_space<vmem>>, vector<1x1x12x8xf32>
    %8 = vector.shape_cast %7 : vector<1x1x12x8xf32> to vector<12x8xf32>
    %c15_12 = arith.constant 15 : index
    %c8 = arith.constant 8 : index
    %9 = vector.load %arg7[%c15_12, %c8] : memref<198x40xf32, #tpu.memory_space<vmem>>, vector<12x8xf32>
    tpu.vector_store %arg7[%c15_12, %c8], %8 {strides = array<i32>} : memref<198x40xf32, #tpu.memory_space<vmem>>, vector<12x8xf32>,
    %c0_13 = arith.constant 0 : index
    %c2 = arith.constant 2 : index
    %c0_14 = arith.constant 0 : index
    %c0_15 = arith.constant 0 : index
    %10 = vector.load %arg1[%c0_13, %c2, %c0_14, %c0_15] : memref<1x4x144x8xf32, #tpu.memory_space<vmem>>, vector<1x1x12x8xf32>
    %11 = vector.shape_cast %10 : vector<1x1x12x8xf32> to vector<12x8xf32>
    %c15_16 = arith.constant 15 : index
    %c16 = arith.constant 16 : index
    %12 = vector.load %arg7[%c15_16, %c16] : memref<198x40xf32, #tpu.memory_space<vmem>>, vector<12x8xf32>
    tpu.vector_store %arg7[%c15_16, %c16], %11 {strides = array<i32>} : memref<198x40xf32, #tpu.memory_space<vmem>>, vector<12x8xf32>,
    %c0_17 = arith.constant 0 : index
    %c3 = arith.constant 3 : index
    %c0_18 = arith.constant 0 : index
    %c0_19 = arith.constant 0 : index
    %13 = vector.load %arg1[%c0_17, %c3, %c0_18, %c0_19] : memref<1x4x144x8xf32, #tpu.memory_space<vmem>>, vector<1x1x12x8xf32>
    %14 = vector.shape_cast %13 : vector<1x1x12x8xf32> to vector<12x8xf32>
    %c15_20 = arith.constant 15 : index
    %c24 = arith.constant 24 : index
    %15 = vector.load %arg7[%c15_20, %c24] : memref<198x40xf32, #tpu.memory_space<vmem>>, vector<12x8xf32>
    tpu.vector_store %arg7[%c15_20, %c24], %14 {strides = array<i32>} : memref<198x40xf32, #tpu.memory_space<vmem>>, vector<12x8xf32>,
    %c0_21 = arith.constant 0 : index
    %c0_22 = arith.constant 0 : index
    %c0_23 = arith.constant 0 : index
    %16 = vector.load %arg2[%c0_21, %c0_22, %c0_23] : memref<1x144x8xf32, #tpu.memory_space<vmem>>, vector<1x12x8xf32>
    %17 = vector.shape_cast %16 : vector<1x12x8xf32> to vector<12x8xf32>
    %c15_24 = arith.constant 15 : index
    %c32 = arith.constant 32 : index
    %18 = vector.load %arg7[%c15_24, %c32] : memref<198x40xf32, #tpu.memory_space<vmem>>, vector<12x8xf32>
    tpu.vector_store %arg7[%c15_24, %c32], %17 {strides = array<i32>} : memref<198x40xf32, #tpu.memory_space<vmem>>, vector<12x8xf32>,
    %c0_25 = arith.constant 0 : index
    %c0_26 = arith.constant 0 : index
    %c12 = arith.constant 12 : index
    %c0_27 = arith.constant 0 : index
    %19 = vector.load %arg1[%c0_25, %c0_26, %c12, %c0_27] : memref<1x4x144x8xf32, #tpu.memory_space<vmem>>, vector<1x1x12x8xf32>
    %20 = vector.shape_cast %19 : vector<1x1x12x8xf32> to vector<12x8xf32>
    %c29 = arith.constant 29 : index
    %c0_28 = arith.constant 0 : index
    %21 = vector.load %arg7[%c29, %c0_28] : memref<198x40xf32, #tpu.memory_space<vmem>>, vector<12x8xf32>
    tpu.vector_store %arg7[%c29, %c0_28], %20 {strides = array<i32>} : memref<198x40xf32, #tpu.memory_space<vmem>>, vector<12x8xf32>,
    %c0_29 = arith.constant 0 : index
    %c1_30 = arith.constant 1 : index
    %c12_31 = arith.constant 12 : index
    %c0_32 = arith.constant 0 : index
    %22 = vector.load %arg1[%c0_29, %c1_30, %c12_31, %c0_32] : memref<1x4x144x8xf32, #tpu.memory_space<vmem>>, vector<1x1x12x8xf32>
    %23 = vector.shape_cast %22 : vector<1x1x12x8xf32> to vector<12x8xf32>
    %c29_33 = arith.constant 29 : index
    %c8_34 = arith.constant 8 : index
    %24 = vector.load %arg7[%c29_33, %c8_34] : memref<198x40xf32, #tpu.memory_space<vmem>>, vector<12x8xf32>
    tpu.vector_store %arg7[%c29_33, %c8_34], %23 {strides = array<i32>} : memref<198x40xf32, #tpu.memory_space<vmem>>, vector<12x8xf32>,
    %c0_35 = arith.constant 0 : index
    %c2_36 = arith.constant 2 : index
    %c12_37 = arith.constant 12 : index
    %c0_38 = arith.constant 0 : index
    %25 = vector.load %arg1[%c0_35, %c2_36, %c12_37, %c0_38] : memref<1x4x144x8xf32, #tpu.memory_space<vmem>>, vector<1x1x12x8xf32>
    %26 = vector.shape_cast %25 : vector<1x1x12x8xf32> to vector<12x8xf32>
    %c29_39 = arith.constant 29 : index
    %c16_40 = arith.constant 16 : index
    %27 = vector.load %arg7[%c29_39, %c16_40] : memref<198x40xf32, #tpu.memory_space<vmem>>, vector<12x8xf32>
    tpu.vector_store %arg7[%c29_39, %c16_40], %26 {strides = array<i32>} : memref<198x40xf32, #tpu.memory_space<vmem>>, vector<12x8xf32>,
    %c0_41 = arith.constant 0 : index
    %c3_42 = arith.constant 3 : index
    %c12_43 = arith.constant 12 : index
    %c0_44 = arith.constant 0 : index
    %28 = vector.load %arg1[%c0_41, %c3_42, %c12_43, %c0_44] : memref<1x4x144x8xf32, #tpu.memory_space<vmem>>, vector<1x1x12x8xf32>
    %29 = vector.shape_cast %28 : vector<1x1x12x8xf32> to vector<12x8xf32>
    %c29_45 = arith.constant 29 : index
    %c24_46 = arith.constant 24 : index
    %30 = vector.load %arg7[%c29_45, %c24_46] : memref<198x40xf32, #tpu.memory_space<vmem>>, vector<12x8xf32>
    tpu.vector_store %arg7[%c29_45, %c24_46], %29 {strides = array<i32>} : memref<198x40xf32, #tpu.memory_space<vmem>>, vector<12x8xf32>,
    %c0_47 = arith.constant 0 : index
    %c12_48 = arith.constant 12 : index
    %c0_49 = arith.constant 0 : index
    %31 = vector.load %arg2[%c0_47, %c12_48, %c0_49] : memref<1x144x8xf32, #tpu.memory_space<vmem>>, vector<1x12x8xf32>
    %32 = vector.shape_cast %31 : vector<1x12x8xf32> to vector<12x8xf32>
    %c29_50 = arith.constant 29 : index
    %c32_51 = arith.constant 32 : index
    %33 = vector.load %arg7[%c29_50, %c32_51] : memref<198x40xf32, #tpu.memory_space<vmem>>, vector<12x8xf32>
    tpu.vector_store %arg7[%c29_50, %c32_51], %32 {strides = array<i32>} : memref<198x40xf32, #tpu.memory_space<vmem>>, vector<12x8xf32>,
    %c0_52 = arith.constant 0 : index
    %c0_53 = arith.constant 0 : index
    %c24_54 = arith.constant 24 : index
    %c0_55 = arith.constant 0 : index
    %34 = vector.load %arg1[%c0_52, %c0_53, %c24_54, %c0_55] : memref<1x4x144x8xf32, #tpu.memory_space<vmem>>, vector<1x1x12x8xf32>
    %35 = vector.shape_cast %34 : vector<1x1x12x8xf32> to vector<12x8xf32>
    %c43 = arith.constant 43 : index
    %c0_56 = arith.constant 0 : index
    %36 = vector.load %arg7[%c43, %c0_56] : memref<198x40xf32, #tpu.memory_space<vmem>>, vector<12x8xf32>
    tpu.vector_store %arg7[%c43, %c0_56], %35 {strides = array<i32>} : memref<198x40xf32, #tpu.memory_space<vmem>>, vector<12x8xf32>,
    %c0_57 = arith.constant 0 : index
    %c1_58 = arith.constant 1 : index
    %c24_59 = arith.constant 24 : index
    %c0_60 = arith.constant 0 : index
    %37 = vector.load %arg1[%c0_57, %c1_58, %c24_59, %c0_60] : memref<1x4x144x8xf32, #tpu.memory_space<vmem>>, vector<1x1x12x8xf32>
    %38 = vector.shape_cast %37 : vector<1x1x12x8xf32> to vector<12x8xf32>
    %c43_61 = arith.constant 43 : index
    %c8_62 = arith.constant 8 : index
    %39 = vector.load %arg7[%c43_61, %c8_62] : memref<198x40xf32, #tpu.memory_space<vmem>>, vector<12x8xf32>
    tpu.vector_store %arg7[%c43_61, %c8_62], %38 {strides = array<i32>} : memref<198x40xf32, #tpu.memory_space<vmem>>, vector<12x8xf32>,
    %c0_63 = arith.constant 0 : index
    %c2_64 = arith.constant 2 : index
    %c24_65 = arith.constant 24 : index
    %c0_66 = arith.constant 0 : index
    %40 = vector.load %arg1[%c0_63, %c2_64, %c24_65, %c0_66] : memref<1x4x144x8xf32, #tpu.memory_space<vmem>>, vector<1x1x12x8xf32>
    %41 = vector.shape_cast %40 : vector<1x1x12x8xf32> to vector<12x8xf32>
    %c43_67 = arith.constant 43 : index
    %c16_68 = arith.constant 16 : index
    %42 = vector.load %arg7[%c43_67, %c16_68] : memref<198x40xf32, #tpu.memory_space<vmem>>, vector<12x8xf32>
    tpu.vector_store %arg7[%c43_67, %c16_68], %41 {strides = array<i32>} : memref<198x40xf32, #tpu.memory_space<vmem>>, vector<12x8xf32>,
    %c0_69 = arith.constant 0 : index
    %c3_70 = arith.constant 3 : index
    %c24_71 = arith.constant 24 : index
    %c0_72 = arith.constant 0 : index
    %43 = vector.load %arg1[%c0_69, %c3_70, %c24_71, %c0_72] : memref<1x4x144x8xf32, #tpu.memory_space<vmem>>, vector<1x1x12x8xf32>
    %44 = vector.shape_cast %43 : vector<1x1x12x8xf32> to vector<12x8xf32>
    %c43_73 = arith.constant 43 : index
    %c24_74 = arith.constant 24 : index
    %45 = vector.load %arg7[%c43_73, %c24_74] : memref<198x40xf32, #tpu.memory_space<vmem>>, vector<12x8xf32>
    tpu.vector_store %arg7[%c43_73, %c24_74], %44 {strides = array<i32>} : memref<198x40xf32, #tpu.memory_space<vmem>>, vector<12x8xf32>,
    %c0_75 = arith.constant 0 : index
    %c24_76 = arith.constant 24 : index
    %c0_77 = arith.constant 0 : index
    %46 = vector.load %arg2[%c0_75, %c24_76, %c0_77] : memref<1x144x8xf32, #tpu.memory_space<vmem>>, vector<1x12x8xf32>
    %47 = vector.shape_cast %46 : vector<1x12x8xf32> to vector<12x8xf32>
    %c43_78 = arith.constant 43 : index
    %c32_79 = arith.constant 32 : index
    %48 = vector.load %arg7[%c43_78, %c32_79] : memref<198x40xf32, #tpu.memory_space<vmem>>, vector<12x8xf32>
    tpu.vector_store %arg7[%c43_78, %c32_79], %47 {strides = array<i32>} : memref<198x40xf32, #tpu.memory_space<vmem>>, vector<12x8xf32>,
    %c0_80 = arith.constant 0 : index
    %c0_81 = arith.constant 0 : index
    %c36 = arith.constant 36 : index
    %c0_82 = arith.constant 0 : index
    %49 = vector.load %arg1[%c0_80, %c0_81, %c36, %c0_82] : memref<1x4x144x8xf32, #tpu.memory_space<vmem>>, vector<1x1x12x8xf32>
    %50 = vector.shape_cast %49 : vector<1x1x12x8xf32> to vector<12x8xf32>
    %c57 = arith.constant 57 : index
    %c0_83 = arith.constant 0 : index
    %51 = vector.load %arg7[%c57, %c0_83] : memref<198x40xf32, #tpu.memory_space<vmem>>, vector<12x8xf32>
    tpu.vector_store %arg7[%c57, %c0_83], %50 {strides = array<i32>} : memref<198x40xf32, #tpu.memory_space<vmem>>, vector<12x8xf32>,
    %c0_84 = arith.constant 0 : index
    %c1_85 = arith.constant 1 : index
    %c36_86 = arith.constant 36 : index
    %c0_87 = arith.constant 0 : index
    %52 = vector.load %arg1[%c0_84, %c1_85, %c36_86, %c0_87] : memref<1x4x144x8xf32, #tpu.memory_space<vmem>>, vector<1x1x12x8xf32>
    %53 = vector.shape_cast %52 : vector<1x1x12x8xf32> to vector<12x8xf32>
    %c57_88 = arith.constant 57 : index
    %c8_89 = arith.constant 8 : index
    %54 = vector.load %arg7[%c57_88, %c8_89] : memref<198x40xf32, #tpu.memory_space<vmem>>, vector<12x8xf32>
    tpu.vector_store %arg7[%c57_88, %c8_89], %53 {strides = array<i32>} : memref<198x40xf32, #tpu.memory_space<vmem>>, vector<12x8xf32>,
    %c0_90 = arith.constant 0 : index
    %c2_91 = arith.constant 2 : index
    %c36_92 = arith.constant 36 : index
    %c0_93 = arith.constant 0 : index
    %55 = vector.load %arg1[%c0_90, %c2_91, %c36_92, %c0_93] : memref<1x4x144x8xf32, #tpu.memory_space<vmem>>, vector<1x1x12x8xf32>
    %56 = vector.shape_cast %55 : vector<1x1x12x8xf32> to vector<12x8xf32>
    %c57_94 = arith.constant 57 : index
    %c16_95 = arith.constant 16 : index
    %57 = vector.load %arg7[%c57_94, %c16_95] : memref<198x40xf32, #tpu.memory_space<vmem>>, vector<12x8xf32>
    tpu.vector_store %arg7[%c57_94, %c16_95], %56 {strides = array<i32>} : memref<198x40xf32, #tpu.memory_space<vmem>>, vector<12x8xf32>,
    %c0_96 = arith.constant 0 : index
    %c3_97 = arith.constant 3 : index
    %c36_98 = arith.constant 36 : index
    %c0_99 = arith.constant 0 : index
    %58 = vector.load %arg1[%c0_96, %c3_97, %c36_98, %c0_99] : memref<1x4x144x8xf32, #tpu.memory_space<vmem>>, vector<1x1x12x8xf32>
    %59 = vector.shape_cast %58 : vector<1x1x12x8xf32> to vector<12x8xf32>
    %c57_100 = arith.constant 57 : index
    %c24_101 = arith.constant 24 : index
    %60 = vector.load %arg7[%c57_100, %c24_101] : memref<198x40xf32, #tpu.memory_space<vmem>>, vector<12x8xf32>
    tpu.vector_store %arg7[%c57_100, %c24_101], %59 {strides = array<i32>} : memref<198x40xf32, #tpu.memory_space<vmem>>, vector<12x8xf32>,
    %c0_102 = arith.constant 0 : index
    %c36_103 = arith.constant 36 : index
    %c0_104 = arith.constant 0 : index
    %61 = vector.load %arg2[%c0_102, %c36_103, %c0_104] : memref<1x144x8xf32, #tpu.memory_space<vmem>>, vector<1x12x8xf32>
    %62 = vector.shape_cast %61 : vector<1x12x8xf32> to vector<12x8xf32>
    %c57_105 = arith.constant 57 : index
    %c32_106 = arith.constant 32 : index
    %63 = vector.load %arg7[%c57_105, %c32_106] : memref<198x40xf32, #tpu.memory_space<vmem>>, vector<12x8xf32>
    tpu.vector_store %arg7[%c57_105, %c32_106], %62 {strides = array<i32>} : memref<198x40xf32, #tpu.memory_space<vmem>>, vector<12x8xf32>,
    %c0_107 = arith.constant 0 : index
    %c0_108 = arith.constant 0 : index
    %c48 = arith.constant 48 : index
    %c0_109 = arith.constant 0 : index
    %64 = vector.load %arg1[%c0_107, %c0_108, %c48, %c0_109] : memref<1x4x144x8xf32, #tpu.memory_space<vmem>>, vector<1x1x12x8xf32>
    %65 = vector.shape_cast %64 : vector<1x1x12x8xf32> to vector<12x8xf32>
    %c71 = arith.constant 71 : index
    %c0_110 = arith.constant 0 : index
    %66 = vector.load %arg7[%c71, %c0_110] : memref<198x40xf32, #tpu.memory_space<vmem>>, vector<12x8xf32>
    tpu.vector_store %arg7[%c71, %c0_110], %65 {strides = array<i32>} : memref<198x40xf32, #tpu.memory_space<vmem>>, vector<12x8xf32>,
    %c0_111 = arith.constant 0 : index
    %c1_112 = arith.constant 1 : index
    %c48_113 = arith.constant 48 : index
    %c0_114 = arith.constant 0 : index
    %67 = vector.load %arg1[%c0_111, %c1_112, %c48_113, %c0_114] : memref<1x4x144x8xf32, #tpu.memory_space<vmem>>, vector<1x1x12x8xf32>
    %68 = vector.shape_cast %67 : vector<1x1x12x8xf32> to vector<12x8xf32>
    %c71_115 = arith.constant 71 : index
    %c8_116 = arith.constant 8 : index
    %69 = vector.load %arg7[%c71_115, %c8_116] : memref<198x40xf32, #tpu.memory_space<vmem>>, vector<12x8xf32>
    tpu.vector_store %arg7[%c71_115, %c8_116], %68 {strides = array<i32>} : memref<198x40xf32, #tpu.memory_space<vmem>>, vector<12x8xf32>,
    %c0_117 = arith.constant 0 : index
    %c2_118 = arith.constant 2 : index
    %c48_119 = arith.constant 48 : index
    %c0_120 = arith.constant 0 : index
    %70 = vector.load %arg1[%c0_117, %c2_118, %c48_119, %c0_120] : memref<1x4x144x8xf32, #tpu.memory_space<vmem>>, vector<1x1x12x8xf32>
    %71 = vector.shape_cast %70 : vector<1x1x12x8xf32> to vector<12x8xf32>
    %c71_121 = arith.constant 71 : index
    %c16_122 = arith.constant 16 : index
    %72 = vector.load %arg7[%c71_121, %c16_122] : memref<198x40xf32, #tpu.memory_space<vmem>>, vector<12x8xf32>
    tpu.vector_store %arg7[%c71_121, %c16_122], %71 {strides = array<i32>} : memref<198x40xf32, #tpu.memory_space<vmem>>, vector<12x8xf32>,
    %c0_123 = arith.constant 0 : index
    %c3_124 = arith.constant 3 : index
    %c48_125 = arith.constant 48 : index
    %c0_126 = arith.constant 0 : index
    %73 = vector.load %arg1[%c0_123, %c3_124, %c48_125, %c0_126] : memref<1x4x144x8xf32, #tpu.memory_space<vmem>>, vector<1x1x12x8xf32>
    %74 = vector.shape_cast %73 : vector<1x1x12x8xf32> to vector<12x8xf32>
    %c71_127 = arith.constant 71 : index
    %c24_128 = arith.constant 24 : index
    %75 = vector.load %arg7[%c71_127, %c24_128] : memref<198x40xf32, #tpu.memory_space<vmem>>, vector<12x8xf32>
    tpu.vector_store %arg7[%c71_127, %c24_128], %74 {strides = array<i32>} : memref<198x40xf32, #tpu.memory_space<vmem>>, vector<12x8xf32>,
    %c0_129 = arith.constant 0 : index
    %c48_130 = arith.constant 48 : index
    %c0_131 = arith.constant 0 : index
    %76 = vector.load %arg2[%c0_129, %c48_130, %c0_131] : memref<1x144x8xf32, #tpu.memory_space<vmem>>, vector<1x12x8xf32>
    %77 = vector.shape_cast %76 : vector<1x12x8xf32> to vector<12x8xf32>
    %c71_132 = arith.constant 71 : index
    %c32_133 = arith.constant 32 : index
    %78 = vector.load %arg7[%c71_132, %c32_133] : memref<198x40xf32, #tpu.memory_space<vmem>>, vector<12x8xf32>
    tpu.vector_store %arg7[%c71_132, %c32_133], %77 {strides = array<i32>} : memref<198x40xf32, #tpu.memory_space<vmem>>, vector<12x8xf32>,
    %c0_134 = arith.constant 0 : index
    %c0_135 = arith.constant 0 : index
    %c60 = arith.constant 60 : index
    %c0_136 = arith.constant 0 : index
    %79 = vector.load %arg1[%c0_134, %c0_135, %c60, %c0_136] : memref<1x4x144x8xf32, #tpu.memory_space<vmem>>, vector<1x1x12x8xf32>
    %80 = vector.shape_cast %79 : vector<1x1x12x8xf32> to vector<12x8xf32>
    %c85 = arith.constant 85 : index
    %c0_137 = arith.constant 0 : index
    %81 = vector.load %arg7[%c85, %c0_137] : memref<198x40xf32, #tpu.memory_space<vmem>>, vector<12x8xf32>
    tpu.vector_store %arg7[%c85, %c0_137], %80 {strides = array<i32>} : memref<198x40xf32, #tpu.memory_space<vmem>>, vector<12x8xf32>,
    %c0_138 = arith.constant 0 : index
    %c1_139 = arith.constant 1 : index
    %c60_140 = arith.constant 60 : index
    %c0_141 = arith.constant 0 : index
    %82 = vector.load %arg1[%c0_138, %c1_139, %c60_140, %c0_141] : memref<1x4x144x8xf32, #tpu.memory_space<vmem>>, vector<1x1x12x8xf32>
    %83 = vector.shape_cast %82 : vector<1x1x12x8xf32> to vector<12x8xf32>
    %c85_142 = arith.constant 85 : index
    %c8_143 = arith.constant 8 : index
    %84 = vector.load %arg7[%c85_142, %c8_143] : memref<198x40xf32, #tpu.memory_space<vmem>>, vector<12x8xf32>
    tpu.vector_store %arg7[%c85_142, %c8_143], %83 {strides = array<i32>} : memref<198x40xf32, #tpu.memory_space<vmem>>, vector<12x8xf32>,
    %c0_144 = arith.constant 0 : index
    %c2_145 = arith.constant 2 : index
    %c60_146 = arith.constant 60 : index
    %c0_147 = arith.constant 0 : index
    %85 = vector.load %arg1[%c0_144, %c2_145, %c60_146, %c0_147] : memref<1x4x144x8xf32, #tpu.memory_space<vmem>>, vector<1x1x12x8xf32>
    %86 = vector.shape_cast %85 : vector<1x1x12x8xf32> to vector<12x8xf32>
    %c85_148 = arith.constant 85 : index
    %c16_149 = arith.constant 16 : index
    %87 = vector.load %arg7[%c85_148, %c16_149] : memref<198x40xf32, #tpu.memory_space<vmem>>, vector<12x8xf32>
    tpu.vector_store %arg7[%c85_148, %c16_149], %86 {strides = array<i32>} : memref<198x40xf32, #tpu.memory_space<vmem>>, vector<12x8xf32>,
    %c0_150 = arith.constant 0 : index
    %c3_151 = arith.constant 3 : index
    %c60_152 = arith.constant 60 : index
    %c0_153 = arith.constant 0 : index
    %88 = vector.load %arg1[%c0_150, %c3_151, %c60_152, %c0_153] : memref<1x4x144x8xf32, #tpu.memory_space<vmem>>, vector<1x1x12x8xf32>
    %89 = vector.shape_cast %88 : vector<1x1x12x8xf32> to vector<12x8xf32>
    %c85_154 = arith.constant 85 : index
    %c24_155 = arith.constant 24 : index
    %90 = vector.load %arg7[%c85_154, %c24_155] : memref<198x40xf32, #tpu.memory_space<vmem>>, vector<12x8xf32>
    tpu.vector_store %arg7[%c85_154, %c24_155], %89 {strides = array<i32>} : memref<198x40xf32, #tpu.memory_space<vmem>>, vector<12x8xf32>,
    %c0_156 = arith.constant 0 : index
    %c60_157 = arith.constant 60 : index
    %c0_158 = arith.constant 0 : index
    %91 = vector.load %arg2[%c0_156, %c60_157, %c0_158] : memref<1x144x8xf32, #tpu.memory_space<vmem>>, vector<1x12x8xf32>
    %92 = vector.shape_cast %91 : vector<1x12x8xf32> to vector<12x8xf32>
    %c85_159 = arith.constant 85 : index
    %c32_160 = arith.constant 32 : index
    %93 = vector.load %arg7[%c85_159, %c32_160] : memref<198x40xf32, #tpu.memory_space<vmem>>, vector<12x8xf32>
    tpu.vector_store %arg7[%c85_159, %c32_160], %92 {strides = array<i32>} : memref<198x40xf32, #tpu.memory_space<vmem>>, vector<12x8xf32>,
    %c0_161 = arith.constant 0 : index
    %c0_162 = arith.constant 0 : index
    %c72 = arith.constant 72 : index
    %c0_163 = arith.constant 0 : index
    %94 = vector.load %arg1[%c0_161, %c0_162, %c72, %c0_163] : memref<1x4x144x8xf32, #tpu.memory_space<vmem>>, vector<1x1x12x8xf32>
    %95 = vector.shape_cast %94 : vector<1x1x12x8xf32> to vector<12x8xf32>
    %c99 = arith.constant 99 : index
    %c0_164 = arith.constant 0 : index
    %96 = vector.load %arg7[%c99, %c0_164] : memref<198x40xf32, #tpu.memory_space<vmem>>, vector<12x8xf32>
    tpu.vector_store %arg7[%c99, %c0_164], %95 {strides = array<i32>} : memref<198x40xf32, #tpu.memory_space<vmem>>, vector<12x8xf32>,
    %c0_165 = arith.constant 0 : index
    %c1_166 = arith.constant 1 : index
    %c72_167 = arith.constant 72 : index
    %c0_168 = arith.constant 0 : index
    %97 = vector.load %arg1[%c0_165, %c1_166, %c72_167, %c0_168] : memref<1x4x144x8xf32, #tpu.memory_space<vmem>>, vector<1x1x12x8xf32>
    %98 = vector.shape_cast %97 : vector<1x1x12x8xf32> to vector<12x8xf32>
    %c99_169 = arith.constant 99 : index
    %c8_170 = arith.constant 8 : index
    %99 = vector.load %arg7[%c99_169, %c8_170] : memref<198x40xf32, #tpu.memory_space<vmem>>, vector<12x8xf32>
    tpu.vector_store %arg7[%c99_169, %c8_170], %98 {strides = array<i32>} : memref<198x40xf32, #tpu.memory_space<vmem>>, vector<12x8xf32>,
    %c0_171 = arith.constant 0 : index
    %c2_172 = arith.constant 2 : index
    %c72_173 = arith.constant 72 : index
    %c0_174 = arith.constant 0 : index
    %100 = vector.load %arg1[%c0_171, %c2_172, %c72_173, %c0_174] : memref<1x4x144x8xf32, #tpu.memory_space<vmem>>, vector<1x1x12x8xf32>
    %101 = vector.shape_cast %100 : vector<1x1x12x8xf32> to vector<12x8xf32>
    %c99_175 = arith.constant 99 : index
    %c16_176 = arith.constant 16 : index
    %102 = vector.load %arg7[%c99_175, %c16_176] : memref<198x40xf32, #tpu.memory_space<vmem>>, vector<12x8xf32>
    tpu.vector_store %arg7[%c99_175, %c16_176], %101 {strides = array<i32>} : memref<198x40xf32, #tpu.memory_space<vmem>>, vector<12x8xf32>,
    %c0_177 = arith.constant 0 : index
    %c3_178 = arith.constant 3 : index
    %c72_179 = arith.constant 72 : index
    %c0_180 = arith.constant 0 : index
    %103 = vector.load %arg1[%c0_177, %c3_178, %c72_179, %c0_180] : memref<1x4x144x8xf32, #tpu.memory_space<vmem>>, vector<1x1x12x8xf32>
    %104 = vector.shape_cast %103 : vector<1x1x12x8xf32> to vector<12x8xf32>
    %c99_181 = arith.constant 99 : index
    %c24_182 = arith.constant 24 : index
    %105 = vector.load %arg7[%c99_181, %c24_182] : memref<198x40xf32, #tpu.memory_space<vmem>>, vector<12x8xf32>
    tpu.vector_store %arg7[%c99_181, %c24_182], %104 {strides = array<i32>} : memref<198x40xf32, #tpu.memory_space<vmem>>, vector<12x8xf32>,
    %c0_183 = arith.constant 0 : index
    %c72_184 = arith.constant 72 : index
    %c0_185 = arith.constant 0 : index
    %106 = vector.load %arg2[%c0_183, %c72_184, %c0_185] : memref<1x144x8xf32, #tpu.memory_space<vmem>>, vector<1x12x8xf32>
    %107 = vector.shape_cast %106 : vector<1x12x8xf32> to vector<12x8xf32>
    %c99_186 = arith.constant 99 : index
    %c32_187 = arith.constant 32 : index
    %108 = vector.load %arg7[%c99_186, %c32_187] : memref<198x40xf32, #tpu.memory_space<vmem>>, vector<12x8xf32>
    tpu.vector_store %arg7[%c99_186, %c32_187], %107 {strides = array<i32>} : memref<198x40xf32, #tpu.memory_space<vmem>>, vector<12x8xf32>,
    %c0_188 = arith.constant 0 : index
    %c0_189 = arith.constant 0 : index
    %c84 = arith.constant 84 : index
    %c0_190 = arith.constant 0 : index
    %109 = vector.load %arg1[%c0_188, %c0_189, %c84, %c0_190] : memref<1x4x144x8xf32, #tpu.memory_space<vmem>>, vector<1x1x12x8xf32>
    %110 = vector.shape_cast %109 : vector<1x1x12x8xf32> to vector<12x8xf32>
    %c113 = arith.constant 113 : index
    %c0_191 = arith.constant 0 : index
    %111 = vector.load %arg7[%c113, %c0_191] : memref<198x40xf32, #tpu.memory_space<vmem>>, vector<12x8xf32>
    tpu.vector_store %arg7[%c113, %c0_191], %110 {strides = array<i32>} : memref<198x40xf32, #tpu.memory_space<vmem>>, vector<12x8xf32>,
    %c0_192 = arith.constant 0 : index
    %c1_193 = arith.constant 1 : index
    %c84_194 = arith.constant 84 : index
    %c0_195 = arith.constant 0 : index
    %112 = vector.load %arg1[%c0_192, %c1_193, %c84_194, %c0_195] : memref<1x4x144x8xf32, #tpu.memory_space<vmem>>, vector<1x1x12x8xf32>
    %113 = vector.shape_cast %112 : vector<1x1x12x8xf32> to vector<12x8xf32>
    %c113_196 = arith.constant 113 : index
    %c8_197 = arith.constant 8 : index
    %114 = vector.load %arg7[%c113_196, %c8_197] : memref<198x40xf32, #tpu.memory_space<vmem>>, vector<12x8xf32>
    tpu.vector_store %arg7[%c113_196, %c8_197], %113 {strides = array<i32>} : memref<198x40xf32, #tpu.memory_space<vmem>>, vector<12x8xf32>,
    %c0_198 = arith.constant 0 : index
    %c2_199 = arith.constant 2 : index
    %c84_200 = arith.constant 84 : index
    %c0_201 = arith.constant 0 : index
    %115 = vector.load %arg1[%c0_198, %c2_199, %c84_200, %c0_201] : memref<1x4x144x8xf32, #tpu.memory_space<vmem>>, vector<1x1x12x8xf32>
    %116 = vector.shape_cast %115 : vector<1x1x12x8xf32> to vector<12x8xf32>
    %c113_202 = arith.constant 113 : index
    %c16_203 = arith.constant 16 : index
    %117 = vector.load %arg7[%c113_202, %c16_203] : memref<198x40xf32, #tpu.memory_space<vmem>>, vector<12x8xf32>
    tpu.vector_store %arg7[%c113_202, %c16_203], %116 {strides = array<i32>} : memref<198x40xf32, #tpu.memory_space<vmem>>, vector<12x8xf32>,
    %c0_204 = arith.constant 0 : index
    %c3_205 = arith.constant 3 : index
    %c84_206 = arith.constant 84 : index
    %c0_207 = arith.constant 0 : index
    %118 = vector.load %arg1[%c0_204, %c3_205, %c84_206, %c0_207] : memref<1x4x144x8xf32, #tpu.memory_space<vmem>>, vector<1x1x12x8xf32>
    %119 = vector.shape_cast %118 : vector<1x1x12x8xf32> to vector<12x8xf32>
    %c113_208 = arith.constant 113 : index
    %c24_209 = arith.constant 24 : index
    %120 = vector.load %arg7[%c113_208, %c24_209] : memref<198x40xf32, #tpu.memory_space<vmem>>, vector<12x8xf32>
    tpu.vector_store %arg7[%c113_208, %c24_209], %119 {strides = array<i32>} : memref<198x40xf32, #tpu.memory_space<vmem>>, vector<12x8xf32>,
    %c0_210 = arith.constant 0 : index
    %c84_211 = arith.constant 84 : index
    %c0_212 = arith.constant 0 : index
    %121 = vector.load %arg2[%c0_210, %c84_211, %c0_212] : memref<1x144x8xf32, #tpu.memory_space<vmem>>, vector<1x12x8xf32>
    %122 = vector.shape_cast %121 : vector<1x12x8xf32> to vector<12x8xf32>
    %c113_213 = arith.constant 113 : index
    %c32_214 = arith.constant 32 : index
    %123 = vector.load %arg7[%c113_213, %c32_214] : memref<198x40xf32, #tpu.memory_space<vmem>>, vector<12x8xf32>
    tpu.vector_store %arg7[%c113_213, %c32_214], %122 {strides = array<i32>} : memref<198x40xf32, #tpu.memory_space<vmem>>, vector<12x8xf32>,
    %c0_215 = arith.constant 0 : index
    %c0_216 = arith.constant 0 : index
    %c96 = arith.constant 96 : index
    %c0_217 = arith.constant 0 : index
    %124 = vector.load %arg1[%c0_215, %c0_216, %c96, %c0_217] : memref<1x4x144x8xf32, #tpu.memory_space<vmem>>, vector<1x1x12x8xf32>
    %125 = vector.shape_cast %124 : vector<1x1x12x8xf32> to vector<12x8xf32>
    %c127 = arith.constant 127 : index
    %c0_218 = arith.constant 0 : index
    %126 = vector.load %arg7[%c127, %c0_218] : memref<198x40xf32, #tpu.memory_space<vmem>>, vector<12x8xf32>
    tpu.vector_store %arg7[%c127, %c0_218], %125 {strides = array<i32>} : memref<198x40xf32, #tpu.memory_space<vmem>>, vector<12x8xf32>,
    %c0_219 = arith.constant 0 : index
    %c1_220 = arith.constant 1 : index
    %c96_221 = arith.constant 96 : index
    %c0_222 = arith.constant 0 : index
    %127 = vector.load %arg1[%c0_219, %c1_220, %c96_221, %c0_222] : memref<1x4x144x8xf32, #tpu.memory_space<vmem>>, vector<1x1x12x8xf32>
    %128 = vector.shape_cast %127 : vector<1x1x12x8xf32> to vector<12x8xf32>
    %c127_223 = arith.constant 127 : index
    %c8_224 = arith.constant 8 : index
    %129 = vector.load %arg7[%c127_223, %c8_224] : memref<198x40xf32, #tpu.memory_space<vmem>>, vector<12x8xf32>
    tpu.vector_store %arg7[%c127_223, %c8_224], %128 {strides = array<i32>} : memref<198x40xf32, #tpu.memory_space<vmem>>, vector<12x8xf32>,
    %c0_225 = arith.constant 0 : index
    %c2_226 = arith.constant 2 : index
    %c96_227 = arith.constant 96 : index
    %c0_228 = arith.constant 0 : index
    %130 = vector.load %arg1[%c0_225, %c2_226, %c96_227, %c0_228] : memref<1x4x144x8xf32, #tpu.memory_space<vmem>>, vector<1x1x12x8xf32>
    %131 = vector.shape_cast %130 : vector<1x1x12x8xf32> to vector<12x8xf32>
    %c127_229 = arith.constant 127 : index
    %c16_230 = arith.constant 16 : index
    %132 = vector.load %arg7[%c127_229, %c16_230] : memref<198x40xf32, #tpu.memory_space<vmem>>, vector<12x8xf32>
    tpu.vector_store %arg7[%c127_229, %c16_230], %131 {strides = array<i32>} : memref<198x40xf32, #tpu.memory_space<vmem>>, vector<12x8xf32>,
    %c0_231 = arith.constant 0 : index
    %c3_232 = arith.constant 3 : index
    %c96_233 = arith.constant 96 : index
    %c0_234 = arith.constant 0 : index
    %133 = vector.load %arg1[%c0_231, %c3_232, %c96_233, %c0_234] : memref<1x4x144x8xf32, #tpu.memory_space<vmem>>, vector<1x1x12x8xf32>
    %134 = vector.shape_cast %133 : vector<1x1x12x8xf32> to vector<12x8xf32>
    %c127_235 = arith.constant 127 : index
    %c24_236 = arith.constant 24 : index
    %135 = vector.load %arg7[%c127_235, %c24_236] : memref<198x40xf32, #tpu.memory_space<vmem>>, vector<12x8xf32>
    tpu.vector_store %arg7[%c127_235, %c24_236], %134 {strides = array<i32>} : memref<198x40xf32, #tpu.memory_space<vmem>>, vector<12x8xf32>,
    %c0_237 = arith.constant 0 : index
    %c96_238 = arith.constant 96 : index
    %c0_239 = arith.constant 0 : index
    %136 = vector.load %arg2[%c0_237, %c96_238, %c0_239] : memref<1x144x8xf32, #tpu.memory_space<vmem>>, vector<1x12x8xf32>
    %137 = vector.shape_cast %136 : vector<1x12x8xf32> to vector<12x8xf32>
    %c127_240 = arith.constant 127 : index
    %c32_241 = arith.constant 32 : index
    %138 = vector.load %arg7[%c127_240, %c32_241] : memref<198x40xf32, #tpu.memory_space<vmem>>, vector<12x8xf32>
    tpu.vector_store %arg7[%c127_240, %c32_241], %137 {strides = array<i32>} : memref<198x40xf32, #tpu.memory_space<vmem>>, vector<12x8xf32>,
    %c0_242 = arith.constant 0 : index
    %c0_243 = arith.constant 0 : index
    %c108 = arith.constant 108 : index
    %c0_244 = arith.constant 0 : index
    %139 = vector.load %arg1[%c0_242, %c0_243, %c108, %c0_244] : memref<1x4x144x8xf32, #tpu.memory_space<vmem>>, vector<1x1x12x8xf32>
    %140 = vector.shape_cast %139 : vector<1x1x12x8xf32> to vector<12x8xf32>
    %c141 = arith.constant 141 : index
    %c0_245 = arith.constant 0 : index
    %141 = vector.load %arg7[%c141, %c0_245] : memref<198x40xf32, #tpu.memory_space<vmem>>, vector<12x8xf32>
    tpu.vector_store %arg7[%c141, %c0_245], %140 {strides = array<i32>} : memref<198x40xf32, #tpu.memory_space<vmem>>, vector<12x8xf32>,
    %c0_246 = arith.constant 0 : index
    %c1_247 = arith.constant 1 : index
    %c108_248 = arith.constant 108 : index
    %c0_249 = arith.constant 0 : index
    %142 = vector.load %arg1[%c0_246, %c1_247, %c108_248, %c0_249] : memref<1x4x144x8xf32, #tpu.memory_space<vmem>>, vector<1x1x12x8xf32>
    %143 = vector.shape_cast %142 : vector<1x1x12x8xf32> to vector<12x8xf32>
    %c141_250 = arith.constant 141 : index
    %c8_251 = arith.constant 8 : index
    %144 = vector.load %arg7[%c141_250, %c8_251] : memref<198x40xf32, #tpu.memory_space<vmem>>, vector<12x8xf32>
    tpu.vector_store %arg7[%c141_250, %c8_251], %143 {strides = array<i32>} : memref<198x40xf32, #tpu.memory_space<vmem>>, vector<12x8xf32>,
    %c0_252 = arith.constant 0 : index
    %c2_253 = arith.constant 2 : index
    %c108_254 = arith.constant 108 : index
    %c0_255 = arith.constant 0 : index
    %145 = vector.load %arg1[%c0_252, %c2_253, %c108_254, %c0_255] : memref<1x4x144x8xf32, #tpu.memory_space<vmem>>, vector<1x1x12x8xf32>
    %146 = vector.shape_cast %145 : vector<1x1x12x8xf32> to vector<12x8xf32>
    %c141_256 = arith.constant 141 : index
    %c16_257 = arith.constant 16 : index
    %147 = vector.load %arg7[%c141_256, %c16_257] : memref<198x40xf32, #tpu.memory_space<vmem>>, vector<12x8xf32>
    tpu.vector_store %arg7[%c141_256, %c16_257], %146 {strides = array<i32>} : memref<198x40xf32, #tpu.memory_space<vmem>>, vector<12x8xf32>,
    %c0_258 = arith.constant 0 : index
    %c3_259 = arith.constant 3 : index
    %c108_260 = arith.constant 108 : index
    %c0_261 = arith.constant 0 : index
    %148 = vector.load %arg1[%c0_258, %c3_259, %c108_260, %c0_261] : memref<1x4x144x8xf32, #tpu.memory_space<vmem>>, vector<1x1x12x8xf32>
    %149 = vector.shape_cast %148 : vector<1x1x12x8xf32> to vector<12x8xf32>
    %c141_262 = arith.constant 141 : index
    %c24_263 = arith.constant 24 : index
    %150 = vector.load %arg7[%c141_262, %c24_263] : memref<198x40xf32, #tpu.memory_space<vmem>>, vector<12x8xf32>
    tpu.vector_store %arg7[%c141_262, %c24_263], %149 {strides = array<i32>} : memref<198x40xf32, #tpu.memory_space<vmem>>, vector<12x8xf32>,
    %c0_264 = arith.constant 0 : index
    %c108_265 = arith.constant 108 : index
    %c0_266 = arith.constant 0 : index
    %151 = vector.load %arg2[%c0_264, %c108_265, %c0_266] : memref<1x144x8xf32, #tpu.memory_space<vmem>>, vector<1x12x8xf32>
    %152 = vector.shape_cast %151 : vector<1x12x8xf32> to vector<12x8xf32>
    %c141_267 = arith.constant 141 : index
    %c32_268 = arith.constant 32 : index
    %153 = vector.load %arg7[%c141_267, %c32_268] : memref<198x40xf32, #tpu.memory_space<vmem>>, vector<12x8xf32>
    tpu.vector_store %arg7[%c141_267, %c32_268], %152 {strides = array<i32>} : memref<198x40xf32, #tpu.memory_space<vmem>>, vector<12x8xf32>,
    %c0_269 = arith.constant 0 : index
    %c0_270 = arith.constant 0 : index
    %c120 = arith.constant 120 : index
    %c0_271 = arith.constant 0 : index
    %154 = vector.load %arg1[%c0_269, %c0_270, %c120, %c0_271] : memref<1x4x144x8xf32, #tpu.memory_space<vmem>>, vector<1x1x12x8xf32>
    %155 = vector.shape_cast %154 : vector<1x1x12x8xf32> to vector<12x8xf32>
    %c155 = arith.constant 155 : index
    %c0_272 = arith.constant 0 : index
    %156 = vector.load %arg7[%c155, %c0_272] : memref<198x40xf32, #tpu.memory_space<vmem>>, vector<12x8xf32>
    tpu.vector_store %arg7[%c155, %c0_272], %155 {strides = array<i32>} : memref<198x40xf32, #tpu.memory_space<vmem>>, vector<12x8xf32>,
    %c0_273 = arith.constant 0 : index
    %c1_274 = arith.constant 1 : index
    %c120_275 = arith.constant 120 : index
    %c0_276 = arith.constant 0 : index
    %157 = vector.load %arg1[%c0_273, %c1_274, %c120_275, %c0_276] : memref<1x4x144x8xf32, #tpu.memory_space<vmem>>, vector<1x1x12x8xf32>
    %158 = vector.shape_cast %157 : vector<1x1x12x8xf32> to vector<12x8xf32>
    %c155_277 = arith.constant 155 : index
    %c8_278 = arith.constant 8 : index
    %159 = vector.load %arg7[%c155_277, %c8_278] : memref<198x40xf32, #tpu.memory_space<vmem>>, vector<12x8xf32>
    tpu.vector_store %arg7[%c155_277, %c8_278], %158 {strides = array<i32>} : memref<198x40xf32, #tpu.memory_space<vmem>>, vector<12x8xf32>,
    %c0_279 = arith.constant 0 : index
    %c2_280 = arith.constant 2 : index
    %c120_281 = arith.constant 120 : index
    %c0_282 = arith.constant 0 : index
    %160 = vector.load %arg1[%c0_279, %c2_280, %c120_281, %c0_282] : memref<1x4x144x8xf32, #tpu.memory_space<vmem>>, vector<1x1x12x8xf32>
    %161 = vector.shape_cast %160 : vector<1x1x12x8xf32> to vector<12x8xf32>
    %c155_283 = arith.constant 155 : index
    %c16_284 = arith.constant 16 : index
    %162 = vector.load %arg7[%c155_283, %c16_284] : memref<198x40xf32, #tpu.memory_space<vmem>>, vector<12x8xf32>
    tpu.vector_store %arg7[%c155_283, %c16_284], %161 {strides = array<i32>} : memref<198x40xf32, #tpu.memory_space<vmem>>, vector<12x8xf32>,
    %c0_285 = arith.constant 0 : index
    %c3_286 = arith.constant 3 : index
    %c120_287 = arith.constant 120 : index
    %c0_288 = arith.constant 0 : index
    %163 = vector.load %arg1[%c0_285, %c3_286, %c120_287, %c0_288] : memref<1x4x144x8xf32, #tpu.memory_space<vmem>>, vector<1x1x12x8xf32>
    %164 = vector.shape_cast %163 : vector<1x1x12x8xf32> to vector<12x8xf32>
    %c155_289 = arith.constant 155 : index
    %c24_290 = arith.constant 24 : index
    %165 = vector.load %arg7[%c155_289, %c24_290] : memref<198x40xf32, #tpu.memory_space<vmem>>, vector<12x8xf32>
    tpu.vector_store %arg7[%c155_289, %c24_290], %164 {strides = array<i32>} : memref<198x40xf32, #tpu.memory_space<vmem>>, vector<12x8xf32>,
    %c0_291 = arith.constant 0 : index
    %c120_292 = arith.constant 120 : index
    %c0_293 = arith.constant 0 : index
    %166 = vector.load %arg2[%c0_291, %c120_292, %c0_293] : memref<1x144x8xf32, #tpu.memory_space<vmem>>, vector<1x12x8xf32>
    %167 = vector.shape_cast %166 : vector<1x12x8xf32> to vector<12x8xf32>
    %c155_294 = arith.constant 155 : index
    %c32_295 = arith.constant 32 : index
    %168 = vector.load %arg7[%c155_294, %c32_295] : memref<198x40xf32, #tpu.memory_space<vmem>>, vector<12x8xf32>
    tpu.vector_store %arg7[%c155_294, %c32_295], %167 {strides = array<i32>} : memref<198x40xf32, #tpu.memory_space<vmem>>, vector<12x8xf32>,
    %c0_296 = arith.constant 0 : index
    %c0_297 = arith.constant 0 : index
    %c132 = arith.constant 132 : index
    %c0_298 = arith.constant 0 : index
    %169 = vector.load %arg1[%c0_296, %c0_297, %c132, %c0_298] : memref<1x4x144x8xf32, #tpu.memory_space<vmem>>, vector<1x1x12x8xf32>
    %170 = vector.shape_cast %169 : vector<1x1x12x8xf32> to vector<12x8xf32>
    %c169 = arith.constant 169 : index
    %c0_299 = arith.constant 0 : index
    %171 = vector.load %arg7[%c169, %c0_299] : memref<198x40xf32, #tpu.memory_space<vmem>>, vector<12x8xf32>
    tpu.vector_store %arg7[%c169, %c0_299], %170 {strides = array<i32>} : memref<198x40xf32, #tpu.memory_space<vmem>>, vector<12x8xf32>,
    %c0_300 = arith.constant 0 : index
    %c1_301 = arith.constant 1 : index
    %c132_302 = arith.constant 132 : index
    %c0_303 = arith.constant 0 : index
    %172 = vector.load %arg1[%c0_300, %c1_301, %c132_302, %c0_303] : memref<1x4x144x8xf32, #tpu.memory_space<vmem>>, vector<1x1x12x8xf32>
    %173 = vector.shape_cast %172 : vector<1x1x12x8xf32> to vector<12x8xf32>
    %c169_304 = arith.constant 169 : index
    %c8_305 = arith.constant 8 : index
    %174 = vector.load %arg7[%c169_304, %c8_305] : memref<198x40xf32, #tpu.memory_space<vmem>>, vector<12x8xf32>
    tpu.vector_store %arg7[%c169_304, %c8_305], %173 {strides = array<i32>} : memref<198x40xf32, #tpu.memory_space<vmem>>, vector<12x8xf32>,
    %c0_306 = arith.constant 0 : index
    %c2_307 = arith.constant 2 : index
    %c132_308 = arith.constant 132 : index
    %c0_309 = arith.constant 0 : index
    %175 = vector.load %arg1[%c0_306, %c2_307, %c132_308, %c0_309] : memref<1x4x144x8xf32, #tpu.memory_space<vmem>>, vector<1x1x12x8xf32>
    %176 = vector.shape_cast %175 : vector<1x1x12x8xf32> to vector<12x8xf32>
    %c169_310 = arith.constant 169 : index
    %c16_311 = arith.constant 16 : index
    %177 = vector.load %arg7[%c169_310, %c16_311] : memref<198x40xf32, #tpu.memory_space<vmem>>, vector<12x8xf32>
    tpu.vector_store %arg7[%c169_310, %c16_311], %176 {strides = array<i32>} : memref<198x40xf32, #tpu.memory_space<vmem>>, vector<12x8xf32>,
    %c0_312 = arith.constant 0 : index
    %c3_313 = arith.constant 3 : index
    %c132_314 = arith.constant 132 : index
    %c0_315 = arith.constant 0 : index
    %178 = vector.load %arg1[%c0_312, %c3_313, %c132_314, %c0_315] : memref<1x4x144x8xf32, #tpu.memory_space<vmem>>, vector<1x1x12x8xf32>
    %179 = vector.shape_cast %178 : vector<1x1x12x8xf32> to vector<12x8xf32>
    %c169_316 = arith.constant 169 : index
    %c24_317 = arith.constant 24 : index
    %180 = vector.load %arg7[%c169_316, %c24_317] : memref<198x40xf32, #tpu.memory_space<vmem>>, vector<12x8xf32>
    tpu.vector_store %arg7[%c169_316, %c24_317], %179 {strides = array<i32>} : memref<198x40xf32, #tpu.memory_space<vmem>>, vector<12x8xf32>,
    %c0_318 = arith.constant 0 : index
    %c132_319 = arith.constant 132 : index
    %c0_320 = arith.constant 0 : index
    %181 = vector.load %arg2[%c0_318, %c132_319, %c0_320] : memref<1x144x8xf32, #tpu.memory_space<vmem>>, vector<1x12x8xf32>
    %182 = vector.shape_cast %181 : vector<1x12x8xf32> to vector<12x8xf32>
    %c169_321 = arith.constant 169 : index
    %c32_322 = arith.constant 32 : index
    %183 = vector.load %arg7[%c169_321, %c32_322] : memref<198x40xf32, #tpu.memory_space<vmem>>, vector<12x8xf32>
    tpu.vector_store %arg7[%c169_321, %c32_322], %182 {strides = array<i32>} : memref<198x40xf32, #tpu.memory_space<vmem>>, vector<12x8xf32>,
    %c0_323 = arith.constant 0 : index
    %c0_324 = arith.constant 0 : index
    %184 = vector.load %arg7[%c0_323, %c0_324] : memref<198x40xf32, #tpu.memory_space<vmem>>, vector<168x40xf32>
    %c0_325 = arith.constant 0 : index
    %c0_326 = arith.constant 0 : index
    %185 = vector.load %arg8[%c0_325, %c0_326] : memref<168x8xf32, #tpu.memory_space<vmem>>, vector<168x8xf32>
    %c0_327 = arith.constant 0 : index
    %c0_328 = arith.constant 0 : index
    %c0_329 = arith.constant 0 : index
    %186 = vector.load %arg3[%c0_327, %c0_328, %c0_329] : memref<9x40x8xf32, #tpu.memory_space<vmem>>, vector<1x40x8xf32>
    %187 = vector.shape_cast %186 : vector<1x40x8xf32> to vector<40x8xf32>
    %cst_330 = arith.constant dense<0.000000e+00> : vector<168x8xf32>
    %188 = tpu.matmul %184, %187, %cst_330 {dimension_numbers = #tpu.dot_dimension_numbers<[1], [0], [0], [1], [0, 0, 1, 1], [], []>} : vector<168x40xf32>, vector<40x8xf32>, vector<168x8xf32> -> vector<168x8xf32>
    %189 = arith.addf %185, %188 : vector<168x8xf32>
    %c0_331 = arith.constant 0 : index
    %c0_332 = arith.constant 0 : index
    %190 = vector.load %arg8[%c0_331, %c0_332] : memref<168x8xf32, #tpu.memory_space<vmem>>, vector<168x8xf32>
    tpu.vector_store %arg8[%c0_331, %c0_332], %189 {strides = array<i32>} : memref<168x8xf32, #tpu.memory_space<vmem>>, vector<168x8xf32>,
    %c1_333 = arith.constant 1 : index
    %c0_334 = arith.constant 0 : index
    %191 = vector.load %arg7[%c1_333, %c0_334] : memref<198x40xf32, #tpu.memory_space<vmem>>, vector<168x40xf32>
    %c0_335 = arith.constant 0 : index
    %c0_336 = arith.constant 0 : index
    %192 = vector.load %arg8[%c0_335, %c0_336] : memref<168x8xf32, #tpu.memory_space<vmem>>, vector<168x8xf32>
    %c1_337 = arith.constant 1 : index
    %c0_338 = arith.constant 0 : index
    %c0_339 = arith.constant 0 : index
    %193 = vector.load %arg3[%c1_337, %c0_338, %c0_339] : memref<9x40x8xf32, #tpu.memory_space<vmem>>, vector<1x40x8xf32>
    %194 = vector.shape_cast %193 : vector<1x40x8xf32> to vector<40x8xf32>
    %cst_340 = arith.constant dense<0.000000e+00> : vector<168x8xf32>
    %195 = tpu.matmul %191, %194, %cst_340 {dimension_numbers = #tpu.dot_dimension_numbers<[1], [0], [0], [1], [0, 0, 1, 1], [], []>} : vector<168x40xf32>, vector<40x8xf32>, vector<168x8xf32> -> vector<168x8xf32>
    %196 = arith.addf %192, %195 : vector<168x8xf32>
    %c0_341 = arith.constant 0 : index
    %c0_342 = arith.constant 0 : index
    %197 = vector.load %arg8[%c0_341, %c0_342] : memref<168x8xf32, #tpu.memory_space<vmem>>, vector<168x8xf32>
    tpu.vector_store %arg8[%c0_341, %c0_342], %196 {strides = array<i32>} : memref<168x8xf32, #tpu.memory_space<vmem>>, vector<168x8xf32>,
    %c2_343 = arith.constant 2 : index
    %c0_344 = arith.constant 0 : index
    %198 = vector.load %arg7[%c2_343, %c0_344] : memref<198x40xf32, #tpu.memory_space<vmem>>, vector<168x40xf32>
    %c0_345 = arith.constant 0 : index
    %c0_346 = arith.constant 0 : index
    %199 = vector.load %arg8[%c0_345, %c0_346] : memref<168x8xf32, #tpu.memory_space<vmem>>, vector<168x8xf32>
    %c2_347 = arith.constant 2 : index
    %c0_348 = arith.constant 0 : index
    %c0_349 = arith.constant 0 : index
    %200 = vector.load %arg3[%c2_347, %c0_348, %c0_349] : memref<9x40x8xf32, #tpu.memory_space<vmem>>, vector<1x40x8xf32>
    %201 = vector.shape_cast %200 : vector<1x40x8xf32> to vector<40x8xf32>
    %cst_350 = arith.constant dense<0.000000e+00> : vector<168x8xf32>
    %202 = tpu.matmul %198, %201, %cst_350 {dimension_numbers = #tpu.dot_dimension_numbers<[1], [0], [0], [1], [0, 0, 1, 1], [], []>} : vector<168x40xf32>, vector<40x8xf32>, vector<168x8xf32> -> vector<168x8xf32>
    %203 = arith.addf %199, %202 : vector<168x8xf32>
    %c0_351 = arith.constant 0 : index
    %c0_352 = arith.constant 0 : index
    %204 = vector.load %arg8[%c0_351, %c0_352] : memref<168x8xf32, #tpu.memory_space<vmem>>, vector<168x8xf32>
    tpu.vector_store %arg8[%c0_351, %c0_352], %203 {strides = array<i32>} : memref<168x8xf32, #tpu.memory_space<vmem>>, vector<168x8xf32>,
    %c14 = arith.constant 14 : index
    %c0_353 = arith.constant 0 : index
    %205 = vector.load %arg7[%c14, %c0_353] : memref<198x40xf32, #tpu.memory_space<vmem>>, vector<168x40xf32>
    %c0_354 = arith.constant 0 : index
    %c0_355 = arith.constant 0 : index
    %206 = vector.load %arg8[%c0_354, %c0_355] : memref<168x8xf32, #tpu.memory_space<vmem>>, vector<168x8xf32>
    %c3_356 = arith.constant 3 : index
    %c0_357 = arith.constant 0 : index
    %c0_358 = arith.constant 0 : index
    %207 = vector.load %arg3[%c3_356, %c0_357, %c0_358] : memref<9x40x8xf32, #tpu.memory_space<vmem>>, vector<1x40x8xf32>
    %208 = vector.shape_cast %207 : vector<1x40x8xf32> to vector<40x8xf32>
    %cst_359 = arith.constant dense<0.000000e+00> : vector<168x8xf32>
    %209 = tpu.matmul %205, %208, %cst_359 {dimension_numbers = #tpu.dot_dimension_numbers<[1], [0], [0], [1], [0, 0, 1, 1], [], []>} : vector<168x40xf32>, vector<40x8xf32>, vector<168x8xf32> -> vector<168x8xf32>
    %210 = arith.addf %206, %209 : vector<168x8xf32>
    %c0_360 = arith.constant 0 : index
    %c0_361 = arith.constant 0 : index
    %211 = vector.load %arg8[%c0_360, %c0_361] : memref<168x8xf32, #tpu.memory_space<vmem>>, vector<168x8xf32>
    tpu.vector_store %arg8[%c0_360, %c0_361], %210 {strides = array<i32>} : memref<168x8xf32, #tpu.memory_space<vmem>>, vector<168x8xf32>,
    %c15_362 = arith.constant 15 : index
    %c0_363 = arith.constant 0 : index
    %212 = vector.load %arg7[%c15_362, %c0_363] : memref<198x40xf32, #tpu.memory_space<vmem>>, vector<168x40xf32>
    %c0_364 = arith.constant 0 : index
    %c0_365 = arith.constant 0 : index
    %213 = vector.load %arg8[%c0_364, %c0_365] : memref<168x8xf32, #tpu.memory_space<vmem>>, vector<168x8xf32>
    %c4 = arith.constant 4 : index
    %c0_366 = arith.constant 0 : index
    %c0_367 = arith.constant 0 : index
    %214 = vector.load %arg3[%c4, %c0_366, %c0_367] : memref<9x40x8xf32, #tpu.memory_space<vmem>>, vector<1x40x8xf32>
    %215 = vector.shape_cast %214 : vector<1x40x8xf32> to vector<40x8xf32>
    %cst_368 = arith.constant dense<0.000000e+00> : vector<168x8xf32>
    %216 = tpu.matmul %212, %215, %cst_368 {dimension_numbers = #tpu.dot_dimension_numbers<[1], [0], [0], [1], [0, 0, 1, 1], [], []>} : vector<168x40xf32>, vector<40x8xf32>, vector<168x8xf32> -> vector<168x8xf32>
    %217 = arith.addf %213, %216 : vector<168x8xf32>
    %c0_369 = arith.constant 0 : index
    %c0_370 = arith.constant 0 : index
    %218 = vector.load %arg8[%c0_369, %c0_370] : memref<168x8xf32, #tpu.memory_space<vmem>>, vector<168x8xf32>
    tpu.vector_store %arg8[%c0_369, %c0_370], %217 {strides = array<i32>} : memref<168x8xf32, #tpu.memory_space<vmem>>, vector<168x8xf32>,
    %c16_371 = arith.constant 16 : index
    %c0_372 = arith.constant 0 : index
    %219 = vector.load %arg7[%c16_371, %c0_372] : memref<198x40xf32, #tpu.memory_space<vmem>>, vector<168x40xf32>
    %c0_373 = arith.constant 0 : index
    %c0_374 = arith.constant 0 : index
    %220 = vector.load %arg8[%c0_373, %c0_374] : memref<168x8xf32, #tpu.memory_space<vmem>>, vector<168x8xf32>
    %c5 = arith.constant 5 : index
    %c0_375 = arith.constant 0 : index
    %c0_376 = arith.constant 0 : index
    %221 = vector.load %arg3[%c5, %c0_375, %c0_376] : memref<9x40x8xf32, #tpu.memory_space<vmem>>, vector<1x40x8xf32>
    %222 = vector.shape_cast %221 : vector<1x40x8xf32> to vector<40x8xf32>
    %cst_377 = arith.constant dense<0.000000e+00> : vector<168x8xf32>
    %223 = tpu.matmul %219, %222, %cst_377 {dimension_numbers = #tpu.dot_dimension_numbers<[1], [0], [0], [1], [0, 0, 1, 1], [], []>} : vector<168x40xf32>, vector<40x8xf32>, vector<168x8xf32> -> vector<168x8xf32>
    %224 = arith.addf %220, %223 : vector<168x8xf32>
    %c0_378 = arith.constant 0 : index
    %c0_379 = arith.constant 0 : index
    %225 = vector.load %arg8[%c0_378, %c0_379] : memref<168x8xf32, #tpu.memory_space<vmem>>, vector<168x8xf32>
    tpu.vector_store %arg8[%c0_378, %c0_379], %224 {strides = array<i32>} : memref<168x8xf32, #tpu.memory_space<vmem>>, vector<168x8xf32>,
    %c28 = arith.constant 28 : index
    %c0_380 = arith.constant 0 : index
    %226 = vector.load %arg7[%c28, %c0_380] : memref<198x40xf32, #tpu.memory_space<vmem>>, vector<168x40xf32>
    %c0_381 = arith.constant 0 : index
    %c0_382 = arith.constant 0 : index
    %227 = vector.load %arg8[%c0_381, %c0_382] : memref<168x8xf32, #tpu.memory_space<vmem>>, vector<168x8xf32>
    %c6 = arith.constant 6 : index
    %c0_383 = arith.constant 0 : index
    %c0_384 = arith.constant 0 : index
    %228 = vector.load %arg3[%c6, %c0_383, %c0_384] : memref<9x40x8xf32, #tpu.memory_space<vmem>>, vector<1x40x8xf32>
    %229 = vector.shape_cast %228 : vector<1x40x8xf32> to vector<40x8xf32>
    %cst_385 = arith.constant dense<0.000000e+00> : vector<168x8xf32>
    %230 = tpu.matmul %226, %229, %cst_385 {dimension_numbers = #tpu.dot_dimension_numbers<[1], [0], [0], [1], [0, 0, 1, 1], [], []>} : vector<168x40xf32>, vector<40x8xf32>, vector<168x8xf32> -> vector<168x8xf32>
    %231 = arith.addf %227, %230 : vector<168x8xf32>
    %c0_386 = arith.constant 0 : index
    %c0_387 = arith.constant 0 : index
    %232 = vector.load %arg8[%c0_386, %c0_387] : memref<168x8xf32, #tpu.memory_space<vmem>>, vector<168x8xf32>
    tpu.vector_store %arg8[%c0_386, %c0_387], %231 {strides = array<i32>} : memref<168x8xf32, #tpu.memory_space<vmem>>, vector<168x8xf32>,
    %c29_388 = arith.constant 29 : index
    %c0_389 = arith.constant 0 : index
    %233 = vector.load %arg7[%c29_388, %c0_389] : memref<198x40xf32, #tpu.memory_space<vmem>>, vector<168x40xf32>
    %c0_390 = arith.constant 0 : index
    %c0_391 = arith.constant 0 : index
    %234 = vector.load %arg8[%c0_390, %c0_391] : memref<168x8xf32, #tpu.memory_space<vmem>>, vector<168x8xf32>
    %c7 = arith.constant 7 : index
    %c0_392 = arith.constant 0 : index
    %c0_393 = arith.constant 0 : index
    %235 = vector.load %arg3[%c7, %c0_392, %c0_393] : memref<9x40x8xf32, #tpu.memory_space<vmem>>, vector<1x40x8xf32>
    %236 = vector.shape_cast %235 : vector<1x40x8xf32> to vector<40x8xf32>
    %cst_394 = arith.constant dense<0.000000e+00> : vector<168x8xf32>
    %237 = tpu.matmul %233, %236, %cst_394 {dimension_numbers = #tpu.dot_dimension_numbers<[1], [0], [0], [1], [0, 0, 1, 1], [], []>} : vector<168x40xf32>, vector<40x8xf32>, vector<168x8xf32> -> vector<168x8xf32>
    %238 = arith.addf %234, %237 : vector<168x8xf32>
    %c0_395 = arith.constant 0 : index
    %c0_396 = arith.constant 0 : index
    %239 = vector.load %arg8[%c0_395, %c0_396] : memref<168x8xf32, #tpu.memory_space<vmem>>, vector<168x8xf32>
    tpu.vector_store %arg8[%c0_395, %c0_396], %238 {strides = array<i32>} : memref<168x8xf32, #tpu.memory_space<vmem>>, vector<168x8xf32>,
    %c30 = arith.constant 30 : index
    %c0_397 = arith.constant 0 : index
    %240 = vector.load %arg7[%c30, %c0_397] : memref<198x40xf32, #tpu.memory_space<vmem>>, vector<168x40xf32>
    %c0_398 = arith.constant 0 : index
    %c0_399 = arith.constant 0 : index
    %241 = vector.load %arg8[%c0_398, %c0_399] : memref<168x8xf32, #tpu.memory_space<vmem>>, vector<168x8xf32>
    %c8_400 = arith.constant 8 : index
    %c0_401 = arith.constant 0 : index
    %c0_402 = arith.constant 0 : index
    %242 = vector.load %arg3[%c8_400, %c0_401, %c0_402] : memref<9x40x8xf32, #tpu.memory_space<vmem>>, vector<1x40x8xf32>
    %243 = vector.shape_cast %242 : vector<1x40x8xf32> to vector<40x8xf32>
    %cst_403 = arith.constant dense<0.000000e+00> : vector<168x8xf32>
    %244 = tpu.matmul %240, %243, %cst_403 {dimension_numbers = #tpu.dot_dimension_numbers<[1], [0], [0], [1], [0, 0, 1, 1], [], []>} : vector<168x40xf32>, vector<40x8xf32>, vector<168x8xf32> -> vector<168x8xf32>
    %245 = arith.addf %241, %244 : vector<168x8xf32>
    %c0_404 = arith.constant 0 : index
    %c0_405 = arith.constant 0 : index
    %246 = vector.load %arg8[%c0_404, %c0_405] : memref<168x8xf32, #tpu.memory_space<vmem>>, vector<168x8xf32>
    tpu.vector_store %arg8[%c0_404, %c0_405], %245 {strides = array<i32>} : memref<168x8xf32, #tpu.memory_space<vmem>>, vector<168x8xf32>,
    %c0_406 = arith.constant 0 : index
    %c0_407 = arith.constant 0 : index
    %247 = vector.load %arg4[%c0_406, %c0_407] : memref<1x8xf32, #tpu.memory_space<vmem>>, vector<1x8xf32>
    %c0_408 = arith.constant 0 : index
    %c0_409 = arith.constant 0 : index
    %248 = vector.load %arg5[%c0_408, %c0_409] : memref<1x8xf32, #tpu.memory_space<vmem>>, vector<1x8xf32>
    %c0_410 = arith.constant 0 : index
    %c0_411 = arith.constant 0 : index
    %249 = vector.load %arg8[%c0_410, %c0_411] : memref<168x8xf32, #tpu.memory_space<vmem>>, vector<12x8xf32>
    %250 = vector.broadcast %247 : vector<1x8xf32> to vector<12x8xf32>
    %251 = arith.mulf %249, %250 : vector<12x8xf32>
    %252 = vector.broadcast %248 : vector<1x8xf32> to vector<12x8xf32>
    %253 = arith.addf %251, %252 : vector<12x8xf32>
    %c0_412 = arith.constant 0 : index
    %c0_413 = arith.constant 0 : index
    %c0_414 = arith.constant 0 : index
    %254 = vector.load %arg6[%c0_412, %c0_413, %c0_414] : memref<1x144x8xf32, #tpu.memory_space<vmem>>, vector<1x12x8xf32>
    %255 = vector.shape_cast %254 : vector<1x12x8xf32> to vector<12x8xf32>
    %256 = vector.shape_cast %253 : vector<12x8xf32> to vector<1x12x8xf32>
    tpu.vector_store %arg6[%c0_412, %c0_413, %c0_414], %256 {strides = array<i32>} : memref<1x144x8xf32, #tpu.memory_space<vmem>>, vector<1x12x8xf32>,
    %c14_415 = arith.constant 14 : index
    %c0_416 = arith.constant 0 : index
    %257 = vector.load %arg8[%c14_415, %c0_416] : memref<168x8xf32, #tpu.memory_space<vmem>>, vector<12x8xf32>
    %258 = vector.broadcast %247 : vector<1x8xf32> to vector<12x8xf32>
    %259 = arith.mulf %257, %258 : vector<12x8xf32>
    %260 = vector.broadcast %248 : vector<1x8xf32> to vector<12x8xf32>
    %261 = arith.addf %259, %260 : vector<12x8xf32>
    %c0_417 = arith.constant 0 : index
    %c12_418 = arith.constant 12 : index
    %c0_419 = arith.constant 0 : index
    %262 = vector.load %arg6[%c0_417, %c12_418, %c0_419] : memref<1x144x8xf32, #tpu.memory_space<vmem>>, vector<1x12x8xf32>
    %263 = vector.shape_cast %262 : vector<1x12x8xf32> to vector<12x8xf32>
    %264 = vector.shape_cast %261 : vector<12x8xf32> to vector<1x12x8xf32>
    tpu.vector_store %arg6[%c0_417, %c12_418, %c0_419], %264 {strides = array<i32>} : memref<1x144x8xf32, #tpu.memory_space<vmem>>, vector<1x12x8xf32>,
    %c28_420 = arith.constant 28 : index
    %c0_421 = arith.constant 0 : index
    %265 = vector.load %arg8[%c28_420, %c0_421] : memref<168x8xf32, #tpu.memory_space<vmem>>, vector<12x8xf32>
    %266 = vector.broadcast %247 : vector<1x8xf32> to vector<12x8xf32>
    %267 = arith.mulf %265, %266 : vector<12x8xf32>
    %268 = vector.broadcast %248 : vector<1x8xf32> to vector<12x8xf32>
    %269 = arith.addf %267, %268 : vector<12x8xf32>
    %c0_422 = arith.constant 0 : index
    %c24_423 = arith.constant 24 : index
    %c0_424 = arith.constant 0 : index
    %270 = vector.load %arg6[%c0_422, %c24_423, %c0_424] : memref<1x144x8xf32, #tpu.memory_space<vmem>>, vector<1x12x8xf32>
    %271 = vector.shape_cast %270 : vector<1x12x8xf32> to vector<12x8xf32>
    %272 = vector.shape_cast %269 : vector<12x8xf32> to vector<1x12x8xf32>
    tpu.vector_store %arg6[%c0_422, %c24_423, %c0_424], %272 {strides = array<i32>} : memref<1x144x8xf32, #tpu.memory_space<vmem>>, vector<1x12x8xf32>,
    %c42 = arith.constant 42 : index
    %c0_425 = arith.constant 0 : index
    %273 = vector.load %arg8[%c42, %c0_425] : memref<168x8xf32, #tpu.memory_space<vmem>>, vector<12x8xf32>
    %274 = vector.broadcast %247 : vector<1x8xf32> to vector<12x8xf32>
    %275 = arith.mulf %273, %274 : vector<12x8xf32>
    %276 = vector.broadcast %248 : vector<1x8xf32> to vector<12x8xf32>
    %277 = arith.addf %275, %276 : vector<12x8xf32>
    %c0_426 = arith.constant 0 : index
    %c36_427 = arith.constant 36 : index
    %c0_428 = arith.constant 0 : index
    %278 = vector.load %arg6[%c0_426, %c36_427, %c0_428] : memref<1x144x8xf32, #tpu.memory_space<vmem>>, vector<1x12x8xf32>
    %279 = vector.shape_cast %278 : vector<1x12x8xf32> to vector<12x8xf32>
    %280 = vector.shape_cast %277 : vector<12x8xf32> to vector<1x12x8xf32>
    tpu.vector_store %arg6[%c0_426, %c36_427, %c0_428], %280 {strides = array<i32>} : memref<1x144x8xf32, #tpu.memory_space<vmem>>, vector<1x12x8xf32>,
    %c56 = arith.constant 56 : index
    %c0_429 = arith.constant 0 : index
    %281 = vector.load %arg8[%c56, %c0_429] : memref<168x8xf32, #tpu.memory_space<vmem>>, vector<12x8xf32>
    %282 = vector.broadcast %247 : vector<1x8xf32> to vector<12x8xf32>
    %283 = arith.mulf %281, %282 : vector<12x8xf32>
    %284 = vector.broadcast %248 : vector<1x8xf32> to vector<12x8xf32>
    %285 = arith.addf %283, %284 : vector<12x8xf32>
    %c0_430 = arith.constant 0 : index
    %c48_431 = arith.constant 48 : index
    %c0_432 = arith.constant 0 : index
    %286 = vector.load %arg6[%c0_430, %c48_431, %c0_432] : memref<1x144x8xf32, #tpu.memory_space<vmem>>, vector<1x12x8xf32>
    %287 = vector.shape_cast %286 : vector<1x12x8xf32> to vector<12x8xf32>
    %288 = vector.shape_cast %285 : vector<12x8xf32> to vector<1x12x8xf32>
    tpu.vector_store %arg6[%c0_430, %c48_431, %c0_432], %288 {strides = array<i32>} : memref<1x144x8xf32, #tpu.memory_space<vmem>>, vector<1x12x8xf32>,
    %c70 = arith.constant 70 : index
    %c0_433 = arith.constant 0 : index
    %289 = vector.load %arg8[%c70, %c0_433] : memref<168x8xf32, #tpu.memory_space<vmem>>, vector<12x8xf32>
    %290 = vector.broadcast %247 : vector<1x8xf32> to vector<12x8xf32>
    %291 = arith.mulf %289, %290 : vector<12x8xf32>
    %292 = vector.broadcast %248 : vector<1x8xf32> to vector<12x8xf32>
    %293 = arith.addf %291, %292 : vector<12x8xf32>
    %c0_434 = arith.constant 0 : index
    %c60_435 = arith.constant 60 : index
    %c0_436 = arith.constant 0 : index
    %294 = vector.load %arg6[%c0_434, %c60_435, %c0_436] : memref<1x144x8xf32, #tpu.memory_space<vmem>>, vector<1x12x8xf32>
    %295 = vector.shape_cast %294 : vector<1x12x8xf32> to vector<12x8xf32>
    %296 = vector.shape_cast %293 : vector<12x8xf32> to vector<1x12x8xf32>
    tpu.vector_store %arg6[%c0_434, %c60_435, %c0_436], %296 {strides = array<i32>} : memref<1x144x8xf32, #tpu.memory_space<vmem>>, vector<1x12x8xf32>,
    %c84_437 = arith.constant 84 : index
    %c0_438 = arith.constant 0 : index
    %297 = vector.load %arg8[%c84_437, %c0_438] : memref<168x8xf32, #tpu.memory_space<vmem>>, vector<12x8xf32>
    %298 = vector.broadcast %247 : vector<1x8xf32> to vector<12x8xf32>
    %299 = arith.mulf %297, %298 : vector<12x8xf32>
    %300 = vector.broadcast %248 : vector<1x8xf32> to vector<12x8xf32>
    %301 = arith.addf %299, %300 : vector<12x8xf32>
    %c0_439 = arith.constant 0 : index
    %c72_440 = arith.constant 72 : index
    %c0_441 = arith.constant 0 : index
    %302 = vector.load %arg6[%c0_439, %c72_440, %c0_441] : memref<1x144x8xf32, #tpu.memory_space<vmem>>, vector<1x12x8xf32>
    %303 = vector.shape_cast %302 : vector<1x12x8xf32> to vector<12x8xf32>
    %304 = vector.shape_cast %301 : vector<12x8xf32> to vector<1x12x8xf32>
    tpu.vector_store %arg6[%c0_439, %c72_440, %c0_441], %304 {strides = array<i32>} : memref<1x144x8xf32, #tpu.memory_space<vmem>>, vector<1x12x8xf32>,
    %c98 = arith.constant 98 : index
    %c0_442 = arith.constant 0 : index
    %305 = vector.load %arg8[%c98, %c0_442] : memref<168x8xf32, #tpu.memory_space<vmem>>, vector<12x8xf32>
    %306 = vector.broadcast %247 : vector<1x8xf32> to vector<12x8xf32>
    %307 = arith.mulf %305, %306 : vector<12x8xf32>
    %308 = vector.broadcast %248 : vector<1x8xf32> to vector<12x8xf32>
    %309 = arith.addf %307, %308 : vector<12x8xf32>
    %c0_443 = arith.constant 0 : index
    %c84_444 = arith.constant 84 : index
    %c0_445 = arith.constant 0 : index
    %310 = vector.load %arg6[%c0_443, %c84_444, %c0_445] : memref<1x144x8xf32, #tpu.memory_space<vmem>>, vector<1x12x8xf32>
    %311 = vector.shape_cast %310 : vector<1x12x8xf32> to vector<12x8xf32>
    %312 = vector.shape_cast %309 : vector<12x8xf32> to vector<1x12x8xf32>
    tpu.vector_store %arg6[%c0_443, %c84_444, %c0_445], %312 {strides = array<i32>} : memref<1x144x8xf32, #tpu.memory_space<vmem>>, vector<1x12x8xf32>,
    %c112 = arith.constant 112 : index
    %c0_446 = arith.constant 0 : index
    %313 = vector.load %arg8[%c112, %c0_446] : memref<168x8xf32, #tpu.memory_space<vmem>>, vector<12x8xf32>
    %314 = vector.broadcast %247 : vector<1x8xf32> to vector<12x8xf32>
    %315 = arith.mulf %313, %314 : vector<12x8xf32>
    %316 = vector.broadcast %248 : vector<1x8xf32> to vector<12x8xf32>
    %317 = arith.addf %315, %316 : vector<12x8xf32>
    %c0_447 = arith.constant 0 : index
    %c96_448 = arith.constant 96 : index
    %c0_449 = arith.constant 0 : index
    %318 = vector.load %arg6[%c0_447, %c96_448, %c0_449] : memref<1x144x8xf32, #tpu.memory_space<vmem>>, vector<1x12x8xf32>
    %319 = vector.shape_cast %318 : vector<1x12x8xf32> to vector<12x8xf32>
    %320 = vector.shape_cast %317 : vector<12x8xf32> to vector<1x12x8xf32>
    tpu.vector_store %arg6[%c0_447, %c96_448, %c0_449], %320 {strides = array<i32>} : memref<1x144x8xf32, #tpu.memory_space<vmem>>, vector<1x12x8xf32>,
    %c126 = arith.constant 126 : index
    %c0_450 = arith.constant 0 : index
    %321 = vector.load %arg8[%c126, %c0_450] : memref<168x8xf32, #tpu.memory_space<vmem>>, vector<12x8xf32>
    %322 = vector.broadcast %247 : vector<1x8xf32> to vector<12x8xf32>
    %323 = arith.mulf %321, %322 : vector<12x8xf32>
    %324 = vector.broadcast %248 : vector<1x8xf32> to vector<12x8xf32>
    %325 = arith.addf %323, %324 : vector<12x8xf32>
    %c0_451 = arith.constant 0 : index
    %c108_452 = arith.constant 108 : index
    %c0_453 = arith.constant 0 : index
    %326 = vector.load %arg6[%c0_451, %c108_452, %c0_453] : memref<1x144x8xf32, #tpu.memory_space<vmem>>, vector<1x12x8xf32>
    %327 = vector.shape_cast %326 : vector<1x12x8xf32> to vector<12x8xf32>
    %328 = vector.shape_cast %325 : vector<12x8xf32> to vector<1x12x8xf32>
    tpu.vector_store %arg6[%c0_451, %c108_452, %c0_453], %328 {strides = array<i32>} : memref<1x144x8xf32, #tpu.memory_space<vmem>>, vector<1x12x8xf32>,
    %c140 = arith.constant 140 : index
    %c0_454 = arith.constant 0 : index
    %329 = vector.load %arg8[%c140, %c0_454] : memref<168x8xf32, #tpu.memory_space<vmem>>, vector<12x8xf32>
    %330 = vector.broadcast %247 : vector<1x8xf32> to vector<12x8xf32>
    %331 = arith.mulf %329, %330 : vector<12x8xf32>
    %332 = vector.broadcast %248 : vector<1x8xf32> to vector<12x8xf32>
    %333 = arith.addf %331, %332 : vector<12x8xf32>
    %c0_455 = arith.constant 0 : index
    %c120_456 = arith.constant 120 : index
    %c0_457 = arith.constant 0 : index
    %334 = vector.load %arg6[%c0_455, %c120_456, %c0_457] : memref<1x144x8xf32, #tpu.memory_space<vmem>>, vector<1x12x8xf32>
    %335 = vector.shape_cast %334 : vector<1x12x8xf32> to vector<12x8xf32>
    %336 = vector.shape_cast %333 : vector<12x8xf32> to vector<1x12x8xf32>
    tpu.vector_store %arg6[%c0_455, %c120_456, %c0_457], %336 {strides = array<i32>} : memref<1x144x8xf32, #tpu.memory_space<vmem>>, vector<1x12x8xf32>,
    %c154 = arith.constant 154 : index
    %c0_458 = arith.constant 0 : index
    %337 = vector.load %arg8[%c154, %c0_458] : memref<168x8xf32, #tpu.memory_space<vmem>>, vector<12x8xf32>
    %338 = vector.broadcast %247 : vector<1x8xf32> to vector<12x8xf32>
    %339 = arith.mulf %337, %338 : vector<12x8xf32>
    %340 = vector.broadcast %248 : vector<1x8xf32> to vector<12x8xf32>
    %341 = arith.addf %339, %340 : vector<12x8xf32>
    %c0_459 = arith.constant 0 : index
    %c132_460 = arith.constant 132 : index
    %c0_461 = arith.constant 0 : index
    %342 = vector.load %arg6[%c0_459, %c132_460, %c0_461] : memref<1x144x8xf32, #tpu.memory_space<vmem>>, vector<1x12x8xf32>
    %343 = vector.shape_cast %342 : vector<1x12x8xf32> to vector<12x8xf32>
    %344 = vector.shape_cast %341 : vector<12x8xf32> to vector<1x12x8xf32>
    tpu.vector_store %arg6[%c0_459, %c132_460, %c0_461], %344 {strides = array<i32>} : memref<1x144x8xf32, #tpu.memory_space<vmem>>, vector<1x12x8xf32>,
    return
  }
  func.func @transform_0(%arg0: i32) -> (i32, i32, i32, i32) {
    %c0_i32 = arith.constant 0 : i32
    %c0_i32_0 = arith.constant 0 : i32
    %c0_i32_1 = arith.constant 0 : i32
    %c0_i32_2 = arith.constant 0 : i32
    return %arg0, %c0_i32, %c0_i32_0, %c0_i32_1 : i32, i32, i32, i32
  }
  func.func @transform_1(%arg0: i32) -> (i32, i32, i32) {
    %c0_i32 = arith.constant 0 : i32
    %c0_i32_0 = arith.constant 0 : i32
    %c0_i32_1 = arith.constant 0 : i32
    return %arg0, %c0_i32, %c0_i32_0 : i32, i32, i32
  }
  func.func @transform_2(%arg0: i32) -> (i32, i32, i32) {
    %c0_i32 = arith.constant 0 : i32
    %c0_i32_0 = arith.constant 0 : i32
    %c0_i32_1 = arith.constant 0 : i32
    %c0_i32_2 = arith.constant 0 : i32
    return %c0_i32, %c0_i32_0, %c0_i32_1 : i32, i32, i32
  }
  func.func @transform_3(%arg0: i32) -> (i32, i32) {
    %c0_i32 = arith.constant 0 : i32
    %c0_i32_0 = arith.constant 0 : i32
    %c0_i32_1 = arith.constant 0 : i32
    return %c0_i32, %c0_i32_0 : i32, i32
  }
  func.func @transform_4(%arg0: i32) -> (i32, i32) {
    %c0_i32 = arith.constant 0 : i32
    %c0_i32_0 = arith.constant 0 : i32
    %c0_i32_1 = arith.constant 0 : i32
    return %c0_i32, %c0_i32_0 : i32, i32
  }
  func.func @transform_5(%arg0: i32) -> (i32, i32, i32) {
    %c0_i32 = arith.constant 0 : i32
    %c0_i32_0 = arith.constant 0 : i32
    %c0_i32_1 = arith.constant 0 : i32
    return %arg0, %c0_i32, %c0_i32_0 : i32, i32, i32
  }
}

</mosaic_0001>

<bundles_post_ra>
// kernel: _lambda_.2
= control target key start
LH: loop header
LB: loop body
LE: loop exit
PB: predicated region body
PF: predicated region fallthrough
CT: control target
= control target key end

     0   :  { %s1123_s15 = smov 0   ;;  %s1125_s16 = smov 0   ;;  %s1340_s0 = inlined_call_operand.vmem [shape: f32[2,144,8], index: 0, kind: input, shape index: {}]   ;;  %s1341_s1 = inlined_call_operand.vmem [shape: f32[4,40,144], index: 1, kind: input, shape index: {}]   ;;  %s1342_s2 = inlined_call_operand.vmem [shape: f32[4,8,8], index: 2, kind: input, shape index: {}]   ;;  %s1343_s3 = inlined_call_operand.vmem [shape: f32[4,144,40], index: 3, kind: input, shape index: {}]   ;;  %s1344_s4 = inlined_call_operand.vmem [shape: f32[2,4,144,8], index: 4, kind: output, shape index: {}]  }
   0x1   :  { %s1127_s17 = smov 0   ;;  %s1129_s18 = smov 0  }
   0x2   :  { %s1131_s19 = smov 0  }
   0x3 LB: > { %s23_s20 = sadd.s32 1, %s1086_s17  ;;  %s26_s21 = sadd.s32 1, %s1090_s18  ;;  %s1094_s19 = sphi %s1131_s19, %s14_s19   ;;  %s1090_s18 = sphi %s1129_s18, %s1348_s18   ;;  %s1086_s17 = sphi %s1127_s17, %s1347_s17   ;;  %s1082_s16 = sphi %s1125_s16, %s1346_s16   ;;  %s1078_s15 = sphi %s1123_s15, %s1345_s15  }
   0x4   : > { %p24_p0 = scmp.ge.s32.totalorder %s23_s20, 4  ;;  %p890_p1 = scmp.ge.s32.totalorder %s1094_s19, 1 }
   0x5   : > { %p205_p2 = scmp.lt.s32.totalorder %s1094_s19, 9 }
   0x6   : > { %s1350_s20 = smov (%p24_p0, %s23_s20), 0  ;;  %s1352_s21 = smov (!%p24_p0, %s26_s21), %s1090_s18 }
   0x7   : > { %p206_p3 = pnand %p890_p1, %p205_p2  ;;  %p28_p4 = scmp.ge.s32.totalorder %s1352_s21, 2 }
   0x8   : > { %p249_p5 = scmp.lt.s32.totalorder (!%p206_p3), %s1082_s16, 1  ;;  %p254_p6 = scmp.lt.s32.totalorder (!%p206_p3), %s1078_s15, 3 }
   0x9   : > { %s1354_s21 = smov (%p28_p4, %s1352_s21), 0  ;;  %209 = sbr.rel (%p206_p3) target bundleno = 694 (0x2b6), region = 36 }
   0xe   : > { %v1096_v0 = vmov 0.0   ;;  %s1356_s16 = smov (!%p249_p5, %s1082_s16), 1  ;;  %s1358_s15 = smov (!%p254_p6, %s1078_s15), 3  ;;  %vm305_vm0 = vcmask 130048   ;;  %vm1097_vm1 = vmmov 0   ;;  %vm412_vm2 = vcmask 64512  }
   0xf   : > { %321 = vmatprep.subr.mxu0 %v1096_v0  ;;  %955 = vmatprep.subr.mxu1 %v1096_v0  ;;  %s1009_s22 = smul.u32 144, %s1356_s16  ;;  %s893_s30 = sshll.u32 %s1358_s15, 3  ;;  %vm536_vm3 = vcmask 326656  }
  0x10   : > { %s1010_s26 = smul.u32 80, %s1358_s15  ;;  %s262_s7 = scalar_lea.vmem %s1342_s2, %s893_s30  ;;  %957 = vmatprep.mubr.msk.f32.mxu1 %vm1097_vm1, %v1096_v0 }
  0x11   : > { %s1163_s25 = scalar_lea.vmem %s1340_s0, %s1009_s22  ;;  %v411_v29 = vld [vmem:[%s262_s7] sm:$0xff]  ;;  %s1011_s8 = smul.u32 144, %s1358_s15 }
  0x12   : > { %v292_v1 = vld [vmem:[%s1163_s25 + $0x78] sm:$0xff]  ;;  %v291_v2 = vld [vmem:[%s1163_s25 + $0x70] sm:$0xff]  ;;  %v290_v3 = vld [vmem:[%s1163_s25 + $0x68] sm:$0xff]  ;;  %s1173_s29 = scalar_lea.vmem %s1341_s1, %s1010_s26  ;;  %956 = vmatpush3.msra.mxu1 %v411_v29  ;;  %s1012_s12 = smul.u32 18, %s1358_s15 }
  0x13   : > { %322 = vmatpush1.msra.mxu0 %v292_v1  ;;  %v289_v4 = vld [vmem:[%s1163_s25 + $0x60] sm:$0xff]  ;;  %v288_v5 = vld [vmem:[%s1163_s25 + $0x58] sm:$0xff]  ;;  %v296_v6 = vld [vmem:[%s1173_s29 + $0x8] sm:$0xff]  ;;  %s1244_s11 = scalar_lea.vmem %s1343_s3, %s1011_s8  ;;  %s1013_s13 = smul.u32 72, %s1356_s16 }
  0x14   : > { %323 = vmatprep.subr.mxu0 %v1096_v0  ;;  %896 = vmatprep.mubr.msk.f32.mxu0 %vm305_vm0, %v296_v6  ;;  %v287_v7 = vld [vmem:[%s1163_s25 + $0x50] sm:$0xff]  ;;  %v286_v8 = vld [vmem:[%s1163_s25 + $0x48] sm:$0xff]  ;;  %v285_v9 = vld [vmem:[%s1163_s25 + $0x40] sm:$0xff] }
  0x15   : > { %324 = vmatpush1.msra.mxu0 %v291_v2  ;;  %v284_v10 = vld [vmem:[%s1163_s25 + $0x38] sm:$0xff]  ;;  %v283_v11 = vld [vmem:[%s1163_s25 + $0x30] sm:$0xff]  ;;  %v282_v12 = vld [vmem:[%s1163_s25 + $0x28] sm:$0xff]  ;;  %s274_s14 = sadd.s32 %s1013_s13, %s1012_s12 }
  0x16   : > { %325 = vmatprep.subr.mxu0 %v1096_v0  ;;  %v281_v13 = vld [vmem:[%s1163_s25 + $0x20] sm:$0xff]  ;;  %v280_v14 = vld [vmem:[%s1163_s25 + $0x18] sm:$0xff]  ;;  %v279_v15 = vld [vmem:[%s1163_s25 + $0x10] sm:$0xff]  ;;  %s895_s22 = sshll.u32 %s274_s14, 3 }
  0x17   : > { %326 = vmatpush1.msra.mxu0 %v290_v3  ;;  %v278_v16 = vld [vmem:[%s1163_s25 + $0x8] sm:$0xff]  ;;  %v277_v17 = vld [vmem:[%s1163_s25] sm:$0xff]  ;;  %v298_v21 = vld [vmem:[%s1173_s29 + $0x18] sm:$0xff] }
  0x18   : > { %327 = vmatprep.subr.mxu0 %v1096_v0  ;;  %v294_v18 = vld [vmem:[%s1163_s25 + $0x88] sm:$0xff]  ;;  %v293_v19 = vld [vmem:[%s1163_s25 + $0x80] sm:$0xff]  ;;  %v297_v22 = vld [vmem:[%s1173_s29 + $0x10] sm:$0xff]  ;;  %s1287_s25 = scalar_lea.vmem %s1344_s4, %s895_s22 }
  0x19   : > { %328 = vmatpush1.msra.mxu0 %v289_v4  ;;  %v295_v20 = vld [vmem:[%s1173_s29] sm:$0xff]  ;;  %v300_v23 = vld [vmem:[%s1173_s29 + $0x28] sm:$0xff]  ;;  %v302_v25 = vld [vmem:[%s1173_s29 + $0x38] sm:$0xff] }
  0x1a   : > { %329 = vmatprep.subr.mxu0 %v1096_v0  ;;  %v299_v24 = vld [vmem:[%s1173_s29 + $0x20] sm:$0xff]  ;;  %v301_v26 = vld [vmem:[%s1173_s29 + $0x30] sm:$0xff]  ;;  %v304_v27 = vld [vmem:[%s1173_s29 + $0x48] sm:$0xff] }
  0x1b   : > { %330 = vmatpush1.msra.mxu0 %v288_v5  ;;  %v303_v28 = vld [vmem:[%s1173_s29 + $0x40] sm:$0xff]  ;;  %v519_v51 = vld [vmem:[%s1244_s11 + $0x8] sm:$0xff]  ;;  %v520_v52 = vld [vmem:[%s1244_s11 + $0x10] sm:$0xff] }
  0x1c   : > { %331 = vmatprep.subr.mxu0 %v1096_v0  ;;  %v518_v40 = vld [vmem:[%s1244_s11] sm:$0xff]  ;;  %v521_v53 = vld [vmem:[%s1244_s11 + $0x18] sm:$0xff]  ;;  %v523_v55 = vld [vmem:[%s1244_s11 + $0x28] sm:$0xff] }
  0x1d   : > { %332 = vmatpush1.msra.mxu0 %v287_v7  ;;  %v522_v54 = vld [vmem:[%s1244_s11 + $0x20] sm:$0xff]  ;;  %v524_v56 = vld [vmem:[%s1244_s11 + $0x30] sm:$0xff]  ;;  %v525_v57 = vld [vmem:[%s1244_s11 + $0x38] sm:$0xff] }
  0x1e   : > { %333 = vmatprep.subr.mxu0 %v1096_v0  ;;  %v526_v58 = vld [vmem:[%s1244_s11 + $0x40] sm:$0xff]  ;;  %v527_v59 = vld [vmem:[%s1244_s11 + $0x48] sm:$0xff]  ;;  %v528_v60 = vld [vmem:[%s1244_s11 + $0x50] sm:$0xff] }
  0x1f   : > { %334 = vmatpush1.msra.mxu0 %v286_v8  ;;  %v529_v61 = vld [vmem:[%s1244_s11 + $0x58] sm:$0xff]  ;;  %v530_v62 = vld [vmem:[%s1244_s11 + $0x60] sm:$0xff]  ;;  %v531_v63 = vld [vmem:[%s1244_s11 + $0x68] sm:$0xff] }
  0x20   : > { %335 = vmatprep.subr.mxu0 %v1096_v0  ;;  %v533_v1 = vld [vmem:[%s1244_s11 + $0x78] sm:$0xff]  ;;  %v534_v2 = vld [vmem:[%s1244_s11 + $0x80] sm:$0xff]  ;;  %v535_v3 = vld [vmem:[%s1244_s11 + $0x88] sm:$0xff] }
  0x21   : > { %336 = vmatpush1.msra.mxu0 %v285_v9 }
  0x22   : > { %337 = vmatprep.subr.mxu0 %v1096_v0 }
  0x23   : > { %338 = vmatpush1.msra.mxu0 %v284_v10 }
  0x24   : > { %339 = vmatprep.subr.mxu0 %v1096_v0 }
  0x25   : > { %340 = vmatpush1.msra.mxu0 %v283_v11 }
  0x26   : > { %341 = vmatprep.subr.mxu0 %v1096_v0 }
  0x27   : > { %342 = vmatpush1.msra.mxu0 %v282_v12 }
  0x28   : > { %343 = vmatprep.subr.mxu0 %v1096_v0 }
  0x29   : > { %344 = vmatpush1.msra.mxu0 %v281_v13 }
  0x2a   : > { %345 = vmatprep.subr.mxu0 %v1096_v0 }
  0x2b   : > { %346 = vmatpush1.msra.mxu0 %v280_v14 }
  0x2c   : > { %347 = vmatprep.subr.mxu0 %v1096_v0 }
  0x2d   : > { %348 = vmatpush1.msra.mxu0 %v279_v15 }
  0x2e   : > { %349 = vmatprep.subr.mxu0 %v1096_v0 }
  0x2f   : > { %350 = vmatpush1.msra.mxu0 %v278_v16 }
  0x30   : > { %351 = vmatprep.subr.mxu0 %v1096_v0 }
  0x31   : > { %352 = vmatpush1.msra.mxu0 %v277_v17 }
  0x32   : > { %381 = vmatprep.subr.mxu0 %v1096_v0 }
  0x33   : > { %382 = vmatpush2.msra.mxu0 %v294_v18 }
  0x34   : > { %383 = vmatprep.subr.mxu0 %v1096_v0 }
  0x35   : > { %384 = vmatpush2.msra.mxu0 %v293_v19 }
  0x36   : > { %386 = vmatmul.mubr.f32.vlgmr.msra.gmra.mxu0 %v295_v20 }
  0x37   : > { %897 = vmatprep.mubr.msk.f32.mxu0 %vm305_vm0, %v298_v21 }
  0x3a   : > { %391 = vmatmul.mubr.f32.gmra.mxu0 %v297_v22 }
  0x3b   : > { %898 = vmatprep.mubr.msk.f32.mxu0 %vm305_vm0, %v300_v23 }
  0x3e   : > { %396 = vmatmul.mubr.f32.gmra.mxu0 %v299_v24 }
  0x3f   : > { %899 = vmatprep.mubr.msk.f32.mxu0 %vm305_vm0, %v302_v25 }
  0x42   : > { %401 = vmatmul.mubr.f32.gmra.mxu0 %v301_v26 }
  0x43   : > { %900 = vmatprep.mubr.msk.f32.mxu0 %vm305_vm0, %v304_v27 }
  0x46   : > { %406 = vmatmul.mubr.f32.gmra.mxu0 %v303_v28 }
  0xf6   : > { %v387_v30 = vpop.f32.mrf.mxu0 }
  0xf7   : > { %958 = vmatmul.mubr.msk.f32.vlgmr.msra.gmra.mxu1 %vm412_vm2, %v387_v30 }
  0xf8   : > { %v389_v31 = vpop.f32.mrf.mxu0  ;;  %960 = vmatprep.mubr.msk.f32.mxu1 %vm1097_vm1, %v1096_v0 }
  0xfa   : > { %v392_v32 = vpop.f32.mrf.mxu0 }
  0xfb   : > { %961 = vmatmul.mubr.msk.f32.gmra.mxu1 %vm412_vm2, %v392_v32 }
  0xfc   : > { %v394_v33 = vpop.f32.mrf.mxu0  ;;  %963 = vmatprep.mubr.msk.f32.mxu1 %vm1097_vm1, %v1096_v0 }
  0xfe   : > { %v397_v34 = vpop.f32.mrf.mxu0 }
  0xff   : > { %964 = vmatmul.mubr.msk.f32.gmra.mxu1 %vm412_vm2, %v397_v34 }
 0x100   : > { %v399_v35 = vpop.f32.mrf.mxu0  ;;  %966 = vmatprep.mubr.msk.f32.mxu1 %vm1097_vm1, %v1096_v0 }
 0x102   : > { %v402_v36 = vpop.f32.mrf.mxu0 }
 0x103   : > { %967 = vmatmul.mubr.msk.f32.gmra.mxu1 %vm412_vm2, %v402_v36 }
 0x104   : > { %v404_v37 = vpop.f32.mrf.mxu0  ;;  %969 = vmatprep.mubr.msk.f32.mxu1 %vm1097_vm1, %v1096_v0  ;;  %v532_v0 = vld [vmem:[%s1244_s11 + $0x70] sm:$0xff] }
 0x106   : > { %v407_v38 = vpop.f32.mrf.mxu0 }
 0x107   : > { %970 = vmatmul.mubr.msk.f32.gmra.mxu1 %vm412_vm2, %v407_v38 }
 0x108   : > { %v409_v39 = vpop.f32.mrf.mxu0  ;;  %982 = vmatprep.mubr.msk.f32.mxu1 %vm536_vm3, %v518_v40 }
 0x1b7   : > { %v494_v41 = vpop.f32.mrf.mxu1 }
 0x1b9   : > { %v959_v42 = vpop.f32.mrf.mxu1 }
 0x1bb   : > { %v499_v43 = vpop.f32.mrf.mxu1 }
 0x1bd   : > { %v962_v44 = vpop.f32.mrf.mxu1 }
 0x1bf   : > { %v504_v45 = vpop.f32.mrf.mxu1 }
 0x1c1   : > { %v965_v46 = vpop.f32.mrf.mxu1 }
 0x1c3   : > { %v509_v47 = vpop.f32.mrf.mxu1 }
 0x1c5   : > { %v968_v48 = vpop.f32.mrf.mxu1 }
 0x1c7   : > { %v514_v49 = vpop.f32.mrf.mxu1 }
 0x1c8   : > { %972 = vmatprep.subr.mxu1 %v514_v49 }
 0x1c9   : > { %v971_v50 = vpop.f32.mrf.mxu1  ;;  %973 = vmatpush3.msra.mxu1 %v514_v49 }
 0x1ca   : > { %974 = vmatprep.subr.mxu1 %v509_v47 }
 0x1cb   : > { %975 = vmatpush3.msra.mxu1 %v509_v47 }
 0x1cc   : > { %976 = vmatprep.subr.mxu1 %v504_v45 }
 0x1cd   : > { %977 = vmatpush3.msra.mxu1 %v504_v45 }
 0x1ce   : > { %978 = vmatprep.subr.mxu1 %v499_v43 }
 0x1cf   : > { %979 = vmatpush3.msra.mxu1 %v499_v43 }
 0x1d0   : > { %980 = vmatprep.subr.mxu1 %v494_v41 }
 0x1d1   : > { %981 = vmatpush3.msra.mxu1 %v494_v41 }
 0x1d2   : > { %983 = vmatmul.mubr.msk.f32.vlgmr.msra.gmra.mxu1 %vm536_vm3, %v519_v51 }
 0x1d3   : > { %985 = vmatprep.mubr.msk.f32.mxu1 %vm536_vm3, %v520_v52 }
 0x1d6   : > { %986 = vmatmul.mubr.msk.f32.gmra.mxu1 %vm536_vm3, %v521_v53 }
 0x1d7   : > { %988 = vmatprep.mubr.msk.f32.mxu1 %vm536_vm3, %v522_v54 }
 0x1da   : > { %989 = vmatmul.mubr.msk.f32.gmra.mxu1 %vm536_vm3, %v523_v55 }
 0x1db   : > { %991 = vmatprep.mubr.msk.f32.mxu1 %vm536_vm3, %v524_v56 }
 0x1de   : > { %992 = vmatmul.mubr.msk.f32.gmra.mxu1 %vm536_vm3, %v525_v57 }
 0x1df   : > { %994 = vmatprep.mubr.msk.f32.mxu1 %vm536_vm3, %v526_v58 }
 0x1e2   : > { %995 = vmatmul.mubr.msk.f32.gmra.mxu1 %vm536_vm3, %v527_v59 }
 0x1e3   : > { %997 = vmatprep.mubr.msk.f32.mxu1 %vm536_vm3, %v528_v60 }
 0x1e6   : > { %998 = vmatmul.mubr.msk.f32.gmra.mxu1 %vm536_vm3, %v529_v61 }
 0x1e7   : > { %1000 = vmatprep.mubr.msk.f32.mxu1 %vm536_vm3, %v530_v62 }
 0x1ea   : > { %1001 = vmatmul.mubr.msk.f32.gmra.mxu1 %vm536_vm3, %v531_v63 }
 0x1eb   : > { %1003 = vmatprep.mubr.msk.f32.mxu1 %vm536_vm3, %v532_v0 }
 0x1ee   : > { %1004 = vmatmul.mubr.msk.f32.gmra.mxu1 %vm536_vm3, %v533_v1 }
 0x1ef   : > { %1006 = vmatprep.mubr.msk.f32.mxu1 %vm536_vm3, %v534_v2 }
 0x1f2   : > { %1007 = vmatmul.mubr.msk.f32.gmra.mxu1 %vm536_vm3, %v535_v3 }
 0x292   : > { %v984_v4 = vpop.f32.mrf.mxu1 }
 0x293   : > { %747 = vst.msk [vmem:[%s1287_s25 + $0x8] sm:$0xff] %vm412_vm2, %v984_v4 }
 0x294   : > { %v657_v5 = vpop.f32.mrf.mxu1 }
 0x295   : > { %746 = vst.msk [vmem:[%s1287_s25] sm:$0xff] %vm412_vm2, %v657_v5 }
 0x296   : > { %v987_v6 = vpop.f32.mrf.mxu1 }
 0x297   : > { %749 = vst.msk [vmem:[%s1287_s25 + $0x18] sm:$0xff] %vm412_vm2, %v987_v6 }
 0x298   : > { %v667_v7 = vpop.f32.mrf.mxu1 }
 0x299   : > { %748 = vst.msk [vmem:[%s1287_s25 + $0x10] sm:$0xff] %vm412_vm2, %v667_v7 }
 0x29a   : > { %v990_v8 = vpop.f32.mrf.mxu1 }
 0x29b   : > { %751 = vst.msk [vmem:[%s1287_s25 + $0x28] sm:$0xff] %vm412_vm2, %v990_v8 }
 0x29c   : > { %v677_v9 = vpop.f32.mrf.mxu1 }
 0x29d   : > { %750 = vst.msk [vmem:[%s1287_s25 + $0x20] sm:$0xff] %vm412_vm2, %v677_v9 }
 0x29e   : > { %v993_v10 = vpop.f32.mrf.mxu1 }
 0x29f   : > { %753 = vst.msk [vmem:[%s1287_s25 + $0x38] sm:$0xff] %vm412_vm2, %v993_v10 }
 0x2a0   : > { %v687_v11 = vpop.f32.mrf.mxu1 }
 0x2a1   : > { %752 = vst.msk [vmem:[%s1287_s25 + $0x30] sm:$0xff] %vm412_vm2, %v687_v11 }
 0x2a2   : > { %v996_v12 = vpop.f32.mrf.mxu1 }
 0x2a3   : > { %755 = vst.msk [vmem:[%s1287_s25 + $0x48] sm:$0xff] %vm412_vm2, %v996_v12 }
 0x2a4   : > { %v697_v13 = vpop.f32.mrf.mxu1 }
 0x2a5   : > { %754 = vst.msk [vmem:[%s1287_s25 + $0x40] sm:$0xff] %vm412_vm2, %v697_v13 }
 0x2a6   : > { %v999_v14 = vpop.f32.mrf.mxu1 }
 0x2a7   : > { %757 = vst.msk [vmem:[%s1287_s25 + $0x58] sm:$0xff] %vm412_vm2, %v999_v14 }
 0x2a8   : > { %v707_v15 = vpop.f32.mrf.mxu1 }
 0x2a9   : > { %756 = vst.msk [vmem:[%s1287_s25 + $0x50] sm:$0xff] %vm412_vm2, %v707_v15 }
 0x2aa   : > { %v1002_v16 = vpop.f32.mrf.mxu1 }
 0x2ab   : > { %759 = vst.msk [vmem:[%s1287_s25 + $0x68] sm:$0xff] %vm412_vm2, %v1002_v16 }
 0x2ac   : > { %v717_v17 = vpop.f32.mrf.mxu1 }
 0x2ad   : > { %758 = vst.msk [vmem:[%s1287_s25 + $0x60] sm:$0xff] %vm412_vm2, %v717_v17 }
 0x2ae   : > { %v1005_v18 = vpop.f32.mrf.mxu1 }
 0x2af   : > { %761 = vst.msk [vmem:[%s1287_s25 + $0x78] sm:$0xff] %vm412_vm2, %v1005_v18 }
 0x2b0   : > { %v727_v19 = vpop.f32.mrf.mxu1 }
 0x2b1   : > { %760 = vst.msk [vmem:[%s1287_s25 + $0x70] sm:$0xff] %vm412_vm2, %v727_v19 }
 0x2b2   : > { %v1008_v20 = vpop.f32.mrf.mxu1 }
 0x2b3   : > { %763 = vst.msk [vmem:[%s1287_s25 + $0x88] sm:$0xff] %vm412_vm2, %v1008_v20 }
 0x2b4   : > { %v737_v21 = vpop.f32.mrf.mxu1 }
 0x2b5   : > { %762 = vst.msk [vmem:[%s1287_s25 + $0x80] sm:$0xff] %vm412_vm2, %v737_v21 }
 0x2b6 PF: > { %s14_s19 = sadd.s32 1, %s1094_s19   ;;  %s1345_s15 = smov %s1086_s17 }
 0x2b7   : > { %p11_p7 = scmp.ge.s32.totalorder %s14_s19, 10   ;;  %s1346_s16 = smov %s1090_s18 }
 0x2b8   : > { %s1347_s17 = smov %s1350_s20  ;;  %s1348_s18 = smov %s1354_s21 }
 0x2b9   :  { %13 = sbr.rel (!%p11_p7) target bundleno = 3 (0x3), region = 75 }

// kernel: _lambda_.3
= control target key start
LH: loop header
LB: loop body
LE: loop exit
PB: predicated region body
PF: predicated region fallthrough
CT: control target
= control target key end

     0   :  { %s5287_s18 = smov 0   ;;  %s6821_s0 = inlined_call_operand.vmem [shape: f32[2,4,144,8], index: 0, kind: input, shape index: {}]   ;;  %s6822_s1 = inlined_call_operand.vmem [shape: f32[2,144,8], index: 1, kind: input, shape index: {}]   ;;  %s6823_s2 = inlined_call_operand.vmem [shape: f32[9,40,8], index: 2, kind: input, shape index: {}]   ;;  %s6824_s3 = inlined_call_operand.vmem [shape: f32[1,8], index: 3, kind: input, shape index: {}]   ;;  %s6825_s4 = inlined_call_operand.vmem [shape: f32[1,8], index: 4, kind: input, shape index: {}]   ;;  %s6826_s5 = inlined_call_operand.vmem [shape: f32[2,144,8], index: 5, kind: output, shape index: {}]  }
   0x1 LB: > { %s4013_s19 = sadd.s32 4294967295, %s5249_s18   ;;  %p4017_p0 = scmp.ge.s32.totalorder %s5249_s18, 1  ;;  %s5249_s18 = sphi %s5287_s18, %s15_s18  }
   0x2   : > { %p197_p1 = scmp.lt.s32.totalorder %s5249_s18, 3 }
   0x4   : > { %p198_p2 = pnand %p4017_p0, %p197_p1 }
   0x5   : > { %p5297_p3 = scmp.lt.s32.totalorder (!%p198_p2), %s4013_s19, 1  ;;  %s5252_s27 = smov (!%p198_p2), 16  }
   0x6   : > { %201 = sbr.rel (%p198_p2) target bundleno = 863 (0x35f), region = 40  ;;  %s5253_s28 = smov (!%p198_p2), 8  }
   0x7   : > { %s5255_s8 = smov (!%p198_p2), 24   ;;  %s5256_s9 = smov (!%p198_p2), 32  }
   0xb   : > { %vm245_vm0 = vcmask 326656   ;;  %vm272_vm1 = vcmask 64512   ;;  %v5251_v0 = vmov 0.0   ;;  %s6829_s19 = smov (!%p5297_p3, %s4013_s19), 1  ;;  %v976_v1 = vld [vmem:[%s6823_s2 + $0x20] sm:$0xff]  ;;  %vm5254_vm2 = vmmov 0  }
   0xc   : > { %256 = vst.msk [vmem:[#allocation2 + $0x50] sm:$0xff] %vm245_vm0, %v5251_v0  ;;  %257 = vst.msk [vmem:[#allocation2 + $0x58] sm:$0xff] %vm245_vm0, %v5251_v0  ;;  %5217 = vmatprep.subr.mxu1 %v5251_v0  ;;  %4560 = vmatprep.subr.mxu0 %v5251_v0  ;;  %s5227_s21 = smul.u32 576, %s6829_s19  ;;  %vm297_vm3 = vcmask 60416   ;;  %v975_v18 = vld [vmem:[%s6823_s2 + $0x18] sm:$0xff]  ;;  %v974_v19 = vld [vmem:[%s6823_s2 + $0x10] sm:$0xff] }
   0xd   : > { %246 = vst.msk [vmem:[#allocation2] sm:$0xff] %vm245_vm0, %v5251_v0  ;;  %247 = vst.msk [vmem:[#allocation2 + $0x8] sm:$0xff] %vm245_vm0, %v5251_v0  ;;  %5222 = vmatpush3.msra.mxu1 %v976_v1  ;;  %4561 = vmatpush3.msra.mxu0 %v976_v1  ;;  %s5228_s29 = smul.u32 144, %s6829_s19  ;;  %v973_v23 = vld [vmem:[%s6823_s2 + $0x8] sm:$0xff]  ;;  %v972_v28 = vld [vmem:[%s6823_s2] sm:$0xff]  ;;  %vm310_vm4 = vcmask 130112  }
   0xe   : > { %248 = vst.msk [vmem:[#allocation2 + $0x10] sm:$0xff] %vm245_vm0, %v5251_v0  ;;  %249 = vst.msk [vmem:[#allocation2 + $0x18] sm:$0xff] %vm245_vm0, %v5251_v0  ;;  %s5406_s26 = scalar_lea.vmem %s6821_s0, %s5227_s21  ;;  %5218 = vmatprep.subr.mxu1 %v5251_v0  ;;  %4562 = vmatprep.subr.mxu0 %v5251_v0  ;;  %vm325_vm5 = vcmask 195712   ;;  %vm312_vm6 = vcmask 126016   ;;  %vm327_vm7 = vcmask 191616   ;;  %vm342_vm8 = vcmask 257216  }
   0xf   : > { %250 = vst.msk [vmem:[#allocation2 + $0x20] sm:$0xff] %vm245_vm0, %v5251_v0  ;;  %251 = vst.msk [vmem:[#allocation2 + $0x28] sm:$0xff] %vm245_vm0, %v5251_v0  ;;  %v4053_v2 = vld [vmem:[%s5406_s26 + $0x15c] sm:$0xff]  ;;  %v4051_v3 = vld [vmem:[%s5406_s26 + $0xcc] sm:$0xff]  ;;  %4603 = vmatprep.mubr.msk.f32.mxu1 %vm5254_vm2, %v5251_v0  ;;  %4570 = vmatprep.mubr.msk.f32.mxu0 %vm5254_vm2, %v5251_v0  ;;  %s5430_s7 = scalar_lea.vmem %s6822_s1, %s5228_s29  ;;  %vm340_vm9 = vcmask 261312   ;;  %vm356_vm10 = vcmask 322816  }
  0x10   : > { %252 = vst.msk [vmem:[#allocation2 + $0x30] sm:$0xff] %vm245_vm0, %v5251_v0  ;;  %253 = vst.msk [vmem:[#allocation2 + $0x38] sm:$0xff] %vm245_vm0, %v5251_v0  ;;  %586 = vrot.lane.b32.xlu1 %v4053_v2, %s5252_s27  ;;  %574 = vrot.lane.b32.xlu0 %v4051_v3, %s5253_s28  ;;  %v4054_v4 = vld [vmem:[%s5406_s26 + $0x164] sm:$0xf]  ;;  %v4052_v5 = vld [vmem:[%s5406_s26 + $0xd4] sm:$0xf] }
  0x11   : > { %254 = vst.msk [vmem:[#allocation2 + $0x40] sm:$0xff] %vm245_vm0, %v5251_v0  ;;  %255 = vst.msk [vmem:[#allocation2 + $0x48] sm:$0xff] %vm245_vm0, %v5251_v0  ;;  %v4056_v6 = vld [vmem:[%s5406_s26 + $0x1f4] sm:$0xf]  ;;  %v4055_v7 = vld [vmem:[%s5406_s26 + $0x1ec] sm:$0xff]  ;;  %5223 = vmatpush3.msra.mxu1 %v975_v18  ;;  %4563 = vmatpush3.msra.mxu0 %v975_v18  ;;  %vm354_vm11 = vcmask 326912  }
  0x12   : > { %258 = vst.msk [vmem:[#allocation2 + $0x60] sm:$0xff] %vm245_vm0, %v5251_v0  ;;  %259 = vst.msk [vmem:[#allocation2 + $0x68] sm:$0xff] %vm245_vm0, %v5251_v0  ;;  %v607_v8 = vld [vmem:[%s5430_s7 + $0x44] sm:$0xf]  ;;  %v606_v9 = vld [vmem:[%s5430_s7 + $0x3c] sm:$0xff]  ;;  %5219 = vmatprep.subr.mxu1 %v5251_v0  ;;  %4564 = vmatprep.subr.mxu0 %v5251_v0  ;;  %vm270_vm12 = vcmask 324608  }
  0x13   : > { %260 = vst.msk [vmem:[#allocation2 + $0x70] sm:$0xff] %vm245_vm0, %v5251_v0  ;;  %261 = vst.msk [vmem:[#allocation2 + $0x78] sm:$0xff] %vm245_vm0, %v5251_v0  ;;  %v4059_v10 = vld [vmem:[%s5406_s26 + $0x168] sm:$0xff]  ;;  %v4057_v11 = vld [vmem:[%s5406_s26 + $0xd8] sm:$0xff]  ;;  %5224 = vmatpush3.msra.mxu1 %v974_v19  ;;  %4565 = vmatpush3.msra.mxu0 %v974_v19 }
  0x14   : > { %262 = vst.msk [vmem:[#allocation2 + $0x80] sm:$0xff] %vm245_vm0, %v5251_v0  ;;  %263 = vst.msk [vmem:[#allocation2 + $0x88] sm:$0xff] %vm245_vm0, %v5251_v0  ;;  %588 = vrot.lane.b32.xlu1 %v4054_v4, %s5252_s27  ;;  %576 = vrot.lane.b32.xlu0 %v4052_v5, %s5253_s28  ;;  %v658_v12 = vld [vmem:[%s5430_s7 + $0x48] sm:$0xff]  ;;  %v4061_v13 = vld [vmem:[%s5406_s26 + $0x1f8] sm:$0xff] }
  0x15   : > { %264 = vst.msk [vmem:[#allocation2 + $0x90] sm:$0xff] %vm245_vm0, %v5251_v0  ;;  %265 = vst.msk [vmem:[#allocation2 + $0x98] sm:$0xff] %vm245_vm0, %v5251_v0  ;;  %v566_v14 = vld [vmem:[%s5406_s26 + $0x3c] sm:$0xff]  ;;  %v4060_v15 = vld [vmem:[%s5406_s26 + $0x170] sm:$0xf]  ;;  %5220 = vmatprep.subr.mxu1 %v5251_v0  ;;  %4566 = vmatprep.subr.mxu0 %v5251_v0 }
  0x16   : > { %266 = vst.msk [vmem:[#allocation2 + $0xa0] sm:$0xff] %vm245_vm0, %v5251_v0  ;;  %267 = vst.msk [vmem:[#allocation2 + $0xa8] sm:$0xff] %vm245_vm0, %v5251_v0  ;;  %v4058_v16 = vld [vmem:[%s5406_s26 + $0xe0] sm:$0xf]  ;;  %v567_v17 = vld [vmem:[%s5406_s26 + $0x44] sm:$0xf]  ;;  %5225 = vmatpush3.msra.mxu1 %v973_v23  ;;  %4567 = vmatpush3.msra.mxu0 %v973_v23 }
  0x17   : > { %268 = vst.msk [vmem:[#allocation2 + $0xb0] sm:$0xff] %vm245_vm0, %v5251_v0  ;;  %269 = vst.msk [vmem:[#allocation2 + $0xb8] sm:$0xff] %vm245_vm0, %v5251_v0  ;;  %v618_v20 = vld [vmem:[%s5406_s26 + $0x48] sm:$0xff]  ;;  %v4062_v21 = vld [vmem:[%s5406_s26 + $0x200] sm:$0xf]  ;;  %5221 = vmatprep.subr.mxu1 %v5251_v0  ;;  %4568 = vmatprep.subr.mxu0 %v5251_v0 }
  0x18   : > { %273 = vst.msk [vmem:[#allocation3] sm:$0xff] %vm272_vm1, %v5251_v0  ;;  %274 = vst.msk [vmem:[#allocation3 + $0x8] sm:$0xff] %vm272_vm1, %v5251_v0  ;;  %600 = vrot.lane.b32.xlu1 %v4056_v6, %s5255_s8  ;;  %598 = vrot.lane.b32.xlu0 %v4055_v7, %s5255_s8  ;;  %v4021_v22 = vld [vmem:[%s5406_s26 + $0x90] sm:$0xff]  ;;  %v294_v25 = vld [vmem:[%s5406_s26] sm:$0xff] }
  0x19   : > { %275 = vst.msk [vmem:[#allocation3 + $0x10] sm:$0xff] %vm272_vm1, %v5251_v0  ;;  %276 = vst.msk [vmem:[#allocation3 + $0x18] sm:$0xff] %vm272_vm1, %v5251_v0  ;;  %v619_v24 = vld [vmem:[%s5406_s26 + $0x50] sm:$0xf]  ;;  %v4023_v27 = vld [vmem:[%s5406_s26 + $0x120] sm:$0xff]  ;;  %5226 = vmatpush3.msra.mxu1 %v972_v28  ;;  %4569 = vmatpush3.msra.mxu0 %v972_v28 }
  0x1a   : > { %277 = vst.msk [vmem:[#allocation3 + $0x20] sm:$0xff] %vm272_vm1, %v5251_v0  ;;  %278 = vst.msk [vmem:[#allocation3 + $0x28] sm:$0xff] %vm272_vm1, %v5251_v0  ;;  %v659_v26 = vld [vmem:[%s5430_s7 + $0x50] sm:$0xf]  ;;  %v670_v29 = vld [vmem:[%s5406_s26 + $0x54] sm:$0xff]  ;;  %4633 = vmatprep.subr.mxu1 %v5251_v0  ;;  %4706 = vmatprep.subr.mxu0 %v5251_v0 }
  0x1b   : > { %279 = vst.msk [vmem:[#allocation3 + $0x30] sm:$0xff] %vm272_vm1, %v5251_v0  ;;  %280 = vst.msk [vmem:[#allocation3 + $0x38] sm:$0xff] %vm272_vm1, %v5251_v0  ;;  %v295_v30 = vld [vmem:[%s5406_s26 + $0x8] sm:$0xf]  ;;  %v930_v31 = vld [vmem:[#allocation2] sm:$0xff] }
  0x1c   : > { %281 = vst.msk [vmem:[#allocation3 + $0x40] sm:$0xff] %vm272_vm1, %v5251_v0  ;;  %282 = vst.msk [vmem:[#allocation3 + $0x48] sm:$0xff] %vm272_vm1, %v5251_v0  ;;  %612 = vrot.lane.b32.xlu1 %v607_v8, %s5256_s9  ;;  %610 = vrot.lane.b32.xlu0 %v606_v9, %s5256_s9  ;;  %v4063_v32 = vld [vmem:[%s5406_s26 + $0xe4] sm:$0xff]  ;;  %v4025_v33 = vld [vmem:[%s5406_s26 + $0x1b0] sm:$0xff] }
  0x1d   : > { %283 = vst.msk [vmem:[#allocation3 + $0x50] sm:$0xff] %vm272_vm1, %v5251_v0  ;;  %284 = vst.msk [vmem:[#allocation3 + $0x58] sm:$0xff] %vm272_vm1, %v5251_v0  ;;  %4571 = vmatmul.mubr.msk.f32.vlgmr.msra.gmra.mxu0 %vm245_vm0, %v930_v31  ;;  %v4065_v34 = vld [vmem:[%s5406_s26 + $0x174] sm:$0xff]  ;;  %v344_v35 = vld [vmem:[%s5430_s7] sm:$0xff] }
  0x1e   : > { %285 = vst.msk [vmem:[#allocation3 + $0x60] sm:$0xff] %vm272_vm1, %v5251_v0  ;;  %286 = vst.msk [vmem:[#allocation3 + $0x68] sm:$0xff] %vm272_vm1, %v5251_v0  ;;  %4573 = vmatprep.mubr.msk.f32.mxu0 %vm5254_vm2, %v5251_v0  ;;  %v671_v36 = vld [vmem:[%s5406_s26 + $0x5c] sm:$0xf]  ;;  %v4067_v37 = vld [vmem:[%s5406_s26 + $0x204] sm:$0xff] }
  0x1f   : > { %287 = vst.msk [vmem:[#allocation3 + $0x70] sm:$0xff] %vm272_vm1, %v5251_v0  ;;  %288 = vst.msk [vmem:[#allocation3 + $0x78] sm:$0xff] %vm272_vm1, %v5251_v0  ;;  %v4022_v38 = vld [vmem:[%s5406_s26 + $0x98] sm:$0xf]  ;;  %v722_v39 = vld [vmem:[%s5406_s26 + $0x60] sm:$0xff] }
  0x20   : > { %289 = vst.msk [vmem:[#allocation3 + $0x80] sm:$0xff] %vm272_vm1, %v5251_v0  ;;  %290 = vst.msk [vmem:[#allocation3 + $0x88] sm:$0xff] %vm272_vm1, %v5251_v0  ;;  %638 = vrot.lane.b32.xlu1 %v4059_v10, %s5252_s27  ;;  %626 = vrot.lane.b32.xlu0 %v4057_v11, %s5253_s28  ;;  %v710_v40 = vld [vmem:[%s5430_s7 + $0x54] sm:$0xff]  ;;  %v4024_v41 = vld [vmem:[%s5406_s26 + $0x128] sm:$0xf] }
  0x21   : > { %291 = vst.msk [vmem:[#allocation3 + $0x90] sm:$0xff] %vm272_vm1, %v5251_v0  ;;  %292 = vst.msk [vmem:[#allocation3 + $0x98] sm:$0xff] %vm272_vm1, %v5251_v0  ;;  %v4064_v42 = vld [vmem:[%s5406_s26 + $0xec] sm:$0xf]  ;;  %v4026_v43 = vld [vmem:[%s5406_s26 + $0x1b8] sm:$0xf] }
  0x22   : > { %293 = vst.msk [vmem:[#allocation3 + $0xa0] sm:$0xff] %vm272_vm1, %v5251_v0  ;;  %568 = vst.msk [vmem:[#allocation2 + $0x55] sm:$0xff] %vm272_vm1, %v566_v14  ;;  %v358_v44 = vld [vmem:[%s5406_s26 + $0xc] sm:$0xff]  ;;  %v345_v45 = vld [vmem:[%s5430_s7 + $0x8] sm:$0xf] }
  0x23   : > { %569 = vst.msk [vmem:[#allocation2 + $0x5d] sm:$0xf] %vm297_vm3, %v567_v17  ;;  %621 = vst.msk [vmem:[#allocation2 + $0x6b] sm:$0xf] %vm297_vm3, %v619_v24  ;;  %v4069_v46 = vld [vmem:[%s5406_s26 + $0xf0] sm:$0xff]  ;;  %v4071_v47 = vld [vmem:[%s5406_s26 + $0x180] sm:$0xff] }
  0x24   : > { %662 = vrot.lane.b32.xlu1 %v658_v12, %s5256_s9  ;;  %650 = vrot.lane.b32.xlu0 %v4061_v13, %s5255_s8  ;;  %620 = vst.msk [vmem:[#allocation2 + $0x63] sm:$0xff] %vm272_vm1, %v618_v20  ;;  %296 = vst.msk [vmem:[#allocation2 + $0xf] sm:$0xff] %vm272_vm1, %v294_v25  ;;  %v4066_v48 = vld [vmem:[%s5406_s26 + $0x17c] sm:$0xf]  ;;  %v723_v49 = vld [vmem:[%s5406_s26 + $0x68] sm:$0xf] }
  0x25   : > { %672 = vst.msk [vmem:[#allocation2 + $0x71] sm:$0xff] %vm272_vm1, %v670_v29  ;;  %724 = vst.msk [vmem:[#allocation2 + $0x7f] sm:$0xff] %vm272_vm1, %v722_v39  ;;  %v4068_v50 = vld [vmem:[%s5406_s26 + $0x20c] sm:$0xf]  ;;  %v4027_v51 = vld [vmem:[%s5406_s26 + $0x9c] sm:$0xff] }
  0x26   : > { %298 = vst.msk [vmem:[#allocation2 + $0x17] sm:$0xf] %vm297_vm3, %v295_v30  ;;  %673 = vst.msk [vmem:[#allocation2 + $0x79] sm:$0xf] %vm297_vm3, %v671_v36  ;;  %v4029_v52 = vld [vmem:[%s5406_s26 + $0x12c] sm:$0xff]  ;;  %v762_v54 = vld [vmem:[%s5430_s7 + $0x60] sm:$0xff] }
  0x27   : > { %360 = vst.msk [vmem:[#allocation2 + $0x1d] sm:$0xff] %vm272_vm1, %v358_v44  ;;  %v4073_v53 = vld [vmem:[%s5406_s26 + $0x210] sm:$0xff]  ;;  %v711_v55 = vld [vmem:[%s5430_s7 + $0x5c] sm:$0xf]  ;;  %v4070_v57 = vld [vmem:[%s5406_s26 + $0xf8] sm:$0xf] }
  0x28   : > { %640 = vrot.lane.b32.xlu1 %v4060_v15, %s5252_s27  ;;  %628 = vrot.lane.b32.xlu0 %v4058_v16, %s5253_s28  ;;  %725 = vst.msk [vmem:[#allocation2 + $0x87] sm:$0xf] %vm297_vm3, %v723_v49  ;;  %v359_v56 = vld [vmem:[%s5406_s26 + $0x14] sm:$0xf]  ;;  %v4031_v58 = vld [vmem:[%s5406_s26 + $0x1bc] sm:$0xff] }
  0x29   : > { %361 = vst.msk [vmem:[#allocation2 + $0x25] sm:$0xf] %vm297_vm3, %v359_v56  ;;  %v774_v59 = vld [vmem:[%s5406_s26 + $0x6c] sm:$0xff]  ;;  %v4072_v60 = vld [vmem:[%s5406_s26 + $0x188] sm:$0xf]  ;;  %v410_v3 = vld [vmem:[%s5406_s26 + $0x18] sm:$0xff] }
  0x2a   : > { %776 = vst.msk [vmem:[#allocation2 + $0x8d] sm:$0xff] %vm272_vm1, %v774_v59  ;;  %v398_v61 = vld [vmem:[%s5430_s7 + $0xc] sm:$0xff]  ;;  %v4074_v62 = vld [vmem:[%s5406_s26 + $0x218] sm:$0xf]  ;;  %v4028_v63 = vld [vmem:[%s5406_s26 + $0xa4] sm:$0xf] }
  0x2b   : > { %v763_v1 = vld [vmem:[%s5430_s7 + $0x68] sm:$0xf]  ;;  %v4030_v2 = vld [vmem:[%s5406_s26 + $0x134] sm:$0xf]  ;;  %412 = vst.msk [vmem:[#allocation2 + $0x2b] sm:$0xff] %vm272_vm1, %v410_v3  ;;  %v4075_v4 = vld [vmem:[%s5406_s26 + $0xfc] sm:$0xff] }
  0x2c   : > { %652 = vrot.lane.b32.xlu1 %v4062_v21, %s5255_s8  ;;  %304 = vrot.lane.b32.xlu0 %v4021_v22, %s5253_s28  ;;  %v4032_v5 = vld [vmem:[%s5406_s26 + $0x1c4] sm:$0xf]  ;;  %v775_v6 = vld [vmem:[%s5406_s26 + $0x74] sm:$0xf]  ;;  %271 = vst.msk [vmem:[#allocation2 + $0xc0] sm:$0x3f] %vm270_vm12, %v5251_v0 }
  0x2d   : > { %777 = vst.msk [vmem:[#allocation2 + $0x95] sm:$0xf] %vm297_vm3, %v775_v6  ;;  %v4077_v7 = vld [vmem:[%s5406_s26 + $0x18c] sm:$0xff]  ;;  %v399_v8 = vld [vmem:[%s5430_s7 + $0x14] sm:$0xf]  ;;  %v4079_v9 = vld [vmem:[%s5406_s26 + $0x21c] sm:$0xff] }
  0x2e   : > { %v4033_v10 = vld [vmem:[%s5406_s26 + $0xa8] sm:$0xff]  ;;  %v4035_v12 = vld [vmem:[%s5406_s26 + $0x138] sm:$0xff]  ;;  %v411_v13 = vld [vmem:[%s5406_s26 + $0x20] sm:$0xf] }
  0x2f   : > { %v814_v11 = vld [vmem:[%s5430_s7 + $0x6c] sm:$0xff]  ;;  %413 = vst.msk [vmem:[#allocation2 + $0x33] sm:$0xf] %vm297_vm3, %v411_v13  ;;  %v4076_v14 = vld [vmem:[%s5406_s26 + $0x104] sm:$0xf]  ;;  %v826_v16 = vld [vmem:[%s5406_s26 + $0x78] sm:$0xff] }
  0x30   : > { %664 = vrot.lane.b32.xlu1 %v659_v26, %s5256_s9  ;;  %319 = vrot.lane.b32.xlu0 %v4023_v27, %s5252_s27  ;;  %v4037_v15 = vld [vmem:[%s5406_s26 + $0x1c8] sm:$0xff]  ;;  %828 = vst.msk [vmem:[#allocation2 + $0x9b] sm:$0xff] %vm272_vm1, %v826_v16  ;;  %v4078_v17 = vld [vmem:[%s5406_s26 + $0x194] sm:$0xf] }
  0x31   : > { %v450_v18 = vld [vmem:[%s5430_s7 + $0x18] sm:$0xff]  ;;  %v4080_v19 = vld [vmem:[%s5406_s26 + $0x224] sm:$0xf]  ;;  %v4034_v20 = vld [vmem:[%s5406_s26 + $0xb0] sm:$0xf] }
  0x32   : > { %v815_v23 = vld [vmem:[%s5430_s7 + $0x74] sm:$0xf]  ;;  %v4036_v24 = vld [vmem:[%s5406_s26 + $0x140] sm:$0xf]  ;;  %v462_v27 = vld [vmem:[%s5406_s26 + $0x24] sm:$0xff] }
  0x33   : > { %464 = vst.msk [vmem:[#allocation2 + $0x39] sm:$0xff] %vm272_vm1, %v462_v27  ;;  %v4081_v28 = vld [vmem:[%s5406_s26 + $0x108] sm:$0xff]  ;;  %v4038_v29 = vld [vmem:[%s5406_s26 + $0x1d0] sm:$0xf]  ;;  %v4116_v56 = vld [vmem:[%s6823_s2 + $0x38] sm:$0xff] }
  0x34   : > { %678 = vrot.lane.b32.xlu1 %v4063_v32, %s5253_s28  ;;  %334 = vrot.lane.b32.xlu0 %v4025_v33, %s5255_s8  ;;  %v827_v32 = vld [vmem:[%s5406_s26 + $0x80] sm:$0xf]  ;;  %v4083_v33 = vld [vmem:[%s5406_s26 + $0x198] sm:$0xff] }
  0x35   : > { %829 = vst.msk [vmem:[#allocation2 + $0xa3] sm:$0xf] %vm297_vm3, %v827_v32  ;;  %v514_v44 = vld [vmem:[%s5406_s26 + $0x30] sm:$0xff]  ;;  %v463_v49 = vld [vmem:[%s5406_s26 + $0x2c] sm:$0xf]  ;;  %v4049_v16 = vld [vmem:[%s5406_s26 + $0x1e0] sm:$0xff] }
  0x36   : > { %516 = vst.msk [vmem:[#allocation2 + $0x47] sm:$0xff] %vm272_vm1, %v514_v44  ;;  %v4115_v3 = vld [vmem:[%s6823_s2 + $0x30] sm:$0xff]  ;;  %v4048_v27 = vld [vmem:[%s5406_s26 + $0x158] sm:$0xf] }
  0x37   : > { %465 = vst.msk [vmem:[#allocation2 + $0x41] sm:$0xf] %vm297_vm3, %v463_v49  ;;  %v4140_v32 = vld [vmem:[%s6823_s2 + $0x50] sm:$0xff]  ;;  %v4088_v49 = vld [vmem:[%s5406_s26 + $0x11c] sm:$0xf] }
  0x38   : > { %690 = vrot.lane.b32.xlu1 %v4065_v34, %s5252_s27  ;;  %348 = vrot.lane.b32.xlu0 %v344_v35, %s5256_s9  ;;  %v451_v34 = vld [vmem:[%s5430_s7 + $0x20] sm:$0xf] }
  0x3c   : > { %702 = vrot.lane.b32.xlu1 %v4067_v37, %s5255_s8  ;;  %306 = vrot.lane.b32.xlu0 %v4022_v38, %s5253_s28  ;;  %v4085_v37 = vld [vmem:[%s5406_s26 + $0x228] sm:$0xff]  ;;  %v4039_v38 = vld [vmem:[%s5406_s26 + $0xb4] sm:$0xff] }
  0x40   : > { %714 = vrot.lane.b32.xlu1 %v710_v40, %s5256_s9  ;;  %321 = vrot.lane.b32.xlu0 %v4024_v41, %s5252_s27  ;;  %v4144_v41 = vld [vmem:[%s6823_s2 + $0x70] sm:$0xff] }
  0x41   : > { %4707 = vmatpush3.msra.mxu0 %v4144_v41  ;;  %v918_v41 = vld [vmem:[%s5430_s7 + $0x84] sm:$0xff] }
  0x42   : > { %4708 = vmatprep.subr.mxu0 %v5251_v0 }
  0x44   : > { %680 = vrot.lane.b32.xlu1 %v4064_v42, %s5253_s28  ;;  %336 = vrot.lane.b32.xlu0 %v4026_v43, %s5255_s8  ;;  %v866_v42 = vld [vmem:[%s5430_s7 + $0x78] sm:$0xff]  ;;  %v4041_v43 = vld [vmem:[%s5406_s26 + $0x144] sm:$0xff] }
  0x48   : > { %350 = vrot.lane.b32.xlu1 %v345_v45, %s5256_s9  ;;  %730 = vrot.lane.b32.xlu0 %v4069_v46, %s5253_s28 }
  0x4c   : > { %742 = vrot.lane.b32.xlu1 %v4071_v47, %s5252_s27  ;;  %692 = vrot.lane.b32.xlu0 %v4066_v48, %s5252_s27  ;;  %v4118_v48 = vld [vmem:[%s6823_s2 + $0x48] sm:$0xff] }
  0x50   : > { %704 = vrot.lane.b32.xlu1 %v4068_v50, %s5255_s8  ;;  %366 = vrot.lane.b32.xlu0 %v4027_v51, %s5253_s28  ;;  %v4117_v50 = vld [vmem:[%s6823_s2 + $0x40] sm:$0xff]  ;;  %v4082_v51 = vld [vmem:[%s5406_s26 + $0x110] sm:$0xf] }
  0x54   : > { %378 = vrot.lane.b32.xlu1 %v4029_v52, %s5252_s27  ;;  %754 = vrot.lane.b32.xlu0 %v4073_v53, %s5255_s8  ;;  %v4043_v52 = vld [vmem:[%s5406_s26 + $0x1d4] sm:$0xff] }
  0x58   : > { %766 = vrot.lane.b32.xlu1 %v762_v54, %s5256_s9  ;;  %716 = vrot.lane.b32.xlu0 %v711_v55, %s5256_s9  ;;  %v4143_v55 = vld [vmem:[%s6823_s2 + $0x68] sm:$0xff] }
  0x59   : > { %4709 = vmatpush3.msra.mxu0 %v4143_v55 }
  0x5a   : > { %4710 = vmatprep.subr.mxu0 %v5251_v0 }
  0x5c   : > { %732 = vrot.lane.b32.xlu1 %v4070_v57, %s5253_s28  ;;  %390 = vrot.lane.b32.xlu0 %v4031_v58, %s5255_s8  ;;  %v4084_v57 = vld [vmem:[%s5406_s26 + $0x1a0] sm:$0xf] }
  0x60   : > { %744 = vrot.lane.b32.xlu1 %v4072_v60, %s5252_s27  ;;  %402 = vrot.lane.b32.xlu0 %v398_v61, %s5256_s9  ;;  %v502_v60 = vld [vmem:[%s5430_s7 + $0x24] sm:$0xff] }
  0x64   : > { %756 = vrot.lane.b32.xlu1 %v4074_v62, %s5255_s8  ;;  %368 = vrot.lane.b32.xlu0 %v4028_v63, %s5253_s28  ;;  %v4045_v62 = vld [vmem:[%s5406_s26 + $0xc0] sm:$0xff] }
  0x68   : > { %768 = vrot.lane.b32.xlu1 %v763_v1, %s5256_s9  ;;  %380 = vrot.lane.b32.xlu0 %v4030_v2, %s5252_s27  ;;  %v4040_v2 = vld [vmem:[%s5406_s26 + $0xbc] sm:$0xf] }
  0x6c   : > { %782 = vrot.lane.b32.xlu1 %v4075_v4, %s5253_s28  ;;  %392 = vrot.lane.b32.xlu0 %v4032_v5, %s5255_s8  ;;  %v4142_v4 = vld [vmem:[%s6823_s2 + $0x60] sm:$0xff]  ;;  %v4042_v5 = vld [vmem:[%s5406_s26 + $0x14c] sm:$0xf] }
  0x6d   : > { %4711 = vmatpush3.msra.mxu0 %v4142_v4 }
  0x6e   : > { %4712 = vmatprep.subr.mxu0 %v5251_v0 }
  0x70   : > { %794 = vrot.lane.b32.xlu1 %v4077_v7, %s5252_s27  ;;  %404 = vrot.lane.b32.xlu0 %v399_v8, %s5256_s9  ;;  %v4086_v8 = vld [vmem:[%s5406_s26 + $0x230] sm:$0xf] }
  0x74   : > { %806 = vrot.lane.b32.xlu1 %v4079_v9, %s5255_s8  ;;  %418 = vrot.lane.b32.xlu0 %v4033_v10, %s5253_s28  ;;  %v4114_v9 = vld [vmem:[%s6823_s2 + $0x28] sm:$0xff]  ;;  %v515_v10 = vld [vmem:[%s5406_s26 + $0x38] sm:$0xf] }
  0x75   : > { %517 = vst.msk [vmem:[#allocation2 + $0x4f] sm:$0xf] %vm297_vm3, %v515_v10 }
  0x78   : > { %818 = vrot.lane.b32.xlu1 %v814_v11, %s5256_s9  ;;  %430 = vrot.lane.b32.xlu0 %v4035_v12, %s5252_s27  ;;  %v867_v11 = vld [vmem:[%s5430_s7 + $0x80] sm:$0xf] }
  0x7c   : > { %784 = vrot.lane.b32.xlu1 %v4076_v14, %s5253_s28  ;;  %442 = vrot.lane.b32.xlu0 %v4037_v15, %s5255_s8  ;;  %v4047_v15 = vld [vmem:[%s5406_s26 + $0x150] sm:$0xff] }
  0x80   : > { %796 = vrot.lane.b32.xlu1 %v4078_v17, %s5252_s27  ;;  %454 = vrot.lane.b32.xlu0 %v450_v18, %s5256_s9 }
  0x82   : > { %v587_v21 = vpop.permute.xlu1 %586  ;;  %v575_v22 = vpop.permute.xlu0 %574 }
  0x83   : > { %580 = vst.msk [vmem:[#allocation2 + $0x55] sm:$0xff] %vm310_vm4, %v575_v22  ;;  %v878_v22 = vld [vmem:[%s5406_s26 + $0x84] sm:$0xff] }
  0x84   : > { %808 = vrot.lane.b32.xlu1 %v4080_v19, %s5255_s8  ;;  %420 = vrot.lane.b32.xlu0 %v4034_v20, %s5253_s28  ;;  %592 = vst.msk [vmem:[#allocation2 + $0x55] sm:$0xff] %vm325_vm5, %v587_v21  ;;  %v4044_v19 = vld [vmem:[%s5406_s26 + $0x1dc] sm:$0xf]  ;;  %v554_v21 = vld [vmem:[%s5430_s7 + $0x30] sm:$0xff] }
  0x85   : > { %v4141_v20 = vld [vmem:[%s6823_s2 + $0x58] sm:$0xff]  ;;  %880 = vst.msk [vmem:[#allocation2 + $0xa9] sm:$0xff] %vm272_vm1, %v878_v22 }
  0x86   : > { %v589_v25 = vpop.permute.xlu1 %588  ;;  %v577_v26 = vpop.permute.xlu0 %576  ;;  %4713 = vmatpush3.msra.mxu0 %v4141_v20 }
  0x87   : > { %581 = vst.msk [vmem:[#allocation2 + $0x5d] sm:$0xf] %vm312_vm6, %v577_v26  ;;  %v503_v26 = vld [vmem:[%s5430_s7 + $0x2c] sm:$0xf]  ;;  %4714 = vmatprep.subr.mxu0 %v5251_v0 }
  0x88   : > { %820 = vrot.lane.b32.xlu1 %v815_v23, %s5256_s9  ;;  %432 = vrot.lane.b32.xlu0 %v4036_v24, %s5252_s27  ;;  %593 = vst.msk [vmem:[#allocation2 + $0x5d] sm:$0xf] %vm327_vm7, %v589_v25 }
  0x89   : > { %4715 = vmatpush3.msra.mxu0 %v4140_v32 }
  0x8a   : > { %v601_v30 = vpop.permute.xlu1 %600  ;;  %v599_v31 = vpop.permute.xlu0 %598  ;;  %4852 = vmatprep.subr.mxu0 %v5251_v0 }
  0x8b   : > { %605 = vst.msk [vmem:[#allocation2 + $0x5d] sm:$0xf] %vm342_vm8, %v601_v30  ;;  %v4046_v30 = vld [vmem:[%s5406_s26 + $0xc8] sm:$0xf] }
  0x8c   : > { %604 = vst.msk [vmem:[#allocation2 + $0x55] sm:$0xff] %vm340_vm9, %v599_v31  ;;  %834 = vrot.lane.b32.xlu1 %v4081_v28, %s5253_s28  ;;  %444 = vrot.lane.b32.xlu0 %v4038_v29, %s5255_s8  ;;  %v555_v31 = vld [vmem:[%s5430_s7 + $0x38] sm:$0xf] }
  0x8e   : > { %v613_v35 = vpop.permute.xlu1 %612  ;;  %v611_v36 = vpop.permute.xlu0 %610 }
  0x8f   : > { %617 = vst.msk [vmem:[#allocation2 + $0x5d] sm:$0xf] %vm356_vm10, %v613_v35 }
  0x90   : > { %616 = vst.msk [vmem:[#allocation2 + $0x55] sm:$0xff] %vm354_vm11, %v611_v36  ;;  %846 = vrot.lane.b32.xlu1 %v4083_v33, %s5252_s27  ;;  %456 = vrot.lane.b32.xlu0 %v451_v34, %s5256_s9  ;;  %v4050_v36 = vld [vmem:[%s5406_s26 + $0x1e8] sm:$0xf] }
  0x92   : > { %v639_v39 = vpop.permute.xlu1 %638  ;;  %v627_v40 = vpop.permute.xlu0 %626 }
  0x93   : > { %632 = vst.msk [vmem:[#allocation2 + $0x63] sm:$0xff] %vm310_vm4, %v627_v40  ;;  %v4087_v40 = vld [vmem:[%s5406_s26 + $0x114] sm:$0xff] }
  0x94   : > { %644 = vst.msk [vmem:[#allocation2 + $0x63] sm:$0xff] %vm325_vm5, %v639_v39  ;;  %858 = vrot.lane.b32.xlu1 %v4085_v37, %s5255_s8  ;;  %470 = vrot.lane.b32.xlu0 %v4039_v38, %s5253_s28  ;;  %v4089_v37 = vld [vmem:[%s5406_s26 + $0x1a4] sm:$0xff] }
  0x96   : > { %v663_v45 = vpop.permute.xlu1 %662  ;;  %v651_v46 = vpop.permute.xlu0 %650 }
  0x97   : > { %v941_v47 = vld [vmem:[#allocation2 + $0x58] sm:$0xff]  ;;  %656 = vst.msk [vmem:[#allocation2 + $0x63] sm:$0xff] %vm340_vm9, %v651_v46  ;;  %v4090_v46 = vld [vmem:[%s5406_s26 + $0x1ac] sm:$0xf] }
  0x98   : > { %4604 = vmatmul.mubr.msk.f32.vlgmr.msra.gmra.mxu1 %vm245_vm0, %v941_v47  ;;  %668 = vst.msk [vmem:[#allocation2 + $0x63] sm:$0xff] %vm354_vm11, %v663_v45  ;;  %870 = vrot.lane.b32.xlu1 %v866_v42, %s5256_s9  ;;  %v4091_v45 = vld [vmem:[%s5406_s26 + $0x234] sm:$0xff] }
  0x99   : > { %482 = vrot.lane.b32.xlu0 %v4041_v43, %s5252_s27  ;;  %4606 = vmatprep.mubr.msk.f32.mxu1 %vm5254_vm2, %v5251_v0 }
  0x9a   : > { %4634 = vmatpush3.msra.mxu1 %v4118_v48  ;;  %v641_v53 = vpop.permute.xlu1 %640  ;;  %v629_v54 = vpop.permute.xlu0 %628 }
  0x9b   : > { %4635 = vmatprep.subr.mxu1 %v5251_v0  ;;  %633 = vst.msk [vmem:[#allocation2 + $0x6b] sm:$0xf] %vm312_vm6, %v629_v54 }
  0x9c   : > { %4636 = vmatpush3.msra.mxu1 %v4117_v50  ;;  %645 = vst.msk [vmem:[#allocation2 + $0x6b] sm:$0xf] %vm327_vm7, %v641_v53  ;;  %836 = vrot.lane.b32.xlu1 %v4082_v51, %s5253_s28  ;;  %v919_v50 = vld [vmem:[%s5430_s7 + $0x8c] sm:$0xf]  ;;  %v4092_v53 = vld [vmem:[%s5406_s26 + $0x23c] sm:$0xf] }
  0x9d   : > { %494 = vrot.lane.b32.xlu0 %v4043_v52, %s5255_s8  ;;  %4637 = vmatprep.subr.mxu1 %v5251_v0 }
  0x9e   : > { %v653_v58 = vpop.permute.xlu1 %652  ;;  %v305_v59 = vpop.permute.xlu0 %304  ;;  %4638 = vmatpush3.msra.mxu1 %v4116_v56 }
  0x9f   : > { %657 = vst.msk [vmem:[#allocation2 + $0x6b] sm:$0xf] %vm342_vm8, %v653_v58  ;;  %v942_v61 = vld [vmem:[#allocation2 + $0x60] sm:$0xff]  ;;  %4639 = vmatprep.subr.mxu1 %v5251_v0 }
  0xa0   : > { %311 = vst.msk [vmem:[#allocation2 + $0xf] sm:$0xff] %vm310_vm4, %v305_v59  ;;  %4607 = vmatmul.mubr.msk.f32.gmra.mxu1 %vm245_vm0, %v942_v61  ;;  %848 = vrot.lane.b32.xlu1 %v4084_v57, %s5252_s27 }
  0xa1   : > { %506 = vrot.lane.b32.xlu0 %v502_v60, %s5256_s9  ;;  %4609 = vmatprep.mubr.msk.f32.mxu1 %vm5254_vm2, %v5251_v0 }
  0xa2   : > { %v665_v63 = vpop.permute.xlu1 %664  ;;  %v320_v1 = vpop.permute.xlu0 %319  ;;  %4640 = vmatpush3.msra.mxu1 %v4115_v3 }
  0xa3   : > { %669 = vst.msk [vmem:[#allocation2 + $0x6b] sm:$0xf] %vm356_vm10, %v665_v63  ;;  %4641 = vmatprep.subr.mxu1 %v5251_v0 }
  0xa4   : > { %326 = vst.msk [vmem:[#allocation2 + $0xf] sm:$0xff] %vm325_vm5, %v320_v1  ;;  %522 = vrot.lane.b32.xlu1 %v4045_v62, %s5253_s28  ;;  %4642 = vmatpush3.msra.mxu1 %v4114_v9 }
  0xa5   : > { %472 = vrot.lane.b32.xlu0 %v4040_v2, %s5253_s28  ;;  %4779 = vmatprep.subr.mxu1 %v5251_v0 }
  0xa6   : > { %v679_v6 = vpop.permute.xlu1 %678  ;;  %v335_v7 = vpop.permute.xlu0 %334 }
  0xa7   : > { %684 = vst.msk [vmem:[#allocation2 + $0x71] sm:$0xff] %vm310_vm4, %v679_v6 }
  0xa8   : > { %341 = vst.msk [vmem:[#allocation2 + $0xf] sm:$0xff] %vm340_vm9, %v335_v7  ;;  %484 = vrot.lane.b32.xlu1 %v4042_v5, %s5252_s27 }
  0xa9   : > { %860 = vrot.lane.b32.xlu0 %v4086_v8, %s5255_s8 }
  0xaa   : > { %v691_v12 = vpop.permute.xlu1 %690  ;;  %v349_v13 = vpop.permute.xlu0 %348  ;;  %v943_v14 = vld [vmem:[#allocation2 + $0x68] sm:$0xff] }
  0xab   : > { %696 = vst.msk [vmem:[#allocation2 + $0x71] sm:$0xff] %vm325_vm5, %v691_v12  ;;  %4610 = vmatmul.mubr.msk.f32.gmra.mxu1 %vm245_vm0, %v943_v14 }
  0xac   : > { %355 = vst.msk [vmem:[#allocation2 + $0xf] sm:$0xff] %vm354_vm11, %v349_v13  ;;  %872 = vrot.lane.b32.xlu1 %v867_v11, %s5256_s9  ;;  %4612 = vmatprep.mubr.msk.f32.mxu1 %vm5254_vm2, %v5251_v0  ;;  %v951_v13 = vld [vmem:[#allocation3] sm:$0xff] }
  0xad   : > { %534 = vrot.lane.b32.xlu0 %v4047_v15, %s5252_s27 }
  0xae   : > { %v703_v17 = vpop.permute.xlu1 %702  ;;  %v307_v18 = vpop.permute.xlu0 %306 }
  0xaf   : > { %708 = vst.msk [vmem:[#allocation2 + $0x71] sm:$0xff] %vm340_vm9, %v703_v17 }
  0xb0   : > { %313 = vst.msk [vmem:[#allocation2 + $0x17] sm:$0xf] %vm312_vm6, %v307_v18  ;;  %546 = vrot.lane.b32.xlu1 %v4049_v16, %s5255_s8 }
  0xb1   : > { %496 = vrot.lane.b32.xlu0 %v4044_v19, %s5255_s8 }
  0xb2   : > { %v715_v23 = vpop.permute.xlu1 %714  ;;  %v322_v24 = vpop.permute.xlu0 %321 }
  0xb3   : > { %v931_v25 = vld [vmem:[#allocation2 + $0x8] sm:$0xff]  ;;  %720 = vst.msk [vmem:[#allocation2 + $0x71] sm:$0xff] %vm354_vm11, %v715_v23 }
  0xb4   : > { %328 = vst.msk [vmem:[#allocation2 + $0x17] sm:$0xf] %vm327_vm7, %v322_v24  ;;  %4574 = vmatmul.mubr.msk.f32.gmra.mxu0 %vm245_vm0, %v931_v25  ;;  %558 = vrot.lane.b32.xlu1 %v554_v21, %s5256_s9 }
  0xb5   : > { %4576 = vmatprep.mubr.msk.f32.mxu0 %vm5254_vm2, %v5251_v0  ;;  %508 = vrot.lane.b32.xlu0 %v503_v26, %s5256_s9 }
  0xb6   : > { %v681_v28 = vpop.permute.xlu1 %680  ;;  %v337_v29 = vpop.permute.xlu0 %336 }
  0xb7   : > { %685 = vst.msk [vmem:[#allocation2 + $0x79] sm:$0xf] %vm312_vm6, %v681_v28 }
  0xb8   : > { %343 = vst.msk [vmem:[#allocation2 + $0x17] sm:$0xf] %vm342_vm8, %v337_v29  ;;  %536 = vrot.lane.b32.xlu1 %v4048_v27, %s5252_s27  ;;  %v879_v27 = vld [vmem:[%s5406_s26 + $0x8c] sm:$0xf]  ;;  %s6690_s26 = scalar_lea.vmem %s6826_s5, %s5228_s29 }
  0xb9   : > { %524 = vrot.lane.b32.xlu0 %v4046_v30, %s5253_s28  ;;  %881 = vst.msk [vmem:[#allocation2 + $0xb1] sm:$0xf] %vm297_vm3, %v879_v27 }
  0xba   : > { %v351_v33 = vpop.permute.xlu1 %350  ;;  %v731_v34 = vpop.permute.xlu0 %730  ;;  %v944_v35 = vld [vmem:[#allocation2 + $0x70] sm:$0xff] }
  0xbb   : > { %357 = vst.msk [vmem:[#allocation2 + $0x17] sm:$0xf] %vm356_vm10, %v351_v33  ;;  %4613 = vmatmul.mubr.msk.f32.gmra.mxu1 %vm245_vm0, %v944_v35 }
  0xbc   : > { %736 = vst.msk [vmem:[#allocation2 + $0x7f] sm:$0xff] %vm310_vm4, %v731_v34  ;;  %560 = vrot.lane.b32.xlu1 %v555_v31, %s5256_s9  ;;  %4615 = vmatprep.mubr.msk.f32.mxu1 %vm5254_vm2, %v5251_v0 }
  0xbd   : > { %548 = vrot.lane.b32.xlu0 %v4050_v36, %s5255_s8 }
  0xbe   : > { %v743_v38 = vpop.permute.xlu1 %742  ;;  %v693_v39 = vpop.permute.xlu0 %692 }
  0xbf   : > { %748 = vst.msk [vmem:[#allocation2 + $0x7f] sm:$0xff] %vm325_vm5, %v743_v38 }
  0xc0   : > { %697 = vst.msk [vmem:[#allocation2 + $0x79] sm:$0xf] %vm327_vm7, %v693_v39  ;;  %898 = vrot.lane.b32.xlu1 %v4089_v37, %s5252_s27 }
  0xc1   : > { %886 = vrot.lane.b32.xlu0 %v4087_v40, %s5253_s28 }
  0xc2   : > { %v705_v42 = vpop.permute.xlu1 %704  ;;  %v367_v43 = vpop.permute.xlu0 %366  ;;  %v932_v44 = vld [vmem:[#allocation2 + $0x10] sm:$0xff] }
  0xc3   : > { %709 = vst.msk [vmem:[#allocation2 + $0x79] sm:$0xf] %vm342_vm8, %v705_v42  ;;  %4577 = vmatmul.mubr.msk.f32.gmra.mxu0 %vm245_vm0, %v932_v44 }
  0xc4   : > { %372 = vst.msk [vmem:[#allocation2 + $0x1d] sm:$0xff] %vm310_vm4, %v367_v43  ;;  %922 = vrot.lane.b32.xlu1 %v918_v41, %s5256_s9  ;;  %4579 = vmatprep.mubr.msk.f32.mxu0 %vm5254_vm2, %v5251_v0 }
  0xc5   : > { %910 = vrot.lane.b32.xlu0 %v4091_v45, %s5255_s8 }
  0xc6   : > { %v379_v47 = vpop.permute.xlu1 %378  ;;  %v755_v48 = vpop.permute.xlu0 %754 }
  0xc7   : > { %384 = vst.msk [vmem:[#allocation2 + $0x1d] sm:$0xff] %vm325_vm5, %v379_v47 }
  0xc8   : > { %760 = vst.msk [vmem:[#allocation2 + $0x7f] sm:$0xff] %vm340_vm9, %v755_v48  ;;  %900 = vrot.lane.b32.xlu1 %v4090_v46, %s5252_s27 }
  0xc9   : > { %888 = vrot.lane.b32.xlu0 %v4088_v49, %s5253_s28 }
  0xca   : > { %v767_v51 = vpop.permute.xlu1 %766  ;;  %v717_v52 = vpop.permute.xlu0 %716 }
  0xcb   : > { %772 = vst.msk [vmem:[#allocation2 + $0x7f] sm:$0xff] %vm354_vm11, %v767_v51 }
  0xcc   : > { %721 = vst.msk [vmem:[#allocation2 + $0x79] sm:$0xf] %vm356_vm10, %v717_v52  ;;  %924 = vrot.lane.b32.xlu1 %v919_v50, %s5256_s9 }
  0xcd   : > { %912 = vrot.lane.b32.xlu0 %v4092_v53, %s5255_s8  ;;  %v1252_v53 = vld [vmem:[#allocation2 + $0x1] sm:$0xff] }
  0xce   : > { %v733_v54 = vpop.permute.xlu1 %732  ;;  %v391_v55 = vpop.permute.xlu0 %390 }
  0xcf   : > { %737 = vst.msk [vmem:[#allocation2 + $0x87] sm:$0xf] %vm312_vm6, %v733_v54  ;;  %v4170_v54 = vld [vmem:[%s6823_s2 + $0x98] sm:$0xff] }
  0xd0   : > { %396 = vst.msk [vmem:[#allocation2 + $0x1d] sm:$0xff] %vm340_vm9, %v391_v55 }
  0xd2   : > { %v745_v56 = vpop.permute.xlu1 %744  ;;  %v403_v57 = vpop.permute.xlu0 %402 }
  0xd3   : > { %v945_v58 = vld [vmem:[#allocation2 + $0x78] sm:$0xff]  ;;  %749 = vst.msk [vmem:[#allocation2 + $0x87] sm:$0xf] %vm327_vm7, %v745_v56 }
  0xd4   : > { %408 = vst.msk [vmem:[#allocation2 + $0x1d] sm:$0xff] %vm354_vm11, %v403_v57  ;;  %4616 = vmatmul.mubr.msk.f32.gmra.mxu1 %vm245_vm0, %v945_v58  ;;  %v4169_v57 = vld [vmem:[%s6823_s2 + $0x90] sm:$0xff] }
  0xd5   : > { %4618 = vmatprep.mubr.msk.f32.mxu1 %vm5254_vm2, %v5251_v0 }
  0xd6   : > { %v757_v59 = vpop.permute.xlu1 %756  ;;  %v369_v60 = vpop.permute.xlu0 %368 }
  0xd7   : > { %761 = vst.msk [vmem:[#allocation2 + $0x87] sm:$0xf] %vm342_vm8, %v757_v59  ;;  %v1253_v59 = vld [vmem:[#allocation2 + $0x9] sm:$0xff] }
  0xd8   : > { %373 = vst.msk [vmem:[#allocation2 + $0x25] sm:$0xf] %vm312_vm6, %v369_v60  ;;  %v4168_v60 = vld [vmem:[%s6823_s2 + $0x88] sm:$0xff] }
  0xda   : > { %v769_v61 = vpop.permute.xlu1 %768  ;;  %v381_v62 = vpop.permute.xlu0 %380 }
  0xdb   : > { %v933_v63 = vld [vmem:[#allocation2 + $0x18] sm:$0xff]  ;;  %773 = vst.msk [vmem:[#allocation2 + $0x87] sm:$0xf] %vm356_vm10, %v769_v61 }
  0xdc   : > { %385 = vst.msk [vmem:[#allocation2 + $0x25] sm:$0xf] %vm327_vm7, %v381_v62  ;;  %4580 = vmatmul.mubr.msk.f32.gmra.mxu0 %vm245_vm0, %v933_v63  ;;  %v4167_v63 = vld [vmem:[%s6823_s2 + $0x80] sm:$0xff] }
  0xdd   : > { %4582 = vmatprep.mubr.msk.f32.mxu0 %vm5254_vm2, %v5251_v0  ;;  %v1106_v17 = vpop.f32.mrf.mxu0  ;;  %v1578_v27 = vld [vmem:[#allocation2 + $0x1a] sm:$0xff] }
  0xde   : > { %v783_v1 = vpop.permute.xlu1 %782  ;;  %v393_v2 = vpop.permute.xlu0 %392  ;;  %v1210_v18 = vadd.f32 %v1106_v17, %v951_v13 }
  0xdf   : > { %788 = vst.msk [vmem:[#allocation2 + $0x8d] sm:$0xff] %vm310_vm4, %v783_v1  ;;  %v4572_v19 = vpop.f32.mrf.mxu0 }
  0xe0   : > { %397 = vst.msk [vmem:[#allocation2 + $0x25] sm:$0xf] %vm342_vm8, %v393_v2  ;;  %v1254_v2 = vld [vmem:[#allocation2 + $0x11] sm:$0xff] }
  0xe1   : > { %1231 = vst.msk [vmem:[#allocation3] sm:$0xff] %vm272_vm1, %v1210_v18  ;;  %v4195_v18 = vld [vmem:[%s6823_s2 + $0xb8] sm:$0xff] }
  0xe2   : > { %v795_v3 = vpop.permute.xlu1 %794  ;;  %v405_v4 = vpop.permute.xlu0 %404  ;;  %v946_v5 = vld [vmem:[#allocation2 + $0x80] sm:$0xff] }
  0xe3   : > { %800 = vst.msk [vmem:[#allocation2 + $0x8d] sm:$0xff] %vm325_vm5, %v795_v3  ;;  %4619 = vmatmul.mubr.msk.f32.gmra.mxu1 %vm245_vm0, %v946_v5 }
  0xe4   : > { %409 = vst.msk [vmem:[#allocation2 + $0x25] sm:$0xf] %vm356_vm10, %v405_v4  ;;  %4621 = vmatprep.mubr.msk.f32.mxu1 %vm5254_vm2, %v5251_v0  ;;  %v4166_v4 = vld [vmem:[%s6823_s2 + $0x78] sm:$0xff] }
  0xe6   : > { %v807_v6 = vpop.permute.xlu1 %806  ;;  %v419_v7 = vpop.permute.xlu0 %418 }
  0xe7   : > { %812 = vst.msk [vmem:[#allocation2 + $0x8d] sm:$0xff] %vm340_vm9, %v807_v6  ;;  %v1255_v6 = vld [vmem:[#allocation2 + $0x19] sm:$0xff] }
  0xe8   : > { %424 = vst.msk [vmem:[#allocation2 + $0x2b] sm:$0xff] %vm310_vm4, %v419_v7 }
  0xea   : > { %v819_v8 = vpop.permute.xlu1 %818  ;;  %v431_v9 = vpop.permute.xlu0 %430 }
  0xeb   : > { %v934_v10 = vld [vmem:[#allocation2 + $0x20] sm:$0xff]  ;;  %824 = vst.msk [vmem:[#allocation2 + $0x8d] sm:$0xff] %vm354_vm11, %v819_v8 }
  0xec   : > { %436 = vst.msk [vmem:[#allocation2 + $0x2b] sm:$0xff] %vm325_vm5, %v431_v9  ;;  %4583 = vmatmul.mubr.msk.f32.gmra.mxu0 %vm245_vm0, %v934_v10  ;;  %v1256_v9 = vld [vmem:[#allocation2 + $0x21] sm:$0xff] }
  0xed   : > { %4585 = vmatprep.mubr.msk.f32.mxu0 %vm5254_vm2, %v5251_v0 }
  0xee   : > { %v785_v11 = vpop.permute.xlu1 %784  ;;  %v443_v12 = vpop.permute.xlu0 %442 }
  0xef   : > { %789 = vst.msk [vmem:[#allocation2 + $0x95] sm:$0xf] %vm312_vm6, %v785_v11 }
  0xf0   : > { %448 = vst.msk [vmem:[#allocation2 + $0x2b] sm:$0xff] %vm340_vm9, %v443_v12 }
  0xf2   : > { %v797_v14 = vpop.permute.xlu1 %796  ;;  %v455_v15 = vpop.permute.xlu0 %454  ;;  %v947_v16 = vld [vmem:[#allocation2 + $0x88] sm:$0xff] }
  0xf3   : > { %801 = vst.msk [vmem:[#allocation2 + $0x95] sm:$0xf] %vm327_vm7, %v797_v14  ;;  %4622 = vmatmul.mubr.msk.f32.gmra.mxu1 %vm245_vm0, %v947_v16  ;;  %v1575_v14 = vld [vmem:[#allocation2 + $0x2] sm:$0xff] }
  0xf4   : > { %460 = vst.msk [vmem:[#allocation2 + $0x2b] sm:$0xff] %vm354_vm11, %v455_v15  ;;  %4624 = vmatprep.mubr.msk.f32.mxu1 %vm5254_vm2, %v5251_v0  ;;  %v4196_v16 = vld [vmem:[%s6823_s2 + $0xc0] sm:$0xff] }
  0xf6   : > { %v809_v20 = vpop.permute.xlu1 %808  ;;  %v421_v21 = vpop.permute.xlu0 %420 }
  0xf7   : > { %813 = vst.msk [vmem:[#allocation2 + $0x95] sm:$0xf] %vm342_vm8, %v809_v20  ;;  %v4194_v20 = vld [vmem:[%s6823_s2 + $0xb0] sm:$0xff] }
  0xf8   : > { %425 = vst.msk [vmem:[#allocation2 + $0x33] sm:$0xf] %vm312_vm6, %v421_v21  ;;  %v1576_v21 = vld [vmem:[#allocation2 + $0xa] sm:$0xff] }
  0xfa   : > { %v821_v22 = vpop.permute.xlu1 %820  ;;  %v433_v23 = vpop.permute.xlu0 %432 }
  0xfb   : > { %v935_v24 = vld [vmem:[#allocation2 + $0x28] sm:$0xff]  ;;  %825 = vst.msk [vmem:[#allocation2 + $0x95] sm:$0xf] %vm356_vm10, %v821_v22 }
  0xfc   : > { %437 = vst.msk [vmem:[#allocation2 + $0x33] sm:$0xf] %vm327_vm7, %v433_v23  ;;  %4586 = vmatmul.mubr.msk.f32.gmra.mxu0 %vm245_vm0, %v935_v24  ;;  %v1257_v13 = vld [vmem:[#allocation2 + $0x29] sm:$0xff]  ;;  %v4192_v24 = vld [vmem:[%s6823_s2 + $0xa0] sm:$0xff] }
  0xfd   : > { %4588 = vmatprep.mubr.msk.f32.mxu0 %vm5254_vm2, %v5251_v0  ;;  %v4193_v22 = vld [vmem:[%s6823_s2 + $0xa8] sm:$0xff] }
  0xfe   : > { %v835_v25 = vpop.permute.xlu1 %834  ;;  %v445_v26 = vpop.permute.xlu0 %444 }
  0xff   : > { %840 = vst.msk [vmem:[#allocation2 + $0x9b] sm:$0xff] %vm310_vm4, %v835_v25  ;;  %v1577_v25 = vld [vmem:[#allocation2 + $0x12] sm:$0xff] }
 0x100   : > { %449 = vst.msk [vmem:[#allocation2 + $0x33] sm:$0xf] %vm342_vm8, %v445_v26 }
 0x102   : > { %v847_v28 = vpop.permute.xlu1 %846  ;;  %v457_v29 = vpop.permute.xlu0 %456  ;;  %v948_v30 = vld [vmem:[#allocation2 + $0x90] sm:$0xff] }
 0x103   : > { %852 = vst.msk [vmem:[#allocation2 + $0x9b] sm:$0xff] %vm325_vm5, %v847_v28  ;;  %4625 = vmatmul.mubr.msk.f32.gmra.mxu1 %vm245_vm0, %v948_v30 }
 0x104   : > { %461 = vst.msk [vmem:[#allocation2 + $0x33] sm:$0xf] %vm356_vm10, %v457_v29  ;;  %4627 = vmatprep.mubr.msk.f32.mxu1 %vm5254_vm2, %v5251_v0  ;;  %v1579_v29 = vld [vmem:[#allocation2 + $0x22] sm:$0xff] }
 0x106   : > { %v859_v31 = vpop.permute.xlu1 %858  ;;  %v471_v32 = vpop.permute.xlu0 %470 }
 0x107   : > { %864 = vst.msk [vmem:[#allocation2 + $0x9b] sm:$0xff] %vm340_vm9, %v859_v31  ;;  %v1580_v31 = vld [vmem:[#allocation2 + $0x2a] sm:$0xff] }
 0x108   : > { %476 = vst.msk [vmem:[#allocation2 + $0x39] sm:$0xff] %vm310_vm4, %v471_v32  ;;  %v962_v32 = vld [vmem:[#allocation3 + $0x58] sm:$0xff] }
 0x10a   : > { %v871_v33 = vpop.permute.xlu1 %870 }
 0x10b   : > { %v483_v34 = vpop.permute.xlu0 %482  ;;  %v936_v35 = vld [vmem:[#allocation2 + $0x30] sm:$0xff]  ;;  %876 = vst.msk [vmem:[#allocation2 + $0x9b] sm:$0xff] %vm354_vm11, %v871_v33  ;;  %v1263_v33 = vld [vmem:[#allocation2 + $0x59] sm:$0xff] }
 0x10c   : > { %488 = vst.msk [vmem:[#allocation2 + $0x39] sm:$0xff] %vm325_vm5, %v483_v34  ;;  %4589 = vmatmul.mubr.msk.f32.gmra.mxu0 %vm245_vm0, %v936_v35  ;;  %v1258_v19 = vld [vmem:[#allocation2 + $0x31] sm:$0xff] }
 0x10d   : > { %4591 = vmatprep.mubr.msk.f32.mxu0 %vm5254_vm2, %v5251_v0 }
 0x10e   : > { %v837_v36 = vpop.permute.xlu1 %836 }
 0x10f   : > { %v495_v37 = vpop.permute.xlu0 %494  ;;  %841 = vst.msk [vmem:[#allocation2 + $0xa3] sm:$0xf] %vm312_vm6, %v837_v36 }
 0x110   : > { %500 = vst.msk [vmem:[#allocation2 + $0x39] sm:$0xff] %vm340_vm9, %v495_v37 }
 0x112   : > { %v849_v38 = vpop.permute.xlu1 %848  ;;  %v949_v39 = vld [vmem:[#allocation2 + $0x98] sm:$0xff] }
 0x113   : > { %853 = vst.msk [vmem:[#allocation2 + $0xa3] sm:$0xf] %vm327_vm7, %v849_v38  ;;  %v507_v40 = vpop.permute.xlu0 %506  ;;  %4628 = vmatmul.mubr.msk.f32.gmra.mxu1 %vm245_vm0, %v949_v39  ;;  %v1264_v38 = vld [vmem:[#allocation2 + $0x61] sm:$0xff] }
 0x114   : > { %512 = vst.msk [vmem:[#allocation2 + $0x39] sm:$0xff] %vm354_vm11, %v507_v40  ;;  %4630 = vmatprep.mubr.msk.f32.mxu1 %vm5254_vm2, %v5251_v0  ;;  %v1265_v40 = vld [vmem:[#allocation2 + $0x69] sm:$0xff] }
 0x116   : > { %v523_v41 = vpop.permute.xlu1 %522 }
 0x117   : > { %528 = vst.msk [vmem:[#allocation2 + $0x47] sm:$0xff] %vm310_vm4, %v523_v41  ;;  %v473_v42 = vpop.permute.xlu0 %472  ;;  %v963_v41 = vld [vmem:[#allocation3 + $0x60] sm:$0xff] }
 0x118   : > { %477 = vst.msk [vmem:[#allocation2 + $0x41] sm:$0xf] %vm312_vm6, %v473_v42 }
 0x11a   : > { %v485_v43 = vpop.permute.xlu1 %484 }
 0x11b   : > { %489 = vst.msk [vmem:[#allocation2 + $0x41] sm:$0xf] %vm327_vm7, %v485_v43  ;;  %v861_v44 = vpop.permute.xlu0 %860  ;;  %v5848_v45 = vld [vmem:[#allocation2 + $0x38] sm:$0xff] }
 0x11c   : > { %865 = vst.msk [vmem:[#allocation2 + $0xa3] sm:$0xf] %vm342_vm8, %v861_v44  ;;  %4592 = vmatmul.mubr.msk.f32.gmra.mxu0 %vm245_vm0, %v5848_v45  ;;  %v1259_v23 = vld [vmem:[#allocation2 + $0x39] sm:$0xff] }
 0x11d   : > { %4594 = vmatprep.mubr.msk.f32.mxu0 %vm5254_vm2, %v5251_v0  ;;  %v1581_v36 = vld [vmem:[#allocation2 + $0x32] sm:$0xff] }
 0x11e   : > { %v873_v46 = vpop.permute.xlu1 %872 }
 0x11f   : > { %877 = vst.msk [vmem:[#allocation2 + $0xa3] sm:$0xf] %vm356_vm10, %v873_v46  ;;  %v535_v47 = vpop.permute.xlu0 %534 }
 0x120   : > { %540 = vst.msk [vmem:[#allocation2 + $0x47] sm:$0xff] %vm325_vm5, %v535_v47  ;;  %v1266_v47 = vld [vmem:[#allocation2 + $0x71] sm:$0xff] }
 0x122   : > { %v547_v48 = vpop.permute.xlu1 %546 }
 0x123   : > { %552 = vst.msk [vmem:[#allocation2 + $0x47] sm:$0xff] %vm340_vm9, %v547_v48  ;;  %v497_v49 = vpop.permute.xlu0 %496 }
 0x124   : > { %501 = vst.msk [vmem:[#allocation2 + $0x41] sm:$0xf] %vm342_vm8, %v497_v49  ;;  %v1267_v49 = vld [vmem:[#allocation2 + $0x79] sm:$0xff] }
 0x126   : > { %v559_v50 = vpop.permute.xlu1 %558  ;;  %v950_v51 = vld [vmem:[#allocation2 + $0xa0] sm:$0xff] }
 0x127   : > { %564 = vst.msk [vmem:[#allocation2 + $0x47] sm:$0xff] %vm354_vm11, %v559_v50  ;;  %v509_v52 = vpop.permute.xlu0 %508  ;;  %4631 = vmatmul.mubr.msk.f32.gmra.mxu1 %vm245_vm0, %v950_v51  ;;  %v964_v51 = vld [vmem:[#allocation3 + $0x68] sm:$0xff] }
 0x128   : > { %513 = vst.msk [vmem:[#allocation2 + $0x41] sm:$0xf] %vm356_vm10, %v509_v52  ;;  %4643 = vmatprep.mubr.msk.f32.mxu1 %vm5254_vm2, %v5251_v0  ;;  %v1268_v52 = vld [vmem:[#allocation2 + $0x81] sm:$0xff] }
 0x12a   : > { %v537_v55 = vpop.permute.xlu1 %536 }
 0x12b   : > { %v525_v56 = vpop.permute.xlu0 %524  ;;  %4644 = vmatmul.mubr.msk.f32.vlgmr.msra.gmra.mxu1 %vm245_vm0, %v1252_v53 }
 0x12c   : > { %529 = vst.msk [vmem:[#allocation2 + $0x4f] sm:$0xf] %vm312_vm6, %v525_v56  ;;  %4646 = vmatprep.mubr.msk.f32.mxu1 %vm5254_vm2, %v5251_v0  ;;  %4780 = vmatpush3.msra.mxu1 %v4170_v54 }
 0x12d   : > { %541 = vst.msk [vmem:[#allocation2 + $0x4f] sm:$0xf] %vm327_vm7, %v537_v55  ;;  %4781 = vmatprep.subr.mxu1 %v5251_v0  ;;  %v1586_v55 = vld [vmem:[#allocation2 + $0x5a] sm:$0xff] }
 0x12e   : > { %v561_v58 = vpop.permute.xlu1 %560  ;;  %4782 = vmatpush3.msra.mxu1 %v4169_v57  ;;  %v1269_v57 = vld [vmem:[#allocation2 + $0x89] sm:$0xff] }
 0x12f   : > { %v549_v61 = vpop.permute.xlu0 %548  ;;  %v5879_v62 = vld [vmem:[#allocation2 + $0x40] sm:$0xff]  ;;  %4647 = vmatmul.mubr.msk.f32.gmra.mxu1 %vm245_vm0, %v1253_v59  ;;  %4783 = vmatprep.subr.mxu1 %v5251_v0  ;;  %v952_v59 = vld [vmem:[#allocation3 + $0x8] sm:$0xff] }
 0x130   : > { %553 = vst.msk [vmem:[#allocation2 + $0x4f] sm:$0xf] %vm342_vm8, %v549_v61  ;;  %4595 = vmatmul.mubr.msk.f32.gmra.mxu0 %vm245_vm0, %v5879_v62  ;;  %4649 = vmatprep.mubr.msk.f32.mxu1 %vm5254_vm2, %v5251_v0  ;;  %v1260_v26 = vld [vmem:[#allocation2 + $0x41] sm:$0xff] }
 0x131   : > { %565 = vst.msk [vmem:[#allocation2 + $0x4f] sm:$0xf] %vm356_vm10, %v561_v58  ;;  %4597 = vmatprep.mubr.msk.f32.mxu0 %vm5254_vm2, %v5251_v0  ;;  %4784 = vmatpush3.msra.mxu1 %v4168_v60  ;;  %v1582_v39 = vld [vmem:[#allocation2 + $0x3a] sm:$0xff]  ;;  %v1583_v43 = vld [vmem:[#allocation2 + $0x42] sm:$0xff]  ;;  %v1270_v60 = vld [vmem:[#allocation2 + $0x91] sm:$0xff] }
 0x132   : > { %v899_v1 = vpop.permute.xlu1 %898  ;;  %4785 = vmatprep.subr.mxu1 %v5251_v0  ;;  %v1587_v58 = vld [vmem:[#allocation2 + $0x62] sm:$0xff] }
 0x133   : > { %v887_v3 = vpop.permute.xlu0 %886  ;;  %4650 = vmatmul.mubr.msk.f32.gmra.mxu1 %vm245_vm0, %v1254_v2 }
 0x134   : > { %892 = vst.msk [vmem:[#allocation2 + $0xa9] sm:$0xff] %vm310_vm4, %v887_v3  ;;  %4652 = vmatprep.mubr.msk.f32.mxu1 %vm5254_vm2, %v5251_v0  ;;  %4786 = vmatpush3.msra.mxu1 %v4167_v63  ;;  %v1271_v3 = vld [vmem:[#allocation2 + $0x99] sm:$0xff] }
 0x135   : > { %904 = vst.msk [vmem:[#allocation2 + $0xa9] sm:$0xff] %vm325_vm5, %v899_v1  ;;  %4787 = vmatprep.subr.mxu1 %v5251_v0  ;;  %v1588_v1 = vld [vmem:[#allocation2 + $0x6a] sm:$0xff] }
 0x136   : > { %v923_v5 = vpop.permute.xlu1 %922  ;;  %4788 = vmatpush3.msra.mxu1 %v4166_v4  ;;  %v1589_v4 = vld [vmem:[#allocation2 + $0x72] sm:$0xff] }
 0x137   : > { %v911_v7 = vpop.permute.xlu0 %910  ;;  %4653 = vmatmul.mubr.msk.f32.gmra.mxu1 %vm245_vm0, %v1255_v6  ;;  %4925 = vmatprep.subr.mxu1 %v5251_v0  ;;  %v1272_v6 = vld [vmem:[#allocation2 + $0xa1] sm:$0xff] }
 0x138   : > { %916 = vst.msk [vmem:[#allocation2 + $0xa9] sm:$0xff] %vm340_vm9, %v911_v7  ;;  %v5907_v8 = vld [vmem:[#allocation2 + $0x48] sm:$0xff]  ;;  %4655 = vmatprep.mubr.msk.f32.mxu1 %vm5254_vm2, %v5251_v0  ;;  %v5917_v12 = vld [vmem:[#allocation2 + $0x50] sm:$0xff] }
 0x139   : > { %928 = vst.msk [vmem:[#allocation2 + $0xa9] sm:$0xff] %vm354_vm11, %v923_v5  ;;  %4598 = vmatmul.mubr.msk.f32.gmra.mxu0 %vm245_vm0, %v5907_v8  ;;  %v1261_v28 = vld [vmem:[#allocation2 + $0x49] sm:$0xff]  ;;  %v1262_v30 = vld [vmem:[#allocation2 + $0x51] sm:$0xff] }
 0x13a   : > { %4600 = vmatprep.mubr.msk.f32.mxu0 %vm5254_vm2, %v5251_v0  ;;  %v901_v10 = vpop.permute.xlu1 %900  ;;  %v1584_v48 = vld [vmem:[#allocation2 + $0x4a] sm:$0xff]  ;;  %v1585_v50 = vld [vmem:[#allocation2 + $0x52] sm:$0xff] }
 0x13b   : > { %4656 = vmatmul.mubr.msk.f32.gmra.mxu1 %vm245_vm0, %v1256_v9  ;;  %v889_v11 = vpop.permute.xlu0 %888  ;;  %v965_v5 = vld [vmem:[#allocation3 + $0x70] sm:$0xff] }
 0x13c   : > { %4658 = vmatprep.mubr.msk.f32.mxu1 %vm5254_vm2, %v5251_v0  ;;  %893 = vst.msk [vmem:[#allocation2 + $0xb1] sm:$0xf] %vm312_vm6, %v889_v11 }
 0x13d   : > { %4601 = vmatmul.mubr.msk.f32.gmra.mxu0 %vm245_vm0, %v5917_v12  ;;  %905 = vst.msk [vmem:[#allocation2 + $0xb1] sm:$0xf] %vm327_vm7, %v901_v10  ;;  %v1590_v10 = vld [vmem:[#allocation2 + $0x7a] sm:$0xff] }
 0x13e   : > { %4716 = vmatprep.mubr.msk.f32.mxu0 %vm5254_vm2, %v5251_v0  ;;  %v925_v15 = vpop.permute.xlu1 %924 }
 0x13f   : > { %4659 = vmatmul.mubr.msk.f32.gmra.mxu1 %vm245_vm0, %v1257_v13  ;;  %v913_v17 = vpop.permute.xlu0 %912  ;;  %v4222_v13 = vld [vmem:[%s6823_s2 + $0xe8] sm:$0xff] }
 0x140   : > { %4661 = vmatprep.mubr.msk.f32.mxu1 %vm5254_vm2, %v5251_v0  ;;  %917 = vst.msk [vmem:[#allocation2 + $0xb1] sm:$0xf] %vm342_vm8, %v913_v17  ;;  %v953_v17 = vld [vmem:[#allocation3 + $0x10] sm:$0xff] }
 0x141   : > { %4717 = vmatmul.mubr.msk.f32.vlgmr.msra.gmra.mxu0 %vm245_vm0, %v1575_v14  ;;  %929 = vst.msk [vmem:[#allocation2 + $0xb1] sm:$0xf] %vm356_vm10, %v925_v15  ;;  %v1898_v14 = vld [vmem:[#allocation2 + $0xe] sm:$0xff]  ;;  %v4221_v15 = vld [vmem:[%s6823_s2 + $0xe0] sm:$0xff] }
 0x142   : > { %4853 = vmatpush3.msra.mxu0 %v4196_v16  ;;  %4719 = vmatprep.mubr.msk.f32.mxu0 %vm5254_vm2, %v5251_v0  ;;  %v1591_v16 = vld [vmem:[#allocation2 + $0x82] sm:$0xff] }
 0x143   : > { %4662 = vmatmul.mubr.msk.f32.gmra.mxu1 %vm245_vm0, %v1258_v19  ;;  %4854 = vmatprep.subr.mxu0 %v5251_v0  ;;  %v1899_v19 = vld [vmem:[#allocation2 + $0x16] sm:$0xff] }
 0x144   : > { %4664 = vmatprep.mubr.msk.f32.mxu1 %vm5254_vm2, %v5251_v0  ;;  %4855 = vmatpush3.msra.mxu0 %v4195_v18  ;;  %v4220_v18 = vld [vmem:[%s6823_s2 + $0xd8] sm:$0xff] }
 0x145   : > { %4720 = vmatmul.mubr.msk.f32.gmra.mxu0 %vm245_vm0, %v1576_v21  ;;  %4856 = vmatprep.subr.mxu0 %v5251_v0  ;;  %v4219_v21 = vld [vmem:[%s6823_s2 + $0xd0] sm:$0xff] }
 0x146   : > { %4722 = vmatprep.mubr.msk.f32.mxu0 %vm5254_vm2, %v5251_v0  ;;  %4857 = vmatpush3.msra.mxu0 %v4194_v20 }
 0x147   : > { %4665 = vmatmul.mubr.msk.f32.gmra.mxu1 %vm245_vm0, %v1259_v23  ;;  %4858 = vmatprep.subr.mxu0 %v5251_v0  ;;  %v1592_v23 = vld [vmem:[#allocation2 + $0x8a] sm:$0xff] }
 0x148   : > { %4667 = vmatprep.mubr.msk.f32.mxu1 %vm5254_vm2, %v5251_v0  ;;  %4859 = vmatpush3.msra.mxu0 %v4193_v22 }
 0x149   : > { %4723 = vmatmul.mubr.msk.f32.gmra.mxu0 %vm245_vm0, %v1577_v25  ;;  %4860 = vmatprep.subr.mxu0 %v5251_v0  ;;  %v4218_v25 = vld [vmem:[%s6823_s2 + $0xc8] sm:$0xff] }
 0x14a   : > { %4725 = vmatprep.mubr.msk.f32.mxu0 %vm5254_vm2, %v5251_v0  ;;  %4861 = vmatpush3.msra.mxu0 %v4192_v24 }
 0x14b   : > { %4668 = vmatmul.mubr.msk.f32.gmra.mxu1 %vm245_vm0, %v1260_v26  ;;  %4998 = vmatprep.subr.mxu0 %v5251_v0  ;;  %v1900_v26 = vld [vmem:[#allocation2 + $0x1e] sm:$0xff] }
 0x14c   : > { %4670 = vmatprep.mubr.msk.f32.mxu1 %vm5254_vm2, %v5251_v0 }
 0x14d   : > { %4726 = vmatmul.mubr.msk.f32.gmra.mxu0 %vm245_vm0, %v1578_v27  ;;  %v1593_v27 = vld [vmem:[#allocation2 + $0x92] sm:$0xff] }
 0x14e   : > { %4728 = vmatprep.mubr.msk.f32.mxu0 %vm5254_vm2, %v5251_v0 }
 0x14f   : > { %4671 = vmatmul.mubr.msk.f32.gmra.mxu1 %vm245_vm0, %v1261_v28  ;;  %v1901_v28 = vld [vmem:[#allocation2 + $0x26] sm:$0xff] }
 0x150   : > { %4673 = vmatprep.mubr.msk.f32.mxu1 %vm5254_vm2, %v5251_v0 }
 0x151   : > { %4729 = vmatmul.mubr.msk.f32.gmra.mxu0 %vm245_vm0, %v1579_v29  ;;  %v1594_v29 = vld [vmem:[#allocation2 + $0x9a] sm:$0xff] }
 0x152   : > { %4731 = vmatprep.mubr.msk.f32.mxu0 %vm5254_vm2, %v5251_v0 }
 0x153   : > { %4674 = vmatmul.mubr.msk.f32.gmra.mxu1 %vm245_vm0, %v1262_v30  ;;  %v1902_v30 = vld [vmem:[#allocation2 + $0x2e] sm:$0xff] }
 0x154   : > { %4676 = vmatprep.mubr.msk.f32.mxu1 %vm5254_vm2, %v5251_v0 }
 0x155   : > { %4732 = vmatmul.mubr.msk.f32.gmra.mxu0 %vm245_vm0, %v1580_v31  ;;  %v1595_v31 = vld [vmem:[#allocation2 + $0xa2] sm:$0xff] }
 0x156   : > { %4734 = vmatprep.mubr.msk.f32.mxu0 %vm5254_vm2, %v5251_v0 }
 0x157   : > { %4677 = vmatmul.mubr.msk.f32.gmra.mxu1 %vm245_vm0, %v1263_v33  ;;  %v1903_v33 = vld [vmem:[#allocation2 + $0x36] sm:$0xff] }
 0x158   : > { %v1161_v34 = vpop.f32.mrf.mxu1  ;;  %4679 = vmatprep.mubr.msk.f32.mxu1 %vm5254_vm2, %v5251_v0 }
 0x159   : > { %v1221_v35 = vadd.f32 %v1161_v34, %v962_v32  ;;  %4735 = vmatmul.mubr.msk.f32.gmra.mxu0 %vm245_vm0, %v1581_v36  ;;  %v966_v32 = vld [vmem:[#allocation3 + $0x78] sm:$0xff] }
 0x15a   : > { %v4605_v37 = vpop.f32.mrf.mxu1  ;;  %4737 = vmatprep.mubr.msk.f32.mxu0 %vm5254_vm2, %v5251_v0 }
 0x15b   : > { %1242 = vst.msk [vmem:[#allocation3 + $0x58] sm:$0xff] %vm272_vm1, %v1221_v35  ;;  %4680 = vmatmul.mubr.msk.f32.gmra.mxu1 %vm245_vm0, %v1264_v38  ;;  %v4248_v35 = vld [vmem:[%s6823_s2 + $0x110] sm:$0xff] }
 0x15c   : > { %4682 = vmatprep.mubr.msk.f32.mxu1 %vm5254_vm2, %v5251_v0  ;;  %v2221_v37 = vld [vmem:[#allocation2 + $0xf] sm:$0xff] }
 0x15d   : > { %4738 = vmatmul.mubr.msk.f32.gmra.mxu0 %vm245_vm0, %v1582_v39  ;;  %v4247_v39 = vld [vmem:[%s6823_s2 + $0x108] sm:$0xff] }
 0x15e   : > { %4740 = vmatprep.mubr.msk.f32.mxu0 %vm5254_vm2, %v5251_v0 }
 0x15f   : > { %4683 = vmatmul.mubr.msk.f32.gmra.mxu1 %vm245_vm0, %v1265_v40  ;;  %v1904_v40 = vld [vmem:[#allocation2 + $0x3e] sm:$0xff] }
 0x160   : > { %v1166_v42 = vpop.f32.mrf.mxu1  ;;  %4685 = vmatprep.mubr.msk.f32.mxu1 %vm5254_vm2, %v5251_v0 }
 0x161   : > { %v1222_v44 = vadd.f32 %v1166_v42, %v963_v41  ;;  %4741 = vmatmul.mubr.msk.f32.gmra.mxu0 %vm245_vm0, %v1583_v43  ;;  %v4246_v41 = vld [vmem:[%s6823_s2 + $0x100] sm:$0xff]  ;;  %v2222_v42 = vld [vmem:[#allocation2 + $0x17] sm:$0xff] }
 0x162   : > { %v4608_v46 = vpop.f32.mrf.mxu1  ;;  %4743 = vmatprep.mubr.msk.f32.mxu0 %vm5254_vm2, %v5251_v0  ;;  %v954_v43 = vld [vmem:[#allocation3 + $0x18] sm:$0xff] }
 0x163   : > { %1243 = vst.msk [vmem:[#allocation3 + $0x60] sm:$0xff] %vm272_vm1, %v1222_v44  ;;  %4686 = vmatmul.mubr.msk.f32.gmra.mxu1 %vm245_vm0, %v1266_v47  ;;  %v4245_v44 = vld [vmem:[%s6823_s2 + $0xf8] sm:$0xff]  ;;  %v1905_v46 = vld [vmem:[#allocation2 + $0x46] sm:$0xff] }
 0x164   : > { %4688 = vmatprep.mubr.msk.f32.mxu1 %vm5254_vm2, %v5251_v0 }
 0x165   : > { %4744 = vmatmul.mubr.msk.f32.gmra.mxu0 %vm245_vm0, %v1584_v48  ;;  %v4244_v48 = vld [vmem:[%s6823_s2 + $0xf0] sm:$0xff] }
 0x166   : > { %4746 = vmatprep.mubr.msk.f32.mxu0 %vm5254_vm2, %v5251_v0 }
 0x167   : > { %4689 = vmatmul.mubr.msk.f32.gmra.mxu1 %vm245_vm0, %v1267_v49 }
 0x168   : > { %4691 = vmatprep.mubr.msk.f32.mxu1 %vm5254_vm2, %v5251_v0 }
 0x169   : > { %4747 = vmatmul.mubr.msk.f32.gmra.mxu0 %vm245_vm0, %v1585_v50  ;;  %v2223_v50 = vld [vmem:[#allocation2 + $0x1f] sm:$0xff] }
 0x16a   : > { %4749 = vmatprep.mubr.msk.f32.mxu0 %vm5254_vm2, %v5251_v0 }
 0x16b   : > { %v1171_v53 = vpop.f32.mrf.mxu1  ;;  %4692 = vmatmul.mubr.msk.f32.gmra.mxu1 %vm245_vm0, %v1268_v52  ;;  %v1906_v52 = vld [vmem:[#allocation2 + $0x4e] sm:$0xff] }
 0x16c   : > { %v1223_v54 = vadd.f32 %v1171_v53, %v964_v51  ;;  %4694 = vmatprep.mubr.msk.f32.mxu1 %vm5254_vm2, %v5251_v0  ;;  %v2224_v53 = vld [vmem:[#allocation2 + $0x27] sm:$0xff] }
 0x16d   : > { %4750 = vmatmul.mubr.msk.f32.gmra.mxu0 %vm245_vm0, %v1586_v55  ;;  %v4611_v56 = vpop.f32.mrf.mxu1  ;;  %v1907_v55 = vld [vmem:[#allocation2 + $0x56] sm:$0xff] }
 0x16e   : > { %1244 = vst.msk [vmem:[#allocation3 + $0x68] sm:$0xff] %vm272_vm1, %v1223_v54  ;;  %4752 = vmatprep.mubr.msk.f32.mxu0 %vm5254_vm2, %v5251_v0  ;;  %v967_v54 = vld [vmem:[#allocation3 + $0x80] sm:$0xff] }
 0x16f   : > { %4695 = vmatmul.mubr.msk.f32.gmra.mxu1 %vm245_vm0, %v1269_v57 }
 0x170   : > { %4697 = vmatprep.mubr.msk.f32.mxu1 %vm5254_vm2, %v5251_v0 }
 0x171   : > { %4753 = vmatmul.mubr.msk.f32.gmra.mxu0 %vm245_vm0, %v1587_v58  ;;  %v2225_v58 = vld [vmem:[#allocation2 + $0x2f] sm:$0xff] }
 0x172   : > { %4755 = vmatprep.mubr.msk.f32.mxu0 %vm5254_vm2, %v5251_v0 }
 0x173   : > { %4698 = vmatmul.mubr.msk.f32.gmra.mxu1 %vm245_vm0, %v1270_v60  ;;  %v1908_v60 = vld [vmem:[#allocation2 + $0x5e] sm:$0xff] }
 0x174   : > { %v1111_v61 = vpop.f32.mrf.mxu0  ;;  %4700 = vmatprep.mubr.msk.f32.mxu1 %vm5254_vm2, %v5251_v0 }
 0x175   : > { %v1211_v63 = vadd.f32 %v1111_v61, %v952_v59  ;;  %4756 = vmatmul.mubr.msk.f32.gmra.mxu0 %vm245_vm0, %v1588_v1  ;;  %v2226_v61 = vld [vmem:[#allocation2 + $0x37] sm:$0xff]  ;;  %v1909_v1 = vld [vmem:[#allocation2 + $0x66] sm:$0xff] }
 0x176   : > { %v4575_v2 = vpop.f32.mrf.mxu0  ;;  %4758 = vmatprep.mubr.msk.f32.mxu0 %vm5254_vm2, %v5251_v0 }
 0x177   : > { %1232 = vst.msk [vmem:[#allocation3 + $0x8] sm:$0xff] %vm272_vm1, %v1211_v63  ;;  %4701 = vmatmul.mubr.msk.f32.gmra.mxu1 %vm245_vm0, %v1271_v3  ;;  %v955_v63 = vld [vmem:[#allocation3 + $0x20] sm:$0xff] }
 0x178   : > { %4703 = vmatprep.mubr.msk.f32.mxu1 %vm5254_vm2, %v5251_v0 }
 0x179   : > { %4759 = vmatmul.mubr.msk.f32.gmra.mxu0 %vm245_vm0, %v1589_v4  ;;  %v2227_v4 = vld [vmem:[#allocation2 + $0x3f] sm:$0xff] }
 0x17a   : > { %4761 = vmatprep.mubr.msk.f32.mxu0 %vm5254_vm2, %v5251_v0 }
 0x17b   : > { %v1176_v7 = vpop.f32.mrf.mxu1  ;;  %4704 = vmatmul.mubr.msk.f32.gmra.mxu1 %vm245_vm0, %v1272_v6  ;;  %v1910_v6 = vld [vmem:[#allocation2 + $0x6e] sm:$0xff] }
 0x17c   : > { %v1224_v9 = vadd.f32 %v1176_v7, %v965_v5  ;;  %4789 = vmatprep.mubr.msk.f32.mxu1 %vm5254_vm2, %v5251_v0  ;;  %v2228_v7 = vld [vmem:[#allocation2 + $0x47] sm:$0xff] }
 0x17d   : > { %4762 = vmatmul.mubr.msk.f32.gmra.mxu0 %vm245_vm0, %v1590_v10  ;;  %v4614_v11 = vpop.f32.mrf.mxu1  ;;  %v1911_v10 = vld [vmem:[#allocation2 + $0x76] sm:$0xff] }
 0x17e   : > { %1245 = vst.msk [vmem:[#allocation3 + $0x70] sm:$0xff] %vm272_vm1, %v1224_v9  ;;  %4764 = vmatprep.mubr.msk.f32.mxu0 %vm5254_vm2, %v5251_v0  ;;  %v968_v9 = vld [vmem:[#allocation3 + $0x88] sm:$0xff] }
 0x17f   : > { %4790 = vmatmul.mubr.msk.f32.vlgmr.msra.gmra.mxu1 %vm245_vm0, %v1898_v14  ;;  %v2229_v14 = vld [vmem:[#allocation2 + $0x4f] sm:$0xff] }
 0x180   : > { %4792 = vmatprep.mubr.msk.f32.mxu1 %vm5254_vm2, %v5251_v0  ;;  %4926 = vmatpush3.msra.mxu1 %v4222_v13 }
 0x181   : > { %4765 = vmatmul.mubr.msk.f32.gmra.mxu0 %vm245_vm0, %v1591_v16  ;;  %4927 = vmatprep.subr.mxu1 %v5251_v0  ;;  %v1912_v16 = vld [vmem:[#allocation2 + $0x7e] sm:$0xff] }
 0x182   : > { %4767 = vmatprep.mubr.msk.f32.mxu0 %vm5254_vm2, %v5251_v0  ;;  %4928 = vmatpush3.msra.mxu1 %v4221_v15 }
 0x183   : > { %v1116_v20 = vpop.f32.mrf.mxu0  ;;  %4793 = vmatmul.mubr.msk.f32.gmra.mxu1 %vm245_vm0, %v1899_v19  ;;  %4929 = vmatprep.subr.mxu1 %v5251_v0  ;;  %v1913_v19 = vld [vmem:[#allocation2 + $0x86] sm:$0xff] }
 0x184   : > { %v1212_v22 = vadd.f32 %v1116_v20, %v953_v17  ;;  %4795 = vmatprep.mubr.msk.f32.mxu1 %vm5254_vm2, %v5251_v0  ;;  %4930 = vmatpush3.msra.mxu1 %v4220_v18  ;;  %v2230_v17 = vld [vmem:[#allocation2 + $0x57] sm:$0xff] }
 0x185   : > { %4768 = vmatmul.mubr.msk.f32.gmra.mxu0 %vm245_vm0, %v1592_v23  ;;  %v4578_v24 = vpop.f32.mrf.mxu0  ;;  %4931 = vmatprep.subr.mxu1 %v5251_v0  ;;  %v956_v18 = vld [vmem:[#allocation3 + $0x28] sm:$0xff] }
 0x186   : > { %1233 = vst.msk [vmem:[#allocation3 + $0x10] sm:$0xff] %vm272_vm1, %v1212_v22  ;;  %4770 = vmatprep.mubr.msk.f32.mxu0 %vm5254_vm2, %v5251_v0  ;;  %4932 = vmatpush3.msra.mxu1 %v4219_v21  ;;  %v2231_v22 = vld [vmem:[#allocation2 + $0x5f] sm:$0xff]  ;;  %v1914_v24 = vld [vmem:[#allocation2 + $0x8e] sm:$0xff] }
 0x187   : > { %4796 = vmatmul.mubr.msk.f32.gmra.mxu1 %vm245_vm0, %v1900_v26  ;;  %4933 = vmatprep.subr.mxu1 %v5251_v0  ;;  %v969_v26 = vld [vmem:[#allocation3 + $0x90] sm:$0xff] }
 0x188   : > { %4798 = vmatprep.mubr.msk.f32.mxu1 %vm5254_vm2, %v5251_v0  ;;  %4934 = vmatpush3.msra.mxu1 %v4218_v25  ;;  %v2232_v25 = vld [vmem:[#allocation2 + $0x67] sm:$0xff] }
 0x189   : > { %4771 = vmatmul.mubr.msk.f32.gmra.mxu0 %vm245_vm0, %v1593_v27  ;;  %5071 = vmatprep.subr.mxu1 %v5251_v0  ;;  %v1915_v27 = vld [vmem:[#allocation2 + $0x96] sm:$0xff] }
 0x18a   : > { %4773 = vmatprep.mubr.msk.f32.mxu0 %vm5254_vm2, %v5251_v0 }
 0x18b   : > { %4799 = vmatmul.mubr.msk.f32.gmra.mxu1 %vm245_vm0, %v1901_v28 }
 0x18c   : > { %4801 = vmatprep.mubr.msk.f32.mxu1 %vm5254_vm2, %v5251_v0 }
 0x18d   : > { %4774 = vmatmul.mubr.msk.f32.gmra.mxu0 %vm245_vm0, %v1594_v29 }
 0x18e   : > { %4776 = vmatprep.mubr.msk.f32.mxu0 %vm5254_vm2, %v5251_v0 }
 0x18f   : > { %4802 = vmatmul.mubr.msk.f32.gmra.mxu1 %vm245_vm0, %v1902_v30  ;;  %v2233_v30 = vld [vmem:[#allocation2 + $0x6f] sm:$0xff] }
 0x190   : > { %4804 = vmatprep.mubr.msk.f32.mxu1 %vm5254_vm2, %v5251_v0 }
 0x191   : > { %4777 = vmatmul.mubr.msk.f32.gmra.mxu0 %vm245_vm0, %v1595_v31 }
 0x192   : > { %4862 = vmatprep.mubr.msk.f32.mxu0 %vm5254_vm2, %v5251_v0 }
 0x193   : > { %4805 = vmatmul.mubr.msk.f32.gmra.mxu1 %vm245_vm0, %v1903_v33  ;;  %v2234_v33 = vld [vmem:[#allocation2 + $0x77] sm:$0xff] }
 0x194   : > { %v1181_v34 = vpop.f32.mrf.mxu1  ;;  %4807 = vmatprep.mubr.msk.f32.mxu1 %vm5254_vm2, %v5251_v0 }
 0x195   : > { %v1225_v36 = vadd.f32 %v1181_v34, %v966_v32  ;;  %4863 = vmatmul.mubr.msk.f32.vlgmr.msra.gmra.mxu0 %vm245_vm0, %v2221_v37  ;;  %v1916_v32 = vld [vmem:[#allocation2 + $0x9e] sm:$0xff] }
 0x196   : > { %v4617_v38 = vpop.f32.mrf.mxu1  ;;  %4999 = vmatpush3.msra.mxu0 %v4248_v35  ;;  %4865 = vmatprep.mubr.msk.f32.mxu0 %vm5254_vm2, %v5251_v0  ;;  %v957_v34 = vld [vmem:[#allocation3 + $0x30] sm:$0xff]  ;;  %v1917_v35 = vld [vmem:[#allocation2 + $0xa6] sm:$0xff] }
 0x197   : > { %1246 = vst.msk [vmem:[#allocation3 + $0x78] sm:$0xff] %vm272_vm1, %v1225_v36  ;;  %4808 = vmatmul.mubr.msk.f32.gmra.mxu1 %vm245_vm0, %v1904_v40  ;;  %5000 = vmatprep.subr.mxu0 %v5251_v0  ;;  %v2235_v38 = vld [vmem:[#allocation2 + $0x7f] sm:$0xff]  ;;  %v1918_v40 = vld [vmem:[#allocation2 + $0xae] sm:$0xff] }
 0x198   : > { %4810 = vmatprep.mubr.msk.f32.mxu1 %vm5254_vm2, %v5251_v0  ;;  %5001 = vmatpush3.msra.mxu0 %v4247_v39 }
 0x199   : > { %4866 = vmatmul.mubr.msk.f32.gmra.mxu0 %vm245_vm0, %v2222_v42  ;;  %5002 = vmatprep.subr.mxu0 %v5251_v0  ;;  %v970_v42 = vld [vmem:[#allocation3 + $0x98] sm:$0xff] }
 0x19a   : > { %4868 = vmatprep.mubr.msk.f32.mxu0 %vm5254_vm2, %v5251_v0  ;;  %5003 = vmatpush3.msra.mxu0 %v4246_v41  ;;  %v2236_v41 = vld [vmem:[#allocation2 + $0x87] sm:$0xff] }
 0x19b   : > { %4811 = vmatmul.mubr.msk.f32.gmra.mxu1 %vm245_vm0, %v1905_v46  ;;  %5004 = vmatprep.subr.mxu0 %v5251_v0 }
 0x19c   : > { %v1121_v47 = vpop.f32.mrf.mxu0  ;;  %4813 = vmatprep.mubr.msk.f32.mxu1 %vm5254_vm2, %v5251_v0  ;;  %5005 = vmatpush3.msra.mxu0 %v4245_v44  ;;  %v2544_v44 = vld [vmem:[#allocation2 + $0x10] sm:$0xff] }
 0x19d   : > { %v1213_v49 = vadd.f32 %v1121_v47, %v954_v43  ;;  %4869 = vmatmul.mubr.msk.f32.gmra.mxu0 %vm245_vm0, %v2223_v50  ;;  %5006 = vmatprep.subr.mxu0 %v5251_v0  ;;  %v4274_v43 = vld [vmem:[%s6823_s2 + $0x138] sm:$0xff]  ;;  %v4273_v47 = vld [vmem:[%s6823_s2 + $0x130] sm:$0xff] }
 0x19e   : > { %v4581_v51 = vpop.f32.mrf.mxu0  ;;  %4871 = vmatprep.mubr.msk.f32.mxu0 %vm5254_vm2, %v5251_v0  ;;  %5007 = vmatpush3.msra.mxu0 %v4244_v48 }
 0x19f   : > { %1234 = vst.msk [vmem:[#allocation3 + $0x18] sm:$0xff] %vm272_vm1, %v1213_v49  ;;  %4814 = vmatmul.mubr.msk.f32.gmra.mxu1 %vm245_vm0, %v1906_v52  ;;  %5144 = vmatprep.subr.mxu0 %v5251_v0  ;;  %v2237_v49 = vld [vmem:[#allocation2 + $0x8f] sm:$0xff]  ;;  %v2545_v52 = vld [vmem:[#allocation2 + $0x18] sm:$0xff] }
 0x1a0   : > { %4816 = vmatprep.mubr.msk.f32.mxu1 %vm5254_vm2, %v5251_v0  ;;  %v4272_v51 = vld [vmem:[%s6823_s2 + $0x128] sm:$0xff] }
 0x1a1   : > { %4872 = vmatmul.mubr.msk.f32.gmra.mxu0 %vm245_vm0, %v2224_v53  ;;  %v4271_v53 = vld [vmem:[%s6823_s2 + $0x120] sm:$0xff] }
 0x1a2   : > { %4874 = vmatprep.mubr.msk.f32.mxu0 %vm5254_vm2, %v5251_v0 }
 0x1a3   : > { %v1186_v56 = vpop.f32.mrf.mxu1  ;;  %4817 = vmatmul.mubr.msk.f32.gmra.mxu1 %vm245_vm0, %v1907_v55  ;;  %v4270_v55 = vld [vmem:[%s6823_s2 + $0x118] sm:$0xff] }
 0x1a4   : > { %v1226_v57 = vadd.f32 %v1186_v56, %v967_v54  ;;  %4819 = vmatprep.mubr.msk.f32.mxu1 %vm5254_vm2, %v5251_v0  ;;  %v2238_v54 = vld [vmem:[#allocation2 + $0x97] sm:$0xff]  ;;  %v958_v56 = vld [vmem:[#allocation3 + $0x38] sm:$0xff] }
 0x1a5   : > { %4875 = vmatmul.mubr.msk.f32.gmra.mxu0 %vm245_vm0, %v2225_v58  ;;  %v4620_v59 = vpop.f32.mrf.mxu1 }
 0x1a6   : > { %1247 = vst.msk [vmem:[#allocation3 + $0x80] sm:$0xff] %vm272_vm1, %v1226_v57  ;;  %4877 = vmatprep.mubr.msk.f32.mxu0 %vm5254_vm2, %v5251_v0  ;;  %v2546_v57 = vld [vmem:[#allocation2 + $0x20] sm:$0xff] }
 0x1a7   : > { %4820 = vmatmul.mubr.msk.f32.gmra.mxu1 %vm245_vm0, %v1908_v60  ;;  %v2239_v59 = vld [vmem:[#allocation2 + $0x9f] sm:$0xff] }
 0x1a8   : > { %4822 = vmatprep.mubr.msk.f32.mxu1 %vm5254_vm2, %v5251_v0 }
 0x1a9   : > { %4878 = vmatmul.mubr.msk.f32.gmra.mxu0 %vm245_vm0, %v2226_v61 }
 0x1aa   : > { %4880 = vmatprep.mubr.msk.f32.mxu0 %vm5254_vm2, %v5251_v0 }
 0x1ab   : > { %4823 = vmatmul.mubr.msk.f32.gmra.mxu1 %vm245_vm0, %v1909_v1  ;;  %v2240_v1 = vld [vmem:[#allocation2 + $0xa7] sm:$0xff] }
 0x1ac   : > { %v1126_v2 = vpop.f32.mrf.mxu0  ;;  %4825 = vmatprep.mubr.msk.f32.mxu1 %vm5254_vm2, %v5251_v0 }
 0x1ad   : > { %v1214_v3 = vadd.f32 %v1126_v2, %v955_v63  ;;  %4881 = vmatmul.mubr.msk.f32.gmra.mxu0 %vm245_vm0, %v2227_v4  ;;  %v2547_v63 = vld [vmem:[#allocation2 + $0x28] sm:$0xff]  ;;  %v2548_v2 = vld [vmem:[#allocation2 + $0x30] sm:$0xff] }
 0x1ae   : > { %v4584_v5 = vpop.f32.mrf.mxu0  ;;  %4883 = vmatprep.mubr.msk.f32.mxu0 %vm5254_vm2, %v5251_v0  ;;  %v971_v4 = vld [vmem:[#allocation3 + $0xa0] sm:$0xff] }
 0x1af   : > { %1235 = vst.msk [vmem:[#allocation3 + $0x20] sm:$0xff] %vm272_vm1, %v1214_v3  ;;  %4826 = vmatmul.mubr.msk.f32.gmra.mxu1 %vm245_vm0, %v1910_v6  ;;  %v2241_v3 = vld [vmem:[#allocation2 + $0xaf] sm:$0xff]  ;;  %v4300_v6 = vld [vmem:[%s6823_s2 + $0x160] sm:$0xff] }
 0x1b0   : > { %4828 = vmatprep.mubr.msk.f32.mxu1 %vm5254_vm2, %v5251_v0 }
 0x1b1   : > { %4884 = vmatmul.mubr.msk.f32.gmra.mxu0 %vm245_vm0, %v2228_v7 }
 0x1b2   : > { %4886 = vmatprep.mubr.msk.f32.mxu0 %vm5254_vm2, %v5251_v0 }
 0x1b3   : > { %v1191_v11 = vpop.f32.mrf.mxu1  ;;  %4829 = vmatmul.mubr.msk.f32.gmra.mxu1 %vm245_vm0, %v1911_v10 }
 0x1b4   : > { %v1227_v13 = vadd.f32 %v1191_v11, %v968_v9  ;;  %4831 = vmatprep.mubr.msk.f32.mxu1 %vm5254_vm2, %v5251_v0  ;;  %v2867_v9 = vld [vmem:[#allocation2 + $0x1c] sm:$0xff] }
 0x1b5   : > { %4887 = vmatmul.mubr.msk.f32.gmra.mxu0 %vm245_vm0, %v2229_v14  ;;  %v4623_v15 = vpop.f32.mrf.mxu1  ;;  %v4299_v11 = vld [vmem:[%s6823_s2 + $0x158] sm:$0xff]  ;;  %v4298_v14 = vld [vmem:[%s6823_s2 + $0x150] sm:$0xff] }
 0x1b6   : > { %1248 = vst.msk [vmem:[#allocation3 + $0x88] sm:$0xff] %vm272_vm1, %v1227_v13  ;;  %4889 = vmatprep.mubr.msk.f32.mxu0 %vm5254_vm2, %v5251_v0 }
 0x1b7   : > { %4832 = vmatmul.mubr.msk.f32.gmra.mxu1 %vm245_vm0, %v1912_v16  ;;  %v2868_v16 = vld [vmem:[#allocation2 + $0x24] sm:$0xff] }
 0x1b8   : > { %4834 = vmatprep.mubr.msk.f32.mxu1 %vm5254_vm2, %v5251_v0 }
 0x1b9   : > { %4890 = vmatmul.mubr.msk.f32.gmra.mxu0 %vm245_vm0, %v2230_v17 }
 0x1ba   : > { %4892 = vmatprep.mubr.msk.f32.mxu0 %vm5254_vm2, %v5251_v0 }
 0x1bb   : > { %4835 = vmatmul.mubr.msk.f32.gmra.mxu1 %vm245_vm0, %v1913_v19  ;;  %v1274_v19 = vld [vmem:[#allocation3 + $0x8] sm:$0xff] }
 0x1bc   : > { %v1131_v20 = vpop.f32.mrf.mxu0  ;;  %4837 = vmatprep.mubr.msk.f32.mxu1 %vm5254_vm2, %v5251_v0 }
 0x1bd   : > { %v1215_v21 = vadd.f32 %v1131_v20, %v956_v18  ;;  %4893 = vmatmul.mubr.msk.f32.gmra.mxu0 %vm245_vm0, %v2231_v22  ;;  %v959_v18 = vld [vmem:[#allocation3 + $0x40] sm:$0xff] }
 0x1be   : > { %v4587_v23 = vpop.f32.mrf.mxu0  ;;  %4895 = vmatprep.mubr.msk.f32.mxu0 %vm5254_vm2, %v5251_v0 }
 0x1bf   : > { %1236 = vst.msk [vmem:[#allocation3 + $0x28] sm:$0xff] %vm272_vm1, %v1215_v21  ;;  %4838 = vmatmul.mubr.msk.f32.gmra.mxu1 %vm245_vm0, %v1914_v24  ;;  %v4296_v21 = vld [vmem:[%s6823_s2 + $0x140] sm:$0xff]  ;;  %v2869_v24 = vld [vmem:[#allocation2 + $0x2c] sm:$0xff] }
 0x1c0   : > { %4840 = vmatprep.mubr.msk.f32.mxu1 %vm5254_vm2, %v5251_v0 }
 0x1c1   : > { %4896 = vmatmul.mubr.msk.f32.gmra.mxu0 %vm245_vm0, %v2232_v25 }
 0x1c2   : > { %4898 = vmatprep.mubr.msk.f32.mxu0 %vm5254_vm2, %v5251_v0 }
 0x1c3   : > { %v1196_v28 = vpop.f32.mrf.mxu1  ;;  %4841 = vmatmul.mubr.msk.f32.gmra.mxu1 %vm245_vm0, %v1915_v27  ;;  %v1275_v27 = vld [vmem:[#allocation3 + $0x10] sm:$0xff] }
 0x1c4   : > { %v1228_v29 = vadd.f32 %v1196_v28, %v969_v26  ;;  %4843 = vmatprep.mubr.msk.f32.mxu1 %vm5254_vm2, %v5251_v0 }
 0x1c5   : > { %4899 = vmatmul.mubr.msk.f32.gmra.mxu0 %vm245_vm0, %v2233_v30  ;;  %v4626_v31 = vpop.f32.mrf.mxu1  ;;  %v2870_v30 = vld [vmem:[#allocation2 + $0x34] sm:$0xff] }
 0x1c6   : > { %1249 = vst.msk [vmem:[#allocation3 + $0x90] sm:$0xff] %vm272_vm1, %v1228_v29  ;;  %4901 = vmatprep.mubr.msk.f32.mxu0 %vm5254_vm2, %v5251_v0 }
 0x1c7   : > { %4844 = vmatmul.mubr.msk.f32.gmra.mxu1 %vm245_vm0, %v1916_v32  ;;  %v2553_v32 = vld [vmem:[#allocation2 + $0x58] sm:$0xff] }
 0x1c8   : > { %4846 = vmatprep.mubr.msk.f32.mxu1 %vm5254_vm2, %v5251_v0 }
 0x1c9   : > { %4902 = vmatmul.mubr.msk.f32.gmra.mxu0 %vm245_vm0, %v2234_v33  ;;  %v1276_v33 = vld [vmem:[#allocation3 + $0x18] sm:$0xff] }
 0x1ca   : > { %4904 = vmatprep.mubr.msk.f32.mxu0 %vm5254_vm2, %v5251_v0 }
 0x1cb   : > { %4847 = vmatmul.mubr.msk.f32.gmra.mxu1 %vm245_vm0, %v1917_v35  ;;  %v960_v35 = vld [vmem:[#allocation3 + $0x48] sm:$0xff] }
 0x1cc   : > { %v1136_v36 = vpop.f32.mrf.mxu0  ;;  %4849 = vmatprep.mubr.msk.f32.mxu1 %vm5254_vm2, %v5251_v0 }
 0x1cd   : > { %v1216_v37 = vadd.f32 %v1136_v36, %v957_v34  ;;  %4905 = vmatmul.mubr.msk.f32.gmra.mxu0 %vm245_vm0, %v2235_v38  ;;  %v2871_v36 = vld [vmem:[#allocation2 + $0x3c] sm:$0xff] }
 0x1ce   : > { %v4590_v39 = vpop.f32.mrf.mxu0  ;;  %4907 = vmatprep.mubr.msk.f32.mxu0 %vm5254_vm2, %v5251_v0 }
 0x1cf   : > { %1237 = vst.msk [vmem:[#allocation3 + $0x30] sm:$0xff] %vm272_vm1, %v1216_v37  ;;  %4850 = vmatmul.mubr.msk.f32.gmra.mxu1 %vm245_vm0, %v1918_v40  ;;  %v2554_v40 = vld [vmem:[#allocation2 + $0x60] sm:$0xff] }
 0x1d0   : > { %4935 = vmatprep.mubr.msk.f32.mxu1 %vm5254_vm2, %v5251_v0 }
 0x1d1   : > { %4908 = vmatmul.mubr.msk.f32.gmra.mxu0 %vm245_vm0, %v2236_v41 }
 0x1d2   : > { %4910 = vmatprep.mubr.msk.f32.mxu0 %vm5254_vm2, %v5251_v0 }
 0x1d3   : > { %v1201_v46 = vpop.f32.mrf.mxu1  ;;  %4936 = vmatmul.mubr.msk.f32.vlgmr.msra.gmra.mxu1 %vm245_vm0, %v2544_v44  ;;  %v961_v44 = vld [vmem:[#allocation3 + $0x50] sm:$0xff] }
 0x1d4   : > { %v1229_v48 = vadd.f32 %v1201_v46, %v970_v42  ;;  %4938 = vmatprep.mubr.msk.f32.mxu1 %vm5254_vm2, %v5251_v0  ;;  %5072 = vmatpush3.msra.mxu1 %v4274_v43  ;;  %v1277_v42 = vld [vmem:[#allocation3 + $0x20] sm:$0xff] }
 0x1d5   : > { %4911 = vmatmul.mubr.msk.f32.gmra.mxu0 %vm245_vm0, %v2237_v49  ;;  %v4629_v50 = vpop.f32.mrf.mxu1  ;;  %5073 = vmatprep.subr.mxu1 %v5251_v0 }
 0x1d6   : > { %1250 = vst.msk [vmem:[#allocation3 + $0x98] sm:$0xff] %vm272_vm1, %v1229_v48  ;;  %4913 = vmatprep.mubr.msk.f32.mxu0 %vm5254_vm2, %v5251_v0  ;;  %5074 = vmatpush3.msra.mxu1 %v4273_v47  ;;  %v2872_v47 = vld [vmem:[#allocation2 + $0x44] sm:$0xff] }
 0x1d7   : > { %4939 = vmatmul.mubr.msk.f32.gmra.mxu1 %vm245_vm0, %v2545_v52  ;;  %5075 = vmatprep.subr.mxu1 %v5251_v0 }
 0x1d8   : > { %4941 = vmatprep.mubr.msk.f32.mxu1 %vm5254_vm2, %v5251_v0  ;;  %5076 = vmatpush3.msra.mxu1 %v4272_v51  ;;  %v2555_v51 = vld [vmem:[#allocation2 + $0x68] sm:$0xff] }
 0x1d9   : > { %4914 = vmatmul.mubr.msk.f32.gmra.mxu0 %vm245_vm0, %v2238_v54  ;;  %5077 = vmatprep.subr.mxu1 %v5251_v0 }
 0x1da   : > { %4916 = vmatprep.mubr.msk.f32.mxu0 %vm5254_vm2, %v5251_v0  ;;  %5078 = vmatpush3.msra.mxu1 %v4271_v53  ;;  %v1278_v53 = vld [vmem:[#allocation3 + $0x28] sm:$0xff] }
 0x1db   : > { %4942 = vmatmul.mubr.msk.f32.gmra.mxu1 %vm245_vm0, %v2546_v57  ;;  %5079 = vmatprep.subr.mxu1 %v5251_v0 }
 0x1dc   : > { %v1141_v58 = vpop.f32.mrf.mxu0  ;;  %4944 = vmatprep.mubr.msk.f32.mxu1 %vm5254_vm2, %v5251_v0  ;;  %5080 = vmatpush3.msra.mxu1 %v4270_v55 }
 0x1dd   : > { %v1217_v60 = vadd.f32 %v1141_v58, %v958_v56  ;;  %4917 = vmatmul.mubr.msk.f32.gmra.mxu0 %vm245_vm0, %v2239_v59  ;;  %v2873_v56 = vld [vmem:[#allocation2 + $0x4c] sm:$0xff] }
 0x1de   : > { %v4593_v61 = vpop.f32.mrf.mxu0  ;;  %4919 = vmatprep.mubr.msk.f32.mxu0 %vm5254_vm2, %v5251_v0 }
 0x1df   : > { %1238 = vst.msk [vmem:[#allocation3 + $0x38] sm:$0xff] %vm272_vm1, %v1217_v60  ;;  %4945 = vmatmul.mubr.msk.f32.gmra.mxu1 %vm245_vm0, %v2547_v63  ;;  %v2556_v61 = vld [vmem:[#allocation2 + $0x70] sm:$0xff] }
 0x1e0   : > { %4947 = vmatprep.mubr.msk.f32.mxu1 %vm5254_vm2, %v5251_v0 }
 0x1e1   : > { %4920 = vmatmul.mubr.msk.f32.gmra.mxu0 %vm245_vm0, %v2240_v1  ;;  %v1279_v1 = vld [vmem:[#allocation3 + $0x30] sm:$0xff] }
 0x1e2   : > { %4922 = vmatprep.mubr.msk.f32.mxu0 %vm5254_vm2, %v5251_v0 }
 0x1e3   : > { %4948 = vmatmul.mubr.msk.f32.gmra.mxu1 %vm245_vm0, %v2548_v2 }
 0x1e4   : > { %4950 = vmatprep.mubr.msk.f32.mxu1 %vm5254_vm2, %v5251_v0 }
 0x1e5   : > { %4923 = vmatmul.mubr.msk.f32.gmra.mxu0 %vm245_vm0, %v2241_v3 }
 0x1e6   : > { %5008 = vmatprep.mubr.msk.f32.mxu0 %vm5254_vm2, %v5251_v0 }
 0x1e7   : > { %v1206_v5 = vpop.f32.mrf.mxu1  ;;  %4951 = vmatmul.mubr.msk.f32.gmra.mxu1 %vm245_vm0, %v5848_v45  ;;  %v1273_v45 = vld [vmem:[#allocation3] sm:$0xff] }
 0x1e8   : > { %v1230_v7 = vadd.f32 %v1206_v5, %v971_v4  ;;  %4953 = vmatprep.mubr.msk.f32.mxu1 %vm5254_vm2, %v5251_v0  ;;  %v2874_v4 = vld [vmem:[#allocation2 + $0x54] sm:$0xff] }
 0x1e9   : > { %5009 = vmatmul.mubr.msk.f32.vlgmr.msra.gmra.mxu0 %vm245_vm0, %v2867_v9  ;;  %v4632_v10 = vpop.f32.mrf.mxu1 }
 0x1ea   : > { %1251 = vst.msk [vmem:[#allocation3 + $0xa0] sm:$0xff] %vm272_vm1, %v1230_v7  ;;  %5145 = vmatpush3.msra.mxu0 %v4300_v6  ;;  %5011 = vmatprep.mubr.msk.f32.mxu0 %vm5254_vm2, %v5251_v0  ;;  %v2557_v10 = vld [vmem:[#allocation2 + $0x78] sm:$0xff] }
 0x1eb   : > { %v1429_v13 = vpop.f32.mrf.mxu1  ;;  %4954 = vmatmul.mubr.msk.f32.gmra.mxu1 %vm245_vm0, %v5879_v62  ;;  %5146 = vmatprep.subr.mxu0 %v5251_v0  ;;  %v4297_v62 = vld [vmem:[%s6823_s2 + $0x148] sm:$0xff] }
 0x1ec   : > { %v1533_v15 = vadd.f32 %v1429_v13, %v1273_v45  ;;  %4956 = vmatprep.mubr.msk.f32.mxu1 %vm5254_vm2, %v5251_v0  ;;  %5147 = vmatpush3.msra.mxu0 %v4299_v11  ;;  %v1280_v45 = vld [vmem:[#allocation3 + $0x38] sm:$0xff] }
 0x1ed   : > { %5012 = vmatmul.mubr.msk.f32.gmra.mxu0 %vm245_vm0, %v2868_v16  ;;  %v4645_v17 = vpop.f32.mrf.mxu1  ;;  %5148 = vmatprep.subr.mxu0 %v5251_v0 }
 0x1ee   : > { %1554 = vst.msk [vmem:[#allocation3] sm:$0xff] %vm272_vm1, %v1533_v15  ;;  %5014 = vmatprep.mubr.msk.f32.mxu0 %vm5254_vm2, %v5251_v0  ;;  %5149 = vmatpush3.msra.mxu0 %v4298_v14  ;;  %v2875_v15 = vld [vmem:[#allocation2 + $0x5c] sm:$0xff] }
 0x1ef   : > { %v1434_v20 = vpop.f32.mrf.mxu1  ;;  %4957 = vmatmul.mubr.msk.f32.gmra.mxu1 %vm245_vm0, %v5907_v8  ;;  %5150 = vmatprep.subr.mxu0 %v5251_v0 }
 0x1f0   : > { %v1146_v22 = vpop.f32.mrf.mxu0  ;;  %v1534_v23 = vadd.f32 %v1434_v20, %v1274_v19  ;;  %4959 = vmatprep.mubr.msk.f32.mxu1 %vm5254_vm2, %v5251_v0  ;;  %5151 = vmatpush3.msra.mxu0 %v4297_v62  ;;  %v2558_v19 = vld [vmem:[#allocation2 + $0x80] sm:$0xff] }
 0x1f1   : > { %v1218_v25 = vadd.f32 %v1146_v22, %v959_v18  ;;  %5015 = vmatmul.mubr.msk.f32.gmra.mxu0 %vm245_vm0, %v2869_v24  ;;  %v4648_v26 = vpop.f32.mrf.mxu1  ;;  %5152 = vmatprep.subr.mxu0 %v5251_v0  ;;  %v2876_v24 = vld [vmem:[#allocation2 + $0x64] sm:$0xff] }
 0x1f2   : > { %1555 = vst.msk [vmem:[#allocation3 + $0x8] sm:$0xff] %vm272_vm1, %v1534_v23  ;;  %v4596_v8 = vpop.f32.mrf.mxu0  ;;  %5017 = vmatprep.mubr.msk.f32.mxu0 %vm5254_vm2, %v5251_v0  ;;  %5153 = vmatpush3.msra.mxu0 %v4296_v21 }
 0x1f3   : > { %1239 = vst.msk [vmem:[#allocation3 + $0x40] sm:$0xff] %vm272_vm1, %v1218_v25  ;;  %v1439_v28 = vpop.f32.mrf.mxu1  ;;  %4960 = vmatmul.mubr.msk.f32.gmra.mxu1 %vm245_vm0, %v5917_v12 }
 0x1f4   : > { %v1535_v29 = vadd.f32 %v1439_v28, %v1275_v27  ;;  %4962 = vmatprep.mubr.msk.f32.mxu1 %vm5254_vm2, %v5251_v0  ;;  %v2559_v28 = vld [vmem:[#allocation2 + $0x88] sm:$0xff] }
 0x1f5   : > { %5018 = vmatmul.mubr.msk.f32.gmra.mxu0 %vm245_vm0, %v2870_v30  ;;  %v4651_v31 = vpop.f32.mrf.mxu1  ;;  %v1596_v57 = vld [vmem:[#allocation3] sm:$0xff] }
 0x1f6   : > { %1556 = vst.msk [vmem:[#allocation3 + $0x10] sm:$0xff] %vm272_vm1, %v1535_v29  ;;  %5020 = vmatprep.mubr.msk.f32.mxu0 %vm5254_vm2, %v5251_v0 }
 0x1f7   : > { %v1444_v34 = vpop.f32.mrf.mxu1  ;;  %4963 = vmatmul.mubr.msk.f32.gmra.mxu1 %vm245_vm0, %v2553_v32 }
 0x1f8   : > { %v1536_v12 = vadd.f32 %v1444_v34, %v1276_v33  ;;  %4965 = vmatprep.mubr.msk.f32.mxu1 %vm5254_vm2, %v5251_v0  ;;  %v2877_v33 = vld [vmem:[#allocation2 + $0x6c] sm:$0xff] }
 0x1f9   : > { %v1151_v37 = vpop.f32.mrf.mxu0  ;;  %5021 = vmatmul.mubr.msk.f32.gmra.mxu0 %vm245_vm0, %v2871_v36  ;;  %v4654_v38 = vpop.f32.mrf.mxu1  ;;  %v1597_v5 = vld [vmem:[#allocation3 + $0x8] sm:$0xff] }
 0x1fa   : > { %1557 = vst.msk [vmem:[#allocation3 + $0x18] sm:$0xff] %vm272_vm1, %v1536_v12  ;;  %v1219_v39 = vadd.f32 %v1151_v37, %v960_v35  ;;  %5023 = vmatprep.mubr.msk.f32.mxu0 %vm5254_vm2, %v5251_v0  ;;  %v1281_v21 = vld [vmem:[#allocation3 + $0x40] sm:$0xff]  ;;  %v2560_v37 = vld [vmem:[#allocation2 + $0x90] sm:$0xff] }
 0x1fb   : > { %v4599_v41 = vpop.f32.mrf.mxu0  ;;  %v1449_v43 = vpop.f32.mrf.mxu1  ;;  %4966 = vmatmul.mubr.msk.f32.gmra.mxu1 %vm245_vm0, %v2554_v40 }
 0x1fc   : > { %1240 = vst.msk [vmem:[#allocation3 + $0x48] sm:$0xff] %vm272_vm1, %v1219_v39  ;;  %v1537_v46 = vadd.f32 %v1449_v43, %v1277_v42  ;;  %4968 = vmatprep.mubr.msk.f32.mxu1 %vm5254_vm2, %v5251_v0  ;;  %v2878_v42 = vld [vmem:[#allocation2 + $0x74] sm:$0xff] }
 0x1fd   : > { %v1156_v48 = vpop.f32.mrf.mxu0  ;;  %5024 = vmatmul.mubr.msk.f32.gmra.mxu0 %vm245_vm0, %v2872_v47  ;;  %v4657_v49 = vpop.f32.mrf.mxu1  ;;  %v1598_v16 = vld [vmem:[#allocation3 + $0x10] sm:$0xff] }
 0x1fe   : > { %1558 = vst.msk [vmem:[#allocation3 + $0x20] sm:$0xff] %vm272_vm1, %v1537_v46  ;;  %v1220_v50 = vadd.f32 %v1156_v48, %v961_v44  ;;  %5026 = vmatprep.mubr.msk.f32.mxu0 %vm5254_vm2, %v5251_v0  ;;  %v2561_v48 = vld [vmem:[#allocation2 + $0x98] sm:$0xff] }
 0x1ff   : > { %v4602_v52 = vpop.f32.mrf.mxu0  ;;  %v1454_v54 = vpop.f32.mrf.mxu1  ;;  %4969 = vmatmul.mubr.msk.f32.gmra.mxu1 %vm245_vm0, %v2555_v51 }
 0x200   : > { %1241 = vst.msk [vmem:[#allocation3 + $0x50] sm:$0xff] %vm272_vm1, %v1220_v50  ;;  %v1538_v55 = vadd.f32 %v1454_v54, %v1278_v53  ;;  %4971 = vmatprep.mubr.msk.f32.mxu1 %vm5254_vm2, %v5251_v0  ;;  %v1284_v50 = vld [vmem:[#allocation3 + $0x58] sm:$0xff] }
 0x201   : > { %v1752_v58 = vpop.f32.mrf.mxu0  ;;  %5027 = vmatmul.mubr.msk.f32.gmra.mxu0 %vm245_vm0, %v2873_v56  ;;  %v4660_v59 = vpop.f32.mrf.mxu1  ;;  %v1599_v25 = vld [vmem:[#allocation3 + $0x18] sm:$0xff] }
 0x202   : > { %1559 = vst.msk [vmem:[#allocation3 + $0x28] sm:$0xff] %vm272_vm1, %v1538_v55  ;;  %v1856_v60 = vadd.f32 %v1752_v58, %v1596_v57  ;;  %5029 = vmatprep.mubr.msk.f32.mxu0 %vm5254_vm2, %v5251_v0  ;;  %v2879_v53 = vld [vmem:[#allocation2 + $0x7c] sm:$0xff] }
 0x203   : > { %v4718_v63 = vpop.f32.mrf.mxu0  ;;  %v1459_v2 = vpop.f32.mrf.mxu1  ;;  %4972 = vmatmul.mubr.msk.f32.gmra.mxu1 %vm245_vm0, %v2556_v61  ;;  %v1282_v30 = vld [vmem:[#allocation3 + $0x48] sm:$0xff]  ;;  %v2562_v58 = vld [vmem:[#allocation2 + $0xa0] sm:$0xff] }
 0x204   : > { %1877 = vst.msk [vmem:[#allocation3] sm:$0xff] %vm272_vm1, %v1856_v60  ;;  %v1539_v3 = vadd.f32 %v1459_v2, %v1279_v1  ;;  %4974 = vmatprep.mubr.msk.f32.mxu1 %vm5254_vm2, %v5251_v0  ;;  %v1285_v60 = vld [vmem:[#allocation3 + $0x60] sm:$0xff] }
 0x205   : > { %v1757_v6 = vpop.f32.mrf.mxu0  ;;  %5030 = vmatmul.mubr.msk.f32.gmra.mxu0 %vm245_vm0, %v2874_v4  ;;  %v4663_v7 = vpop.f32.mrf.mxu1  ;;  %v1600_v34 = vld [vmem:[#allocation3 + $0x20] sm:$0xff] }
 0x206   : > { %1560 = vst.msk [vmem:[#allocation3 + $0x30] sm:$0xff] %vm272_vm1, %v1539_v3  ;;  %v1857_v9 = vadd.f32 %v1757_v6, %v1597_v5  ;;  %5032 = vmatprep.mubr.msk.f32.mxu0 %vm5254_vm2, %v5251_v0  ;;  %v2880_v1 = vld [vmem:[#allocation2 + $0x84] sm:$0xff] }
 0x207   : > { %v4721_v11 = vpop.f32.mrf.mxu0  ;;  %v1464_v13 = vpop.f32.mrf.mxu1  ;;  %4975 = vmatmul.mubr.msk.f32.gmra.mxu1 %vm245_vm0, %v2557_v10  ;;  %v1283_v39 = vld [vmem:[#allocation3 + $0x50] sm:$0xff]  ;;  %v2563_v6 = vld [vmem:[#allocation2 + $0xa8] sm:$0xff] }
 0x208   : > { %1878 = vst.msk [vmem:[#allocation3 + $0x8] sm:$0xff] %vm272_vm1, %v1857_v9  ;;  %v1540_v14 = vadd.f32 %v1464_v13, %v1280_v45  ;;  %4977 = vmatprep.mubr.msk.f32.mxu1 %vm5254_vm2, %v5251_v0  ;;  %v1286_v9 = vld [vmem:[#allocation3 + $0x68] sm:$0xff] }
 0x209   : > { %v1762_v17 = vpop.f32.mrf.mxu0  ;;  %5033 = vmatmul.mubr.msk.f32.gmra.mxu0 %vm245_vm0, %v2875_v15  ;;  %v4666_v62 = vpop.f32.mrf.mxu1  ;;  %v1601_v43 = vld [vmem:[#allocation3 + $0x28] sm:$0xff] }
 0x20a   : > { %1561 = vst.msk [vmem:[#allocation3 + $0x38] sm:$0xff] %vm272_vm1, %v1540_v14  ;;  %v1858_v18 = vadd.f32 %v1762_v17, %v1598_v16  ;;  %5035 = vmatprep.mubr.msk.f32.mxu0 %vm5254_vm2, %v5251_v0  ;;  %v2881_v45 = vld [vmem:[#allocation2 + $0x8c] sm:$0xff] }
 0x20b   : > { %v4724_v20 = vpop.f32.mrf.mxu0  ;;  %v1469_v22 = vpop.f32.mrf.mxu1  ;;  %4978 = vmatmul.mubr.msk.f32.gmra.mxu1 %vm245_vm0, %v2558_v19  ;;  %v2564_v17 = vld [vmem:[#allocation2 + $0xb0] sm:$0xff] }
 0x20c   : > { %1879 = vst.msk [vmem:[#allocation3 + $0x10] sm:$0xff] %vm272_vm1, %v1858_v18  ;;  %v1541_v23 = vadd.f32 %v1469_v22, %v1281_v21  ;;  %4980 = vmatprep.mubr.msk.f32.mxu1 %vm5254_vm2, %v5251_v0  ;;  %v1287_v18 = vld [vmem:[#allocation3 + $0x70] sm:$0xff] }
 0x20d   : > { %v1767_v26 = vpop.f32.mrf.mxu0  ;;  %5036 = vmatmul.mubr.msk.f32.gmra.mxu0 %vm245_vm0, %v2876_v24  ;;  %v4669_v8 = vpop.f32.mrf.mxu1  ;;  %v1602_v54 = vld [vmem:[#allocation3 + $0x30] sm:$0xff] }
 0x20e   : > { %1562 = vst.msk [vmem:[#allocation3 + $0x40] sm:$0xff] %vm272_vm1, %v1541_v23  ;;  %v1859_v27 = vadd.f32 %v1767_v26, %v1599_v25  ;;  %5038 = vmatprep.mubr.msk.f32.mxu0 %vm5254_vm2, %v5251_v0  ;;  %v2882_v21 = vld [vmem:[#allocation2 + $0x94] sm:$0xff]  ;;  %v3190_v26 = vld [vmem:[#allocation2 + $0x1d] sm:$0xff] }
 0x20f   : > { %v4727_v29 = vpop.f32.mrf.mxu0  ;;  %v1474_v31 = vpop.f32.mrf.mxu1  ;;  %4981 = vmatmul.mubr.msk.f32.gmra.mxu1 %vm245_vm0, %v2559_v28 }
 0x210   : > { %1880 = vst.msk [vmem:[#allocation3 + $0x18] sm:$0xff] %vm272_vm1, %v1859_v27  ;;  %v1542_v32 = vadd.f32 %v1474_v31, %v1282_v30  ;;  %4983 = vmatprep.mubr.msk.f32.mxu1 %vm5254_vm2, %v5251_v0  ;;  %v1288_v27 = vld [vmem:[#allocation3 + $0x78] sm:$0xff] }
 0x211   : > { %v1772_v35 = vpop.f32.mrf.mxu0  ;;  %5039 = vmatmul.mubr.msk.f32.gmra.mxu0 %vm245_vm0, %v2877_v33  ;;  %v4672_v12 = vpop.f32.mrf.mxu1  ;;  %v1603_v2 = vld [vmem:[#allocation3 + $0x38] sm:$0xff] }
 0x212   : > { %1563 = vst.msk [vmem:[#allocation3 + $0x48] sm:$0xff] %vm272_vm1, %v1542_v32  ;;  %v1860_v36 = vadd.f32 %v1772_v35, %v1600_v34  ;;  %5041 = vmatprep.mubr.msk.f32.mxu0 %vm5254_vm2, %v5251_v0  ;;  %v2883_v30 = vld [vmem:[#allocation2 + $0x9c] sm:$0xff]  ;;  %v3191_v35 = vld [vmem:[#allocation2 + $0x25] sm:$0xff] }
 0x213   : > { %v4730_v38 = vpop.f32.mrf.mxu0  ;;  %v1479_v40 = vpop.f32.mrf.mxu1  ;;  %4984 = vmatmul.mubr.msk.f32.gmra.mxu1 %vm245_vm0, %v2560_v37 }
 0x214   : > { %1881 = vst.msk [vmem:[#allocation3 + $0x20] sm:$0xff] %vm272_vm1, %v1860_v36  ;;  %v1543_v41 = vadd.f32 %v1479_v40, %v1283_v39  ;;  %4986 = vmatprep.mubr.msk.f32.mxu1 %vm5254_vm2, %v5251_v0  ;;  %v1289_v36 = vld [vmem:[#allocation3 + $0x80] sm:$0xff] }
 0x215   : > { %v1777_v44 = vpop.f32.mrf.mxu0  ;;  %5042 = vmatmul.mubr.msk.f32.gmra.mxu0 %vm245_vm0, %v2878_v42  ;;  %v4675_v46 = vpop.f32.mrf.mxu1  ;;  %v1604_v13 = vld [vmem:[#allocation3 + $0x40] sm:$0xff] }
 0x216   : > { %1564 = vst.msk [vmem:[#allocation3 + $0x50] sm:$0xff] %vm272_vm1, %v1543_v41  ;;  %v1861_v47 = vadd.f32 %v1777_v44, %v1601_v43  ;;  %5044 = vmatprep.mubr.msk.f32.mxu0 %vm5254_vm2, %v5251_v0  ;;  %v2884_v39 = vld [vmem:[#allocation2 + $0xa4] sm:$0xff]  ;;  %v3192_v44 = vld [vmem:[#allocation2 + $0x2d] sm:$0xff] }
 0x217   : > { %v4733_v49 = vpop.f32.mrf.mxu0  ;;  %v1484_v51 = vpop.f32.mrf.mxu1  ;;  %4987 = vmatmul.mubr.msk.f32.gmra.mxu1 %vm245_vm0, %v2561_v48 }
 0x218   : > { %1882 = vst.msk [vmem:[#allocation3 + $0x28] sm:$0xff] %vm272_vm1, %v1861_v47  ;;  %v1544_v52 = vadd.f32 %v1484_v51, %v1284_v50  ;;  %4989 = vmatprep.mubr.msk.f32.mxu1 %vm5254_vm2, %v5251_v0  ;;  %v1290_v47 = vld [vmem:[#allocation3 + $0x88] sm:$0xff] }
 0x219   : > { %v1782_v55 = vpop.f32.mrf.mxu0  ;;  %5045 = vmatmul.mubr.msk.f32.gmra.mxu0 %vm245_vm0, %v2879_v53  ;;  %v4678_v56 = vpop.f32.mrf.mxu1  ;;  %v1605_v22 = vld [vmem:[#allocation3 + $0x48] sm:$0xff] }
 0x21a   : > { %1565 = vst.msk [vmem:[#allocation3 + $0x58] sm:$0xff] %vm272_vm1, %v1544_v52  ;;  %v1862_v57 = vadd.f32 %v1782_v55, %v1602_v54  ;;  %5047 = vmatprep.mubr.msk.f32.mxu0 %vm5254_vm2, %v5251_v0  ;;  %v2885_v50 = vld [vmem:[#allocation2 + $0xac] sm:$0xff]  ;;  %v3193_v55 = vld [vmem:[#allocation2 + $0x35] sm:$0xff] }
 0x21b   : > { %v4736_v59 = vpop.f32.mrf.mxu0  ;;  %v1489_v61 = vpop.f32.mrf.mxu1  ;;  %4990 = vmatmul.mubr.msk.f32.gmra.mxu1 %vm245_vm0, %v2562_v58 }
 0x21c   : > { %1883 = vst.msk [vmem:[#allocation3 + $0x30] sm:$0xff] %vm272_vm1, %v1862_v57  ;;  %v1545_v63 = vadd.f32 %v1489_v61, %v1285_v60  ;;  %4992 = vmatprep.mubr.msk.f32.mxu1 %vm5254_vm2, %v5251_v0  ;;  %v1291_v57 = vld [vmem:[#allocation3 + $0x90] sm:$0xff] }
 0x21d   : > { %v1787_v3 = vpop.f32.mrf.mxu0  ;;  %5048 = vmatmul.mubr.msk.f32.gmra.mxu0 %vm245_vm0, %v2880_v1  ;;  %v4681_v4 = vpop.f32.mrf.mxu1  ;;  %v1606_v31 = vld [vmem:[#allocation3 + $0x50] sm:$0xff] }
 0x21e   : > { %1566 = vst.msk [vmem:[#allocation3 + $0x60] sm:$0xff] %vm272_vm1, %v1545_v63  ;;  %v1863_v5 = vadd.f32 %v1787_v3, %v1603_v2  ;;  %5050 = vmatprep.mubr.msk.f32.mxu0 %vm5254_vm2, %v5251_v0  ;;  %v2886_v60 = vld [vmem:[#allocation2 + $0xb4] sm:$0xff]  ;;  %v3194_v3 = vld [vmem:[#allocation2 + $0x3d] sm:$0xff] }
 0x21f   : > { %v4739_v7 = vpop.f32.mrf.mxu0  ;;  %v1494_v10 = vpop.f32.mrf.mxu1  ;;  %4993 = vmatmul.mubr.msk.f32.gmra.mxu1 %vm245_vm0, %v2563_v6  ;;  %v2887_v4 = vld [vmem:[#allocation2 + $0xbc] sm:$0xff] }
 0x220   : > { %1884 = vst.msk [vmem:[#allocation3 + $0x38] sm:$0xff] %vm272_vm1, %v1863_v5  ;;  %v1546_v11 = vadd.f32 %v1494_v10, %v1286_v9  ;;  %4995 = vmatprep.mubr.msk.f32.mxu1 %vm5254_vm2, %v5251_v0  ;;  %v1292_v6 = vld [vmem:[#allocation3 + $0x98] sm:$0xff] }
 0x221   : > { %v1792_v14 = vpop.f32.mrf.mxu0  ;;  %5051 = vmatmul.mubr.msk.f32.gmra.mxu0 %vm245_vm0, %v2881_v45  ;;  %v4684_v15 = vpop.f32.mrf.mxu1  ;;  %v1607_v40 = vld [vmem:[#allocation3 + $0x58] sm:$0xff] }
 0x222   : > { %1567 = vst.msk [vmem:[#allocation3 + $0x68] sm:$0xff] %vm272_vm1, %v1546_v11  ;;  %v1864_v16 = vadd.f32 %v1792_v14, %v1604_v13  ;;  %5053 = vmatprep.mubr.msk.f32.mxu0 %vm5254_vm2, %v5251_v0  ;;  %v3195_v14 = vld [vmem:[#allocation2 + $0x45] sm:$0xff] }
 0x223   : > { %v4742_v62 = vpop.f32.mrf.mxu0  ;;  %v1499_v19 = vpop.f32.mrf.mxu1  ;;  %4996 = vmatmul.mubr.msk.f32.gmra.mxu1 %vm245_vm0, %v2564_v17 }
 0x224   : > { %1885 = vst.msk [vmem:[#allocation3 + $0x40] sm:$0xff] %vm272_vm1, %v1864_v16  ;;  %v1547_v20 = vadd.f32 %v1499_v19, %v1287_v18  ;;  %5081 = vmatprep.mubr.msk.f32.mxu1 %vm5254_vm2, %v5251_v0  ;;  %v1293_v16 = vld [vmem:[#allocation3 + $0xa0] sm:$0xff]  ;;  %v3513_v18 = vld [vmem:[#allocation2 + $0x1e] sm:$0xff] }
 0x225   : > { %v1797_v23 = vpop.f32.mrf.mxu0  ;;  %5054 = vmatmul.mubr.msk.f32.gmra.mxu0 %vm245_vm0, %v2882_v21  ;;  %v4687_v24 = vpop.f32.mrf.mxu1  ;;  %v1608_v51 = vld [vmem:[#allocation3 + $0x60] sm:$0xff] }
 0x226   : > { %1568 = vst.msk [vmem:[#allocation3 + $0x70] sm:$0xff] %vm272_vm1, %v1547_v20  ;;  %v1865_v25 = vadd.f32 %v1797_v23, %v1605_v22  ;;  %5056 = vmatprep.mubr.msk.f32.mxu0 %vm5254_vm2, %v5251_v0  ;;  %v3196_v23 = vld [vmem:[#allocation2 + $0x4d] sm:$0xff] }
 0x227   : > { %v4745_v8 = vpop.f32.mrf.mxu0  ;;  %v1504_v28 = vpop.f32.mrf.mxu1  ;;  %5082 = vmatmul.mubr.msk.f32.vlgmr.msra.gmra.mxu1 %vm245_vm0, %v3190_v26 }
 0x228   : > { %1886 = vst.msk [vmem:[#allocation3 + $0x48] sm:$0xff] %vm272_vm1, %v1865_v25  ;;  %v1548_v29 = vadd.f32 %v1504_v28, %v1288_v27  ;;  %5084 = vmatprep.mubr.msk.f32.mxu1 %vm5254_vm2, %v5251_v0  ;;  %v1919_v25 = vld [vmem:[#allocation3] sm:$0xff] }
 0x229   : > { %v1802_v32 = vpop.f32.mrf.mxu0  ;;  %5057 = vmatmul.mubr.msk.f32.gmra.mxu0 %vm245_vm0, %v2883_v30  ;;  %v4690_v33 = vpop.f32.mrf.mxu1  ;;  %v1609_v61 = vld [vmem:[#allocation3 + $0x68] sm:$0xff]  ;;  %v3514_v27 = vld [vmem:[#allocation2 + $0x26] sm:$0xff] }
 0x22a   : > { %1569 = vst.msk [vmem:[#allocation3 + $0x78] sm:$0xff] %vm272_vm1, %v1548_v29  ;;  %v1866_v34 = vadd.f32 %v1802_v32, %v1606_v31  ;;  %5059 = vmatprep.mubr.msk.f32.mxu0 %vm5254_vm2, %v5251_v0  ;;  %v3197_v32 = vld [vmem:[#allocation2 + $0x55] sm:$0xff] }
 0x22b   : > { %v4748_v12 = vpop.f32.mrf.mxu0  ;;  %v1509_v37 = vpop.f32.mrf.mxu1  ;;  %5085 = vmatmul.mubr.msk.f32.gmra.mxu1 %vm245_vm0, %v3191_v35 }
 0x22c   : > { %1887 = vst.msk [vmem:[#allocation3 + $0x50] sm:$0xff] %vm272_vm1, %v1866_v34  ;;  %v1549_v38 = vadd.f32 %v1509_v37, %v1289_v36  ;;  %5087 = vmatprep.mubr.msk.f32.mxu1 %vm5254_vm2, %v5251_v0  ;;  %v1920_v34 = vld [vmem:[#allocation3 + $0x8] sm:$0xff] }
 0x22d   : > { %v1807_v41 = vpop.f32.mrf.mxu0  ;;  %5060 = vmatmul.mubr.msk.f32.gmra.mxu0 %vm245_vm0, %v2884_v39  ;;  %v4693_v42 = vpop.f32.mrf.mxu1  ;;  %v1610_v10 = vld [vmem:[#allocation3 + $0x70] sm:$0xff]  ;;  %v3515_v36 = vld [vmem:[#allocation2 + $0x2e] sm:$0xff] }
 0x22e   : > { %1570 = vst.msk [vmem:[#allocation3 + $0x80] sm:$0xff] %vm272_vm1, %v1549_v38  ;;  %v1867_v43 = vadd.f32 %v1807_v41, %v1607_v40  ;;  %5062 = vmatprep.mubr.msk.f32.mxu0 %vm5254_vm2, %v5251_v0  ;;  %v3198_v41 = vld [vmem:[#allocation2 + $0x5d] sm:$0xff] }
 0x22f   : > { %v4751_v46 = vpop.f32.mrf.mxu0  ;;  %v1514_v48 = vpop.f32.mrf.mxu1  ;;  %5088 = vmatmul.mubr.msk.f32.gmra.mxu1 %vm245_vm0, %v3192_v44 }
 0x230   : > { %1888 = vst.msk [vmem:[#allocation3 + $0x58] sm:$0xff] %vm272_vm1, %v1867_v43  ;;  %v1550_v49 = vadd.f32 %v1514_v48, %v1290_v47  ;;  %5090 = vmatprep.mubr.msk.f32.mxu1 %vm5254_vm2, %v5251_v0  ;;  %v1921_v43 = vld [vmem:[#allocation3 + $0x10] sm:$0xff] }
 0x231   : > { %v1812_v52 = vpop.f32.mrf.mxu0  ;;  %5063 = vmatmul.mubr.msk.f32.gmra.mxu0 %vm245_vm0, %v2885_v50  ;;  %v4696_v53 = vpop.f32.mrf.mxu1  ;;  %v1611_v19 = vld [vmem:[#allocation3 + $0x78] sm:$0xff]  ;;  %v3516_v47 = vld [vmem:[#allocation2 + $0x36] sm:$0xff] }
 0x232   : > { %1571 = vst.msk [vmem:[#allocation3 + $0x88] sm:$0xff] %vm272_vm1, %v1550_v49  ;;  %v1868_v54 = vadd.f32 %v1812_v52, %v1608_v51  ;;  %5065 = vmatprep.mubr.msk.f32.mxu0 %vm5254_vm2, %v5251_v0  ;;  %v3199_v52 = vld [vmem:[#allocation2 + $0x65] sm:$0xff] }
 0x233   : > { %v4754_v56 = vpop.f32.mrf.mxu0  ;;  %v1519_v58 = vpop.f32.mrf.mxu1  ;;  %5091 = vmatmul.mubr.msk.f32.gmra.mxu1 %vm245_vm0, %v3193_v55 }
 0x234   : > { %1889 = vst.msk [vmem:[#allocation3 + $0x60] sm:$0xff] %vm272_vm1, %v1868_v54  ;;  %v1551_v59 = vadd.f32 %v1519_v58, %v1291_v57  ;;  %5093 = vmatprep.mubr.msk.f32.mxu1 %vm5254_vm2, %v5251_v0  ;;  %v1922_v54 = vld [vmem:[#allocation3 + $0x18] sm:$0xff] }
 0x235   : > { %v1817_v63 = vpop.f32.mrf.mxu0  ;;  %5066 = vmatmul.mubr.msk.f32.gmra.mxu0 %vm245_vm0, %v2886_v60  ;;  %v4699_v1 = vpop.f32.mrf.mxu1  ;;  %v1612_v28 = vld [vmem:[#allocation3 + $0x80] sm:$0xff]  ;;  %v3517_v57 = vld [vmem:[#allocation2 + $0x3e] sm:$0xff] }
 0x236   : > { %1572 = vst.msk [vmem:[#allocation3 + $0x90] sm:$0xff] %vm272_vm1, %v1551_v59  ;;  %v1869_v2 = vadd.f32 %v1817_v63, %v1609_v61  ;;  %5068 = vmatprep.mubr.msk.f32.mxu0 %vm5254_vm2, %v5251_v0  ;;  %v3200_v63 = vld [vmem:[#allocation2 + $0x6d] sm:$0xff] }
 0x237   : > { %v4757_v5 = vpop.f32.mrf.mxu0  ;;  %v1524_v7 = vpop.f32.mrf.mxu1  ;;  %5094 = vmatmul.mubr.msk.f32.gmra.mxu1 %vm245_vm0, %v3194_v3 }
 0x238   : > { %1890 = vst.msk [vmem:[#allocation3 + $0x68] sm:$0xff] %vm272_vm1, %v1869_v2  ;;  %v1552_v9 = vadd.f32 %v1524_v7, %v1292_v6  ;;  %5096 = vmatprep.mubr.msk.f32.mxu1 %vm5254_vm2, %v5251_v0  ;;  %v1923_v2 = vld [vmem:[#allocation3 + $0x20] sm:$0xff] }
 0x239   : > { %v1822_v11 = vpop.f32.mrf.mxu0  ;;  %5069 = vmatmul.mubr.msk.f32.gmra.mxu0 %vm245_vm0, %v2887_v4  ;;  %v4702_v45 = vpop.f32.mrf.mxu1  ;;  %v1613_v37 = vld [vmem:[#allocation3 + $0x88] sm:$0xff]  ;;  %v3518_v5 = vld [vmem:[#allocation2 + $0x46] sm:$0xff] }
 0x23a   : > { %1573 = vst.msk [vmem:[#allocation3 + $0x98] sm:$0xff] %vm272_vm1, %v1552_v9  ;;  %v1870_v13 = vadd.f32 %v1822_v11, %v1610_v10  ;;  %5154 = vmatprep.mubr.msk.f32.mxu0 %vm5254_vm2, %v5251_v0  ;;  %v3201_v11 = vld [vmem:[#allocation2 + $0x75] sm:$0xff] }
 0x23b   : > { %v4760_v15 = vpop.f32.mrf.mxu0  ;;  %v1529_v17 = vpop.f32.mrf.mxu1  ;;  %5097 = vmatmul.mubr.msk.f32.gmra.mxu1 %vm245_vm0, %v3195_v14 }
 0x23c   : > { %1891 = vst.msk [vmem:[#allocation3 + $0x70] sm:$0xff] %vm272_vm1, %v1870_v13  ;;  %v1553_v62 = vadd.f32 %v1529_v17, %v1293_v16  ;;  %5099 = vmatprep.mubr.msk.f32.mxu1 %vm5254_vm2, %v5251_v0  ;;  %v1924_v13 = vld [vmem:[#allocation3 + $0x28] sm:$0xff] }
 0x23d   : > { %v1827_v20 = vpop.f32.mrf.mxu0  ;;  %5155 = vmatmul.mubr.msk.f32.vlgmr.msra.gmra.mxu0 %vm245_vm0, %v3513_v18  ;;  %v4705_v21 = vpop.f32.mrf.mxu1  ;;  %v1614_v48 = vld [vmem:[#allocation3 + $0x90] sm:$0xff]  ;;  %v3519_v16 = vld [vmem:[#allocation2 + $0x4e] sm:$0xff] }
 0x23e   : > { %1574 = vst.msk [vmem:[#allocation3 + $0xa0] sm:$0xff] %vm272_vm1, %v1553_v62  ;;  %v1871_v22 = vadd.f32 %v1827_v20, %v1611_v19  ;;  %5157 = vmatprep.mubr.msk.f32.mxu0 %vm5254_vm2, %v5251_v0  ;;  %v3202_v20 = vld [vmem:[#allocation2 + $0x7d] sm:$0xff] }
 0x23f   : > { %v4763_v24 = vpop.f32.mrf.mxu0  ;;  %v2075_v26 = vpop.f32.mrf.mxu1  ;;  %5100 = vmatmul.mubr.msk.f32.gmra.mxu1 %vm245_vm0, %v3196_v23 }
 0x240   : > { %1892 = vst.msk [vmem:[#allocation3 + $0x78] sm:$0xff] %vm272_vm1, %v1871_v22  ;;  %v2179_v8 = vadd.f32 %v2075_v26, %v1919_v25  ;;  %5102 = vmatprep.mubr.msk.f32.mxu1 %vm5254_vm2, %v5251_v0  ;;  %v1925_v22 = vld [vmem:[#allocation3 + $0x30] sm:$0xff] }
 0x241   : > { %v1832_v29 = vpop.f32.mrf.mxu0  ;;  %5158 = vmatmul.mubr.msk.f32.gmra.mxu0 %vm245_vm0, %v3514_v27  ;;  %v4791_v30 = vpop.f32.mrf.mxu1  ;;  %v1615_v58 = vld [vmem:[#allocation3 + $0x98] sm:$0xff]  ;;  %v3520_v25 = vld [vmem:[#allocation2 + $0x56] sm:$0xff] }
 0x242   : > { %2200 = vst.msk [vmem:[#allocation3] sm:$0xff] %vm272_vm1, %v2179_v8  ;;  %v1872_v31 = vadd.f32 %v1832_v29, %v1612_v28  ;;  %5160 = vmatprep.mubr.msk.f32.mxu0 %vm5254_vm2, %v5251_v0  ;;  %v3203_v29 = vld [vmem:[#allocation2 + $0x85] sm:$0xff] }
 0x243   : > { %v4766_v33 = vpop.f32.mrf.mxu0  ;;  %v2080_v35 = vpop.f32.mrf.mxu1  ;;  %5103 = vmatmul.mubr.msk.f32.gmra.mxu1 %vm245_vm0, %v3197_v32 }
 0x244   : > { %1893 = vst.msk [vmem:[#allocation3 + $0x80] sm:$0xff] %vm272_vm1, %v1872_v31  ;;  %v2180_v12 = vadd.f32 %v2080_v35, %v1920_v34  ;;  %5105 = vmatprep.mubr.msk.f32.mxu1 %vm5254_vm2, %v5251_v0  ;;  %v1926_v31 = vld [vmem:[#allocation3 + $0x38] sm:$0xff] }
 0x245   : > { %v1837_v38 = vpop.f32.mrf.mxu0  ;;  %5161 = vmatmul.mubr.msk.f32.gmra.mxu0 %vm245_vm0, %v3515_v36  ;;  %v4794_v39 = vpop.f32.mrf.mxu1  ;;  %v1616_v6 = vld [vmem:[#allocation3 + $0xa0] sm:$0xff]  ;;  %v3521_v34 = vld [vmem:[#allocation2 + $0x5e] sm:$0xff] }
 0x246   : > { %2201 = vst.msk [vmem:[#allocation3 + $0x8] sm:$0xff] %vm272_vm1, %v2180_v12  ;;  %v1873_v40 = vadd.f32 %v1837_v38, %v1613_v37  ;;  %5163 = vmatprep.mubr.msk.f32.mxu0 %vm5254_vm2, %v5251_v0  ;;  %v3204_v38 = vld [vmem:[#allocation2 + $0x8d] sm:$0xff] }
 0x247   : > { %v4769_v42 = vpop.f32.mrf.mxu0  ;;  %v2085_v44 = vpop.f32.mrf.mxu1  ;;  %5106 = vmatmul.mubr.msk.f32.gmra.mxu1 %vm245_vm0, %v3198_v41 }
 0x248   : > { %1894 = vst.msk [vmem:[#allocation3 + $0x88] sm:$0xff] %vm272_vm1, %v1873_v40  ;;  %v2181_v46 = vadd.f32 %v2085_v44, %v1921_v43  ;;  %5108 = vmatprep.mubr.msk.f32.mxu1 %vm5254_vm2, %v5251_v0  ;;  %v1927_v40 = vld [vmem:[#allocation3 + $0x40] sm:$0xff] }
 0x249   : > { %v1842_v49 = vpop.f32.mrf.mxu0  ;;  %5164 = vmatmul.mubr.msk.f32.gmra.mxu0 %vm245_vm0, %v3516_v47  ;;  %v4797_v50 = vpop.f32.mrf.mxu1  ;;  %v2242_v17 = vld [vmem:[#allocation3] sm:$0xff] }
 0x24a   : > { %2202 = vst.msk [vmem:[#allocation3 + $0x10] sm:$0xff] %vm272_vm1, %v2181_v46  ;;  %v1874_v51 = vadd.f32 %v1842_v49, %v1614_v48  ;;  %5166 = vmatprep.mubr.msk.f32.mxu0 %vm5254_vm2, %v5251_v0  ;;  %v3522_v43 = vld [vmem:[#allocation2 + $0x66] sm:$0xff]  ;;  %v3205_v49 = vld [vmem:[#allocation2 + $0x95] sm:$0xff] }
 0x24b   : > { %v4772_v53 = vpop.f32.mrf.mxu0  ;;  %v2090_v55 = vpop.f32.mrf.mxu1  ;;  %5109 = vmatmul.mubr.msk.f32.gmra.mxu1 %vm245_vm0, %v3199_v52 }
 0x24c   : > { %1895 = vst.msk [vmem:[#allocation3 + $0x90] sm:$0xff] %vm272_vm1, %v1874_v51  ;;  %v2182_v56 = vadd.f32 %v2090_v55, %v1922_v54  ;;  %5111 = vmatprep.mubr.msk.f32.mxu1 %vm5254_vm2, %v5251_v0  ;;  %v1928_v51 = vld [vmem:[#allocation3 + $0x48] sm:$0xff] }
 0x24d   : > { %v1847_v59 = vpop.f32.mrf.mxu0  ;;  %5167 = vmatmul.mubr.msk.f32.gmra.mxu0 %vm245_vm0, %v3517_v57  ;;  %v4800_v60 = vpop.f32.mrf.mxu1  ;;  %v2243_v26 = vld [vmem:[#allocation3 + $0x8] sm:$0xff] }
 0x24e   : > { %2203 = vst.msk [vmem:[#allocation3 + $0x18] sm:$0xff] %vm272_vm1, %v2182_v56  ;;  %v1875_v61 = vadd.f32 %v1847_v59, %v1615_v58  ;;  %5169 = vmatprep.mubr.msk.f32.mxu0 %vm5254_vm2, %v5251_v0  ;;  %v3523_v54 = vld [vmem:[#allocation2 + $0x6e] sm:$0xff]  ;;  %v3206_v59 = vld [vmem:[#allocation2 + $0x9d] sm:$0xff] }
 0x24f   : > { %v4775_v1 = vpop.f32.mrf.mxu0  ;;  %v2095_v3 = vpop.f32.mrf.mxu1  ;;  %5112 = vmatmul.mubr.msk.f32.gmra.mxu1 %vm245_vm0, %v3200_v63 }
 0x250   : > { %1896 = vst.msk [vmem:[#allocation3 + $0x98] sm:$0xff] %vm272_vm1, %v1875_v61  ;;  %v2183_v4 = vadd.f32 %v2095_v3, %v1923_v2  ;;  %5114 = vmatprep.mubr.msk.f32.mxu1 %vm5254_vm2, %v5251_v0  ;;  %v1929_v61 = vld [vmem:[#allocation3 + $0x50] sm:$0xff] }
 0x251   : > { %v1852_v7 = vpop.f32.mrf.mxu0  ;;  %5170 = vmatmul.mubr.msk.f32.gmra.mxu0 %vm245_vm0, %v3518_v5  ;;  %v4803_v9 = vpop.f32.mrf.mxu1  ;;  %v2244_v35 = vld [vmem:[#allocation3 + $0x10] sm:$0xff] }
 0x252   : > { %2204 = vst.msk [vmem:[#allocation3 + $0x20] sm:$0xff] %vm272_vm1, %v2183_v4  ;;  %v1876_v10 = vadd.f32 %v1852_v7, %v1616_v6  ;;  %5172 = vmatprep.mubr.msk.f32.mxu0 %vm5254_vm2, %v5251_v0  ;;  %v3524_v2 = vld [vmem:[#allocation2 + $0x76] sm:$0xff]  ;;  %v3207_v7 = vld [vmem:[#allocation2 + $0xa5] sm:$0xff] }
 0x253   : > { %v4778_v45 = vpop.f32.mrf.mxu0  ;;  %v2100_v14 = vpop.f32.mrf.mxu1  ;;  %5115 = vmatmul.mubr.msk.f32.gmra.mxu1 %vm245_vm0, %v3201_v11 }
 0x254   : > { %1897 = vst.msk [vmem:[#allocation3 + $0xa0] sm:$0xff] %vm272_vm1, %v1876_v10  ;;  %v2184_v15 = vadd.f32 %v2100_v14, %v1924_v13  ;;  %5117 = vmatprep.mubr.msk.f32.mxu1 %vm5254_vm2, %v5251_v0  ;;  %v1930_v10 = vld [vmem:[#allocation3 + $0x58] sm:$0xff] }
 0x255   : > { %v2398_v62 = vpop.f32.mrf.mxu0  ;;  %5173 = vmatmul.mubr.msk.f32.gmra.mxu0 %vm245_vm0, %v3519_v16  ;;  %v4806_v18 = vpop.f32.mrf.mxu1  ;;  %v2245_v44 = vld [vmem:[#allocation3 + $0x18] sm:$0xff] }
 0x256   : > { %2205 = vst.msk [vmem:[#allocation3 + $0x28] sm:$0xff] %vm272_vm1, %v2184_v15  ;;  %v2502_v19 = vadd.f32 %v2398_v62, %v2242_v17  ;;  %5175 = vmatprep.mubr.msk.f32.mxu0 %vm5254_vm2, %v5251_v0  ;;  %v3525_v13 = vld [vmem:[#allocation2 + $0x7e] sm:$0xff]  ;;  %v3208_v62 = vld [vmem:[#allocation2 + $0xad] sm:$0xff] }
 0x257   : > { %v4864_v21 = vpop.f32.mrf.mxu0  ;;  %v2105_v23 = vpop.f32.mrf.mxu1  ;;  %5118 = vmatmul.mubr.msk.f32.gmra.mxu1 %vm245_vm0, %v3202_v20 }
 0x258   : > { %2523 = vst.msk [vmem:[#allocation3] sm:$0xff] %vm272_vm1, %v2502_v19  ;;  %v2185_v24 = vadd.f32 %v2105_v23, %v1925_v22  ;;  %5120 = vmatprep.mubr.msk.f32.mxu1 %vm5254_vm2, %v5251_v0  ;;  %v1931_v19 = vld [vmem:[#allocation3 + $0x60] sm:$0xff]  ;;  %v3209_v23 = vld [vmem:[#allocation2 + $0xb5] sm:$0xff] }
 0x259   : > { %v2403_v8 = vpop.f32.mrf.mxu0  ;;  %5176 = vmatmul.mubr.msk.f32.gmra.mxu0 %vm245_vm0, %v3520_v25  ;;  %v4809_v27 = vpop.f32.mrf.mxu1  ;;  %v2246_v55 = vld [vmem:[#allocation3 + $0x20] sm:$0xff] }
 0x25a   : > { %2206 = vst.msk [vmem:[#allocation3 + $0x30] sm:$0xff] %vm272_vm1, %v2185_v24  ;;  %v2503_v28 = vadd.f32 %v2403_v8, %v2243_v26  ;;  %5178 = vmatprep.mubr.msk.f32.mxu0 %vm5254_vm2, %v5251_v0  ;;  %v3526_v22 = vld [vmem:[#allocation2 + $0x86] sm:$0xff] }
 0x25b   : > { %v4867_v30 = vpop.f32.mrf.mxu0  ;;  %v2110_v32 = vpop.f32.mrf.mxu1  ;;  %5121 = vmatmul.mubr.msk.f32.gmra.mxu1 %vm245_vm0, %v3203_v29 }
 0x25c   : > { %2524 = vst.msk [vmem:[#allocation3 + $0x8] sm:$0xff] %vm272_vm1, %v2503_v28  ;;  %v2186_v33 = vadd.f32 %v2110_v32, %v1926_v31  ;;  %5123 = vmatprep.mubr.msk.f32.mxu1 %vm5254_vm2, %v5251_v0  ;;  %v1932_v28 = vld [vmem:[#allocation3 + $0x68] sm:$0xff]  ;;  %v3210_v32 = vld [vmem:[#allocation2 + $0xbd] sm:$0xff] }
 0x25d   : > { %v2408_v12 = vpop.f32.mrf.mxu0  ;;  %5179 = vmatmul.mubr.msk.f32.gmra.mxu0 %vm245_vm0, %v3521_v34  ;;  %v4812_v36 = vpop.f32.mrf.mxu1  ;;  %v2247_v3 = vld [vmem:[#allocation3 + $0x28] sm:$0xff] }
 0x25e   : > { %2207 = vst.msk [vmem:[#allocation3 + $0x38] sm:$0xff] %vm272_vm1, %v2186_v33  ;;  %v2504_v37 = vadd.f32 %v2408_v12, %v2244_v35  ;;  %5181 = vmatprep.mubr.msk.f32.mxu0 %vm5254_vm2, %v5251_v0  ;;  %v3527_v31 = vld [vmem:[#allocation2 + $0x8e] sm:$0xff] }
 0x25f   : > { %v4870_v39 = vpop.f32.mrf.mxu0  ;;  %v2115_v41 = vpop.f32.mrf.mxu1  ;;  %5124 = vmatmul.mubr.msk.f32.gmra.mxu1 %vm245_vm0, %v3204_v38 }
 0x260   : > { %2525 = vst.msk [vmem:[#allocation3 + $0x10] sm:$0xff] %vm272_vm1, %v2504_v37  ;;  %v2187_v42 = vadd.f32 %v2115_v41, %v1927_v40  ;;  %5126 = vmatprep.mubr.msk.f32.mxu1 %vm5254_vm2, %v5251_v0  ;;  %v1933_v37 = vld [vmem:[#allocation3 + $0x70] sm:$0xff] }
 0x261   : > { %v2413_v46 = vpop.f32.mrf.mxu0  ;;  %5182 = vmatmul.mubr.msk.f32.gmra.mxu0 %vm245_vm0, %v3522_v43  ;;  %v4815_v47 = vpop.f32.mrf.mxu1  ;;  %v2248_v14 = vld [vmem:[#allocation3 + $0x30] sm:$0xff] }
 0x262   : > { %2208 = vst.msk [vmem:[#allocation3 + $0x40] sm:$0xff] %vm272_vm1, %v2187_v42  ;;  %v2505_v48 = vadd.f32 %v2413_v46, %v2245_v44  ;;  %5184 = vmatprep.mubr.msk.f32.mxu0 %vm5254_vm2, %v5251_v0  ;;  %v3528_v40 = vld [vmem:[#allocation2 + $0x96] sm:$0xff]  ;;  %v1934_v47 = vld [vmem:[#allocation3 + $0x78] sm:$0xff] }
 0x263   : > { %v4873_v50 = vpop.f32.mrf.mxu0  ;;  %v2120_v52 = vpop.f32.mrf.mxu1  ;;  %5127 = vmatmul.mubr.msk.f32.gmra.mxu1 %vm245_vm0, %v3205_v49 }
 0x264   : > { %2526 = vst.msk [vmem:[#allocation3 + $0x18] sm:$0xff] %vm272_vm1, %v2505_v48  ;;  %v2188_v53 = vadd.f32 %v2120_v52, %v1928_v51  ;;  %5129 = vmatprep.mubr.msk.f32.mxu1 %vm5254_vm2, %v5251_v0  ;;  %v3529_v50 = vld [vmem:[#allocation2 + $0x9e] sm:$0xff] }
 0x265   : > { %v2418_v56 = vpop.f32.mrf.mxu0  ;;  %5185 = vmatmul.mubr.msk.f32.gmra.mxu0 %vm245_vm0, %v3523_v54  ;;  %v4818_v57 = vpop.f32.mrf.mxu1  ;;  %v2249_v24 = vld [vmem:[#allocation3 + $0x38] sm:$0xff] }
 0x266   : > { %2209 = vst.msk [vmem:[#allocation3 + $0x48] sm:$0xff] %vm272_vm1, %v2188_v53  ;;  %v2506_v58 = vadd.f32 %v2418_v56, %v2246_v55  ;;  %5187 = vmatprep.mubr.msk.f32.mxu0 %vm5254_vm2, %v5251_v0  ;;  %v1935_v56 = vld [vmem:[#allocation3 + $0x80] sm:$0xff] }
 0x267   : > { %v4876_v60 = vpop.f32.mrf.mxu0  ;;  %v2125_v63 = vpop.f32.mrf.mxu1  ;;  %5130 = vmatmul.mubr.msk.f32.gmra.mxu1 %vm245_vm0, %v3206_v59  ;;  %v3530_v59 = vld [vmem:[#allocation2 + $0xa6] sm:$0xff] }
 0x268   : > { %2527 = vst.msk [vmem:[#allocation3 + $0x20] sm:$0xff] %vm272_vm1, %v2506_v58  ;;  %v2189_v1 = vadd.f32 %v2125_v63, %v1929_v61  ;;  %5132 = vmatprep.mubr.msk.f32.mxu1 %vm5254_vm2, %v5251_v0 }
 0x269   : > { %v2423_v4 = vpop.f32.mrf.mxu0  ;;  %5188 = vmatmul.mubr.msk.f32.gmra.mxu0 %vm245_vm0, %v3524_v2  ;;  %v4821_v5 = vpop.f32.mrf.mxu1  ;;  %v2250_v33 = vld [vmem:[#allocation3 + $0x40] sm:$0xff] }
 0x26a   : > { %2210 = vst.msk [vmem:[#allocation3 + $0x50] sm:$0xff] %vm272_vm1, %v2189_v1  ;;  %v2507_v6 = vadd.f32 %v2423_v4, %v2247_v3  ;;  %5190 = vmatprep.mubr.msk.f32.mxu0 %vm5254_vm2, %v5251_v0  ;;  %v1936_v3 = vld [vmem:[#allocation3 + $0x88] sm:$0xff] }
 0x26b   : > { %v4879_v9 = vpop.f32.mrf.mxu0  ;;  %v2130_v11 = vpop.f32.mrf.mxu1  ;;  %5133 = vmatmul.mubr.msk.f32.gmra.mxu1 %vm245_vm0, %v3207_v7 }
 0x26c   : > { %2528 = vst.msk [vmem:[#allocation3 + $0x28] sm:$0xff] %vm272_vm1, %v2507_v6  ;;  %v2190_v45 = vadd.f32 %v2130_v11, %v1930_v10  ;;  %5135 = vmatprep.mubr.msk.f32.mxu1 %vm5254_vm2, %v5251_v0  ;;  %v3531_v6 = vld [vmem:[#allocation2 + $0xae] sm:$0xff] }
 0x26d   : > { %v2428_v15 = vpop.f32.mrf.mxu0  ;;  %5191 = vmatmul.mubr.msk.f32.gmra.mxu0 %vm245_vm0, %v3525_v13  ;;  %v4824_v16 = vpop.f32.mrf.mxu1  ;;  %v2251_v41 = vld [vmem:[#allocation3 + $0x48] sm:$0xff] }
 0x26e   : > { %2211 = vst.msk [vmem:[#allocation3 + $0x58] sm:$0xff] %vm272_vm1, %v2190_v45  ;;  %v2508_v17 = vadd.f32 %v2428_v15, %v2248_v14  ;;  %5193 = vmatprep.mubr.msk.f32.mxu0 %vm5254_vm2, %v5251_v0  ;;  %v3532_v45 = vld [vmem:[#allocation2 + $0xb6] sm:$0xff] }
 0x26f   : > { %v4882_v18 = vpop.f32.mrf.mxu0  ;;  %v2135_v20 = vpop.f32.mrf.mxu1  ;;  %5136 = vmatmul.mubr.msk.f32.gmra.mxu1 %vm245_vm0, %v3208_v62  ;;  %v1937_v14 = vld [vmem:[#allocation3 + $0x90] sm:$0xff] }
 0x270   : > { %2529 = vst.msk [vmem:[#allocation3 + $0x30] sm:$0xff] %vm272_vm1, %v2508_v17  ;;  %v2191_v21 = vadd.f32 %v2135_v20, %v1931_v19  ;;  %5138 = vmatprep.mubr.msk.f32.mxu1 %vm5254_vm2, %v5251_v0  ;;  %v3533_v20 = vld [vmem:[#allocation2 + $0xbe] sm:$0xff] }
 0x271   : > { %v2433_v25 = vpop.f32.mrf.mxu0  ;;  %5194 = vmatmul.mubr.msk.f32.gmra.mxu0 %vm245_vm0, %v3526_v22  ;;  %v4827_v26 = vpop.f32.mrf.mxu1  ;;  %v2252_v51 = vld [vmem:[#allocation3 + $0x50] sm:$0xff]  ;;  %v1938_v22 = vld [vmem:[#allocation3 + $0x98] sm:$0xff] }
 0x272   : > { %2212 = vst.msk [vmem:[#allocation3 + $0x60] sm:$0xff] %vm272_vm1, %v2191_v21  ;;  %v2509_v8 = vadd.f32 %v2433_v25, %v2249_v24  ;;  %5196 = vmatprep.mubr.msk.f32.mxu0 %vm5254_vm2, %v5251_v0 }
 0x273   : > { %v4885_v27 = vpop.f32.mrf.mxu0  ;;  %v2140_v29 = vpop.f32.mrf.mxu1  ;;  %5139 = vmatmul.mubr.msk.f32.gmra.mxu1 %vm245_vm0, %v3209_v23 }
 0x274   : > { %2530 = vst.msk [vmem:[#allocation3 + $0x38] sm:$0xff] %vm272_vm1, %v2509_v8  ;;  %v2192_v30 = vadd.f32 %v2140_v29, %v1932_v28  ;;  %5141 = vmatprep.mubr.msk.f32.mxu1 %vm5254_vm2, %v5251_v0  ;;  %v1939_v29 = vld [vmem:[#allocation3 + $0xa0] sm:$0xff] }
 0x275   : > { %v2438_v34 = vpop.f32.mrf.mxu0  ;;  %5197 = vmatmul.mubr.msk.f32.gmra.mxu0 %vm245_vm0, %v3527_v31  ;;  %v4830_v35 = vpop.f32.mrf.mxu1  ;;  %v2253_v60 = vld [vmem:[#allocation3 + $0x58] sm:$0xff] }
 0x276   : > { %2213 = vst.msk [vmem:[#allocation3 + $0x68] sm:$0xff] %vm272_vm1, %v2192_v30  ;;  %v2510_v12 = vadd.f32 %v2438_v34, %v2250_v33  ;;  %5199 = vmatprep.mubr.msk.f32.mxu0 %vm5254_vm2, %v5251_v0 }
 0x277   : > { %v4888_v36 = vpop.f32.mrf.mxu0  ;;  %v2145_v38 = vpop.f32.mrf.mxu1  ;;  %5142 = vmatmul.mubr.msk.f32.gmra.mxu1 %vm245_vm0, %v3210_v32 }
 0x278   : > { %2531 = vst.msk [vmem:[#allocation3 + $0x40] sm:$0xff] %vm272_vm1, %v2510_v12  ;;  %v2193_v39 = vadd.f32 %v2145_v38, %v1933_v37  ;;  %v2565_v12 = vld [vmem:[#allocation3] sm:$0xff] }
 0x279   : > { %v2443_v42 = vpop.f32.mrf.mxu0  ;;  %5200 = vmatmul.mubr.msk.f32.gmra.mxu0 %vm245_vm0, %v3528_v40  ;;  %v4833_v43 = vpop.f32.mrf.mxu1  ;;  %v2254_v7 = vld [vmem:[#allocation3 + $0x60] sm:$0xff] }
 0x27a   : > { %2214 = vst.msk [vmem:[#allocation3 + $0x70] sm:$0xff] %vm272_vm1, %v2193_v39  ;;  %v2511_v44 = vadd.f32 %v2443_v42, %v2251_v41  ;;  %5202 = vmatprep.mubr.msk.f32.mxu0 %vm5254_vm2, %v5251_v0  ;;  %v2566_v43 = vld [vmem:[#allocation3 + $0x8] sm:$0xff] }
 0x27b   : > { %v4891_v46 = vpop.f32.mrf.mxu0  ;;  %v2150_v48 = vpop.f32.mrf.mxu1 }
 0x27c   : > { %2532 = vst.msk [vmem:[#allocation3 + $0x48] sm:$0xff] %vm272_vm1, %v2511_v44  ;;  %v2194_v49 = vadd.f32 %v2150_v48, %v1934_v47 }
 0x27d   : > { %v2448_v52 = vpop.f32.mrf.mxu0  ;;  %5203 = vmatmul.mubr.msk.f32.gmra.mxu0 %vm245_vm0, %v3529_v50  ;;  %v4836_v53 = vpop.f32.mrf.mxu1  ;;  %v2255_v17 = vld [vmem:[#allocation3 + $0x68] sm:$0xff] }
 0x27e   : > { %2215 = vst.msk [vmem:[#allocation3 + $0x78] sm:$0xff] %vm272_vm1, %v2194_v49  ;;  %v2512_v54 = vadd.f32 %v2448_v52, %v2252_v51  ;;  %5205 = vmatprep.mubr.msk.f32.mxu0 %vm5254_vm2, %v5251_v0  ;;  %v2567_v52 = vld [vmem:[#allocation3 + $0x10] sm:$0xff] }
 0x27f   : > { %v4894_v55 = vpop.f32.mrf.mxu0  ;;  %v2155_v57 = vpop.f32.mrf.mxu1 }
 0x280   : > { %2533 = vst.msk [vmem:[#allocation3 + $0x50] sm:$0xff] %vm272_vm1, %v2512_v54  ;;  %v2195_v58 = vadd.f32 %v2155_v57, %v1935_v56 }
 0x281   : > { %v2453_v61 = vpop.f32.mrf.mxu0  ;;  %5206 = vmatmul.mubr.msk.f32.gmra.mxu0 %vm245_vm0, %v3530_v59  ;;  %v4839_v63 = vpop.f32.mrf.mxu1  ;;  %v2256_v25 = vld [vmem:[#allocation3 + $0x70] sm:$0xff] }
 0x282   : > { %2216 = vst.msk [vmem:[#allocation3 + $0x80] sm:$0xff] %vm272_vm1, %v2195_v58  ;;  %v2513_v1 = vadd.f32 %v2453_v61, %v2253_v60  ;;  %5208 = vmatprep.mubr.msk.f32.mxu0 %vm5254_vm2, %v5251_v0  ;;  %v2568_v60 = vld [vmem:[#allocation3 + $0x18] sm:$0xff] }
 0x283   : > { %v4897_v2 = vpop.f32.mrf.mxu0  ;;  %v2160_v4 = vpop.f32.mrf.mxu1 }
 0x284   : > { %2534 = vst.msk [vmem:[#allocation3 + $0x58] sm:$0xff] %vm272_vm1, %v2513_v1  ;;  %v2196_v5 = vadd.f32 %v2160_v4, %v1936_v3 }
 0x285   : > { %v2458_v9 = vpop.f32.mrf.mxu0  ;;  %5209 = vmatmul.mubr.msk.f32.gmra.mxu0 %vm245_vm0, %v3531_v6  ;;  %v4842_v10 = vpop.f32.mrf.mxu1  ;;  %v2257_v31 = vld [vmem:[#allocation3 + $0x78] sm:$0xff]  ;;  %v2569_v6 = vld [vmem:[#allocation3 + $0x20] sm:$0xff] }
 0x286   : > { %2217 = vst.msk [vmem:[#allocation3 + $0x88] sm:$0xff] %vm272_vm1, %v2196_v5  ;;  %v2514_v11 = vadd.f32 %v2458_v9, %v2254_v7  ;;  %5211 = vmatprep.mubr.msk.f32.mxu0 %vm5254_vm2, %v5251_v0 }
 0x287   : > { %v4900_v13 = vpop.f32.mrf.mxu0  ;;  %v2165_v15 = vpop.f32.mrf.mxu1 }
 0x288   : > { %2535 = vst.msk [vmem:[#allocation3 + $0x60] sm:$0xff] %vm272_vm1, %v2514_v11  ;;  %v2197_v16 = vadd.f32 %v2165_v15, %v1937_v14  ;;  %v2570_v15 = vld [vmem:[#allocation3 + $0x28] sm:$0xff] }
 0x289   : > { %v2463_v62 = vpop.f32.mrf.mxu0  ;;  %5212 = vmatmul.mubr.msk.f32.gmra.mxu0 %vm245_vm0, %v3532_v45  ;;  %v4845_v18 = vpop.f32.mrf.mxu1  ;;  %v2258_v38 = vld [vmem:[#allocation3 + $0x80] sm:$0xff] }
 0x28a   : > { %2218 = vst.msk [vmem:[#allocation3 + $0x90] sm:$0xff] %vm272_vm1, %v2197_v16  ;;  %v2515_v19 = vadd.f32 %v2463_v62, %v2255_v17  ;;  %5214 = vmatprep.mubr.msk.f32.mxu0 %vm5254_vm2, %v5251_v0 }
 0x28b   : > { %v4903_v21 = vpop.f32.mrf.mxu0  ;;  %v2170_v23 = vpop.f32.mrf.mxu1 }
 0x28c   : > { %2536 = vst.msk [vmem:[#allocation3 + $0x68] sm:$0xff] %vm272_vm1, %v2515_v19  ;;  %v2198_v24 = vadd.f32 %v2170_v23, %v1938_v22  ;;  %v2571_v22 = vld [vmem:[#allocation3 + $0x30] sm:$0xff] }
 0x28d   : > { %v2468_v26 = vpop.f32.mrf.mxu0  ;;  %5215 = vmatmul.mubr.msk.f32.gmra.mxu0 %vm245_vm0, %v3533_v20  ;;  %v4848_v8 = vpop.f32.mrf.mxu1  ;;  %v2259_v47 = vld [vmem:[#allocation3 + $0x88] sm:$0xff] }
 0x28e   : > { %2219 = vst.msk [vmem:[#allocation3 + $0x98] sm:$0xff] %vm272_vm1, %v2198_v24  ;;  %v2516_v27 = vadd.f32 %v2468_v26, %v2256_v25 }
 0x28f   : > { %v4906_v28 = vpop.f32.mrf.mxu0  ;;  %v2175_v30 = vpop.f32.mrf.mxu1 }
 0x290   : > { %2537 = vst.msk [vmem:[#allocation3 + $0x70] sm:$0xff] %vm272_vm1, %v2516_v27  ;;  %v2199_v0 = vadd.f32 %v2175_v30, %v1939_v29  ;;  %v2572_v29 = vld [vmem:[#allocation3 + $0x38] sm:$0xff] }
 0x291   : > { %v2473_v32 = vpop.f32.mrf.mxu0  ;;  %v4851_v33 = vpop.f32.mrf.mxu1  ;;  %v2260_v55 = vld [vmem:[#allocation3 + $0x90] sm:$0xff] }
 0x292   : > { %2220 = vst.msk [vmem:[#allocation3 + $0xa0] sm:$0xff] %vm272_vm1, %v2199_v0  ;;  %v2517_v34 = vadd.f32 %v2473_v32, %v2257_v31 }
 0x293   : > { %v4909_v35 = vpop.f32.mrf.mxu0  ;;  %v2721_v36 = vpop.f32.mrf.mxu1 }
 0x294   : > { %2538 = vst.msk [vmem:[#allocation3 + $0x78] sm:$0xff] %vm272_vm1, %v2517_v34  ;;  %v2825_v37 = vadd.f32 %v2721_v36, %v2565_v12  ;;  %v2573_v12 = vld [vmem:[#allocation3 + $0x40] sm:$0xff] }
 0x295   : > { %v2478_v39 = vpop.f32.mrf.mxu0  ;;  %v4937_v40 = vpop.f32.mrf.mxu1  ;;  %v2261_v1 = vld [vmem:[#allocation3 + $0x98] sm:$0xff] }
 0x296   : > { %2846 = vst.msk [vmem:[#allocation3] sm:$0xff] %vm272_vm1, %v2825_v37  ;;  %v2518_v41 = vadd.f32 %v2478_v39, %v2258_v38 }
 0x297   : > { %v4912_v42 = vpop.f32.mrf.mxu0  ;;  %v2726_v44 = vpop.f32.mrf.mxu1 }
 0x298   : > { %2539 = vst.msk [vmem:[#allocation3 + $0x80] sm:$0xff] %vm272_vm1, %v2518_v41  ;;  %v2826_v46 = vadd.f32 %v2726_v44, %v2566_v43  ;;  %v2574_v43 = vld [vmem:[#allocation3 + $0x48] sm:$0xff] }
 0x299   : > { %v2483_v48 = vpop.f32.mrf.mxu0  ;;  %v4940_v49 = vpop.f32.mrf.mxu1  ;;  %v2262_v10 = vld [vmem:[#allocation3 + $0xa0] sm:$0xff] }
 0x29a   : > { %2847 = vst.msk [vmem:[#allocation3 + $0x8] sm:$0xff] %vm272_vm1, %v2826_v46  ;;  %v2519_v50 = vadd.f32 %v2483_v48, %v2259_v47 }
 0x29b   : > { %v4915_v51 = vpop.f32.mrf.mxu0  ;;  %v2731_v53 = vpop.f32.mrf.mxu1 }
 0x29c   : > { %2540 = vst.msk [vmem:[#allocation3 + $0x88] sm:$0xff] %vm272_vm1, %v2519_v50  ;;  %v2827_v54 = vadd.f32 %v2731_v53, %v2567_v52  ;;  %v2575_v52 = vld [vmem:[#allocation3 + $0x50] sm:$0xff] }
 0x29d   : > { %v2488_v56 = vpop.f32.mrf.mxu0  ;;  %v4943_v57 = vpop.f32.mrf.mxu1  ;;  %v2888_v62 = vld [vmem:[#allocation3] sm:$0xff] }
 0x29e   : > { %2848 = vst.msk [vmem:[#allocation3 + $0x10] sm:$0xff] %vm272_vm1, %v2827_v54  ;;  %v2520_v58 = vadd.f32 %v2488_v56, %v2260_v55 }
 0x29f   : > { %v4918_v59 = vpop.f32.mrf.mxu0  ;;  %v2736_v61 = vpop.f32.mrf.mxu1 }
 0x2a0   : > { %2541 = vst.msk [vmem:[#allocation3 + $0x90] sm:$0xff] %vm272_vm1, %v2520_v58  ;;  %v2828_v63 = vadd.f32 %v2736_v61, %v2568_v60  ;;  %v2576_v60 = vld [vmem:[#allocation3 + $0x58] sm:$0xff] }
 0x2a1   : > { %v2493_v2 = vpop.f32.mrf.mxu0  ;;  %v4946_v3 = vpop.f32.mrf.mxu1  ;;  %v2889_v25 = vld [vmem:[#allocation3 + $0x8] sm:$0xff] }
 0x2a2   : > { %2849 = vst.msk [vmem:[#allocation3 + $0x18] sm:$0xff] %vm272_vm1, %v2828_v63  ;;  %v2521_v4 = vadd.f32 %v2493_v2, %v2261_v1 }
 0x2a3   : > { %v4921_v5 = vpop.f32.mrf.mxu0  ;;  %v2741_v7 = vpop.f32.mrf.mxu1 }
 0x2a4   : > { %2542 = vst.msk [vmem:[#allocation3 + $0x98] sm:$0xff] %vm272_vm1, %v2521_v4  ;;  %v2829_v9 = vadd.f32 %v2741_v7, %v2569_v6  ;;  %v2577_v6 = vld [vmem:[#allocation3 + $0x60] sm:$0xff] }
 0x2a5   : > { %v2498_v11 = vpop.f32.mrf.mxu0  ;;  %v4949_v45 = vpop.f32.mrf.mxu1  ;;  %v2890_v31 = vld [vmem:[#allocation3 + $0x10] sm:$0xff] }
 0x2a6   : > { %2850 = vst.msk [vmem:[#allocation3 + $0x20] sm:$0xff] %vm272_vm1, %v2829_v9  ;;  %v2522_v13 = vadd.f32 %v2498_v11, %v2262_v10 }
 0x2a7   : > { %v4924_v14 = vpop.f32.mrf.mxu0  ;;  %v2746_v16 = vpop.f32.mrf.mxu1 }
 0x2a8   : > { %2543 = vst.msk [vmem:[#allocation3 + $0xa0] sm:$0xff] %vm272_vm1, %v2522_v13  ;;  %v2830_v17 = vadd.f32 %v2746_v16, %v2570_v15  ;;  %v2578_v15 = vld [vmem:[#allocation3 + $0x68] sm:$0xff] }
 0x2a9   : > { %v3044_v18 = vpop.f32.mrf.mxu0  ;;  %v4952_v19 = vpop.f32.mrf.mxu1  ;;  %v2891_v38 = vld [vmem:[#allocation3 + $0x18] sm:$0xff] }
 0x2aa   : > { %2851 = vst.msk [vmem:[#allocation3 + $0x28] sm:$0xff] %vm272_vm1, %v2830_v17  ;;  %v3148_v20 = vadd.f32 %v3044_v18, %v2888_v62 }
 0x2ab   : > { %v5010_v21 = vpop.f32.mrf.mxu0  ;;  %v2751_v23 = vpop.f32.mrf.mxu1 }
 0x2ac   : > { %3169 = vst.msk [vmem:[#allocation3] sm:$0xff] %vm272_vm1, %v3148_v20  ;;  %v2831_v24 = vadd.f32 %v2751_v23, %v2571_v22  ;;  %v2579_v22 = vld [vmem:[#allocation3 + $0x70] sm:$0xff] }
 0x2ad   : > { %v3049_v26 = vpop.f32.mrf.mxu0  ;;  %v4955_v8 = vpop.f32.mrf.mxu1  ;;  %v2892_v47 = vld [vmem:[#allocation3 + $0x20] sm:$0xff] }
 0x2ae   : > { %2852 = vst.msk [vmem:[#allocation3 + $0x30] sm:$0xff] %vm272_vm1, %v2831_v24  ;;  %v3149_v27 = vadd.f32 %v3049_v26, %v2889_v25 }
 0x2af   : > { %v5013_v28 = vpop.f32.mrf.mxu0  ;;  %v2756_v30 = vpop.f32.mrf.mxu1 }
 0x2b0   : > { %3170 = vst.msk [vmem:[#allocation3 + $0x8] sm:$0xff] %vm272_vm1, %v3149_v27  ;;  %v2832_v0 = vadd.f32 %v2756_v30, %v2572_v29  ;;  %v2580_v29 = vld [vmem:[#allocation3 + $0x78] sm:$0xff] }
 0x2b1   : > { %v3054_v32 = vpop.f32.mrf.mxu0  ;;  %v4958_v33 = vpop.f32.mrf.mxu1  ;;  %v2893_v55 = vld [vmem:[#allocation3 + $0x28] sm:$0xff] }
 0x2b2   : > { %2853 = vst.msk [vmem:[#allocation3 + $0x38] sm:$0xff] %vm272_vm1, %v2832_v0  ;;  %v3150_v34 = vadd.f32 %v3054_v32, %v2890_v31 }
 0x2b3   : > { %v5016_v35 = vpop.f32.mrf.mxu0  ;;  %v2761_v36 = vpop.f32.mrf.mxu1 }
 0x2b4   : > { %3171 = vst.msk [vmem:[#allocation3 + $0x10] sm:$0xff] %vm272_vm1, %v3150_v34  ;;  %v2833_v37 = vadd.f32 %v2761_v36, %v2573_v12  ;;  %v2581_v12 = vld [vmem:[#allocation3 + $0x80] sm:$0xff] }
 0x2b5   : > { %v3059_v39 = vpop.f32.mrf.mxu0  ;;  %v4961_v40 = vpop.f32.mrf.mxu1  ;;  %v2894_v1 = vld [vmem:[#allocation3 + $0x30] sm:$0xff] }
 0x2b6   : > { %2854 = vst.msk [vmem:[#allocation3 + $0x40] sm:$0xff] %vm272_vm1, %v2833_v37  ;;  %v3151_v41 = vadd.f32 %v3059_v39, %v2891_v38 }
 0x2b7   : > { %v5019_v42 = vpop.f32.mrf.mxu0  ;;  %v2766_v44 = vpop.f32.mrf.mxu1 }
 0x2b8   : > { %3172 = vst.msk [vmem:[#allocation3 + $0x18] sm:$0xff] %vm272_vm1, %v3151_v41  ;;  %v2834_v46 = vadd.f32 %v2766_v44, %v2574_v43  ;;  %v2582_v43 = vld [vmem:[#allocation3 + $0x88] sm:$0xff] }
 0x2b9   : > { %v3064_v48 = vpop.f32.mrf.mxu0  ;;  %v4964_v49 = vpop.f32.mrf.mxu1  ;;  %v2895_v10 = vld [vmem:[#allocation3 + $0x38] sm:$0xff] }
 0x2ba   : > { %2855 = vst.msk [vmem:[#allocation3 + $0x48] sm:$0xff] %vm272_vm1, %v2834_v46  ;;  %v3152_v50 = vadd.f32 %v3064_v48, %v2892_v47 }
 0x2bb   : > { %v5022_v51 = vpop.f32.mrf.mxu0  ;;  %v2771_v53 = vpop.f32.mrf.mxu1 }
 0x2bc   : > { %3173 = vst.msk [vmem:[#allocation3 + $0x20] sm:$0xff] %vm272_vm1, %v3152_v50  ;;  %v2835_v54 = vadd.f32 %v2771_v53, %v2575_v52  ;;  %v2583_v52 = vld [vmem:[#allocation3 + $0x90] sm:$0xff] }
 0x2bd   : > { %v3069_v56 = vpop.f32.mrf.mxu0  ;;  %v4967_v57 = vpop.f32.mrf.mxu1  ;;  %v2896_v62 = vld [vmem:[#allocation3 + $0x40] sm:$0xff] }
 0x2be   : > { %2856 = vst.msk [vmem:[#allocation3 + $0x50] sm:$0xff] %vm272_vm1, %v2835_v54  ;;  %v3153_v58 = vadd.f32 %v3069_v56, %v2893_v55 }
 0x2bf   : > { %v5025_v59 = vpop.f32.mrf.mxu0  ;;  %v2776_v61 = vpop.f32.mrf.mxu1 }
 0x2c0   : > { %3174 = vst.msk [vmem:[#allocation3 + $0x28] sm:$0xff] %vm272_vm1, %v3153_v58  ;;  %v2836_v63 = vadd.f32 %v2776_v61, %v2576_v60  ;;  %v2584_v60 = vld [vmem:[#allocation3 + $0x98] sm:$0xff] }
 0x2c1   : > { %v3074_v2 = vpop.f32.mrf.mxu0  ;;  %v4970_v3 = vpop.f32.mrf.mxu1  ;;  %v2897_v25 = vld [vmem:[#allocation3 + $0x48] sm:$0xff] }
 0x2c2   : > { %2857 = vst.msk [vmem:[#allocation3 + $0x58] sm:$0xff] %vm272_vm1, %v2836_v63  ;;  %v3154_v4 = vadd.f32 %v3074_v2, %v2894_v1 }
 0x2c3   : > { %v5028_v5 = vpop.f32.mrf.mxu0  ;;  %v2781_v7 = vpop.f32.mrf.mxu1 }
 0x2c4   : > { %3175 = vst.msk [vmem:[#allocation3 + $0x30] sm:$0xff] %vm272_vm1, %v3154_v4  ;;  %v2837_v9 = vadd.f32 %v2781_v7, %v2577_v6  ;;  %v2585_v6 = vld [vmem:[#allocation3 + $0xa0] sm:$0xff] }
 0x2c5   : > { %v3079_v11 = vpop.f32.mrf.mxu0  ;;  %v4973_v45 = vpop.f32.mrf.mxu1  ;;  %v2898_v31 = vld [vmem:[#allocation3 + $0x50] sm:$0xff] }
 0x2c6   : > { %2858 = vst.msk [vmem:[#allocation3 + $0x60] sm:$0xff] %vm272_vm1, %v2837_v9  ;;  %v3155_v13 = vadd.f32 %v3079_v11, %v2895_v10 }
 0x2c7   : > { %v5031_v14 = vpop.f32.mrf.mxu0  ;;  %v2786_v16 = vpop.f32.mrf.mxu1 }
 0x2c8   : > { %3176 = vst.msk [vmem:[#allocation3 + $0x38] sm:$0xff] %vm272_vm1, %v3155_v13  ;;  %v2838_v17 = vadd.f32 %v2786_v16, %v2578_v15  ;;  %v3211_v15 = vld [vmem:[#allocation3] sm:$0xff] }
 0x2c9   : > { %v3084_v18 = vpop.f32.mrf.mxu0  ;;  %v4976_v19 = vpop.f32.mrf.mxu1  ;;  %v2899_v38 = vld [vmem:[#allocation3 + $0x58] sm:$0xff] }
 0x2ca   : > { %2859 = vst.msk [vmem:[#allocation3 + $0x68] sm:$0xff] %vm272_vm1, %v2838_v17  ;;  %v3156_v20 = vadd.f32 %v3084_v18, %v2896_v62 }
 0x2cb   : > { %v5034_v21 = vpop.f32.mrf.mxu0  ;;  %v2791_v23 = vpop.f32.mrf.mxu1 }
 0x2cc   : > { %3177 = vst.msk [vmem:[#allocation3 + $0x40] sm:$0xff] %vm272_vm1, %v3156_v20  ;;  %v2839_v24 = vadd.f32 %v2791_v23, %v2579_v22  ;;  %v3212_v22 = vld [vmem:[#allocation3 + $0x8] sm:$0xff] }
 0x2cd   : > { %v3089_v26 = vpop.f32.mrf.mxu0  ;;  %v4979_v8 = vpop.f32.mrf.mxu1  ;;  %v2900_v47 = vld [vmem:[#allocation3 + $0x60] sm:$0xff] }
 0x2ce   : > { %2860 = vst.msk [vmem:[#allocation3 + $0x70] sm:$0xff] %vm272_vm1, %v2839_v24  ;;  %v3157_v27 = vadd.f32 %v3089_v26, %v2897_v25 }
 0x2cf   : > { %v5037_v28 = vpop.f32.mrf.mxu0  ;;  %v2796_v30 = vpop.f32.mrf.mxu1 }
 0x2d0   : > { %3178 = vst.msk [vmem:[#allocation3 + $0x48] sm:$0xff] %vm272_vm1, %v3157_v27  ;;  %v2840_v0 = vadd.f32 %v2796_v30, %v2580_v29  ;;  %v3213_v29 = vld [vmem:[#allocation3 + $0x10] sm:$0xff] }
 0x2d1   : > { %v3094_v32 = vpop.f32.mrf.mxu0  ;;  %v4982_v33 = vpop.f32.mrf.mxu1  ;;  %v2901_v55 = vld [vmem:[#allocation3 + $0x68] sm:$0xff] }
 0x2d2   : > { %2861 = vst.msk [vmem:[#allocation3 + $0x78] sm:$0xff] %vm272_vm1, %v2840_v0  ;;  %v3158_v34 = vadd.f32 %v3094_v32, %v2898_v31 }
 0x2d3   : > { %v5040_v35 = vpop.f32.mrf.mxu0  ;;  %v2801_v36 = vpop.f32.mrf.mxu1 }
 0x2d4   : > { %3179 = vst.msk [vmem:[#allocation3 + $0x50] sm:$0xff] %vm272_vm1, %v3158_v34  ;;  %v2841_v37 = vadd.f32 %v2801_v36, %v2581_v12  ;;  %v3214_v12 = vld [vmem:[#allocation3 + $0x18] sm:$0xff] }
 0x2d5   : > { %v3099_v39 = vpop.f32.mrf.mxu0  ;;  %v4985_v40 = vpop.f32.mrf.mxu1  ;;  %v2902_v1 = vld [vmem:[#allocation3 + $0x70] sm:$0xff] }
 0x2d6   : > { %2862 = vst.msk [vmem:[#allocation3 + $0x80] sm:$0xff] %vm272_vm1, %v2841_v37  ;;  %v3159_v41 = vadd.f32 %v3099_v39, %v2899_v38 }
 0x2d7   : > { %v5043_v42 = vpop.f32.mrf.mxu0  ;;  %v2806_v44 = vpop.f32.mrf.mxu1 }
 0x2d8   : > { %3180 = vst.msk [vmem:[#allocation3 + $0x58] sm:$0xff] %vm272_vm1, %v3159_v41  ;;  %v2842_v46 = vadd.f32 %v2806_v44, %v2582_v43  ;;  %v3215_v43 = vld [vmem:[#allocation3 + $0x20] sm:$0xff] }
 0x2d9   : > { %v3104_v48 = vpop.f32.mrf.mxu0  ;;  %v4988_v49 = vpop.f32.mrf.mxu1  ;;  %v2903_v10 = vld [vmem:[#allocation3 + $0x78] sm:$0xff] }
 0x2da   : > { %2863 = vst.msk [vmem:[#allocation3 + $0x88] sm:$0xff] %vm272_vm1, %v2842_v46  ;;  %v3160_v50 = vadd.f32 %v3104_v48, %v2900_v47 }
 0x2db   : > { %v5046_v51 = vpop.f32.mrf.mxu0  ;;  %v2811_v53 = vpop.f32.mrf.mxu1 }
 0x2dc   : > { %3181 = vst.msk [vmem:[#allocation3 + $0x60] sm:$0xff] %vm272_vm1, %v3160_v50  ;;  %v2843_v54 = vadd.f32 %v2811_v53, %v2583_v52  ;;  %v3216_v52 = vld [vmem:[#allocation3 + $0x28] sm:$0xff] }
 0x2dd   : > { %v3109_v56 = vpop.f32.mrf.mxu0  ;;  %v4991_v57 = vpop.f32.mrf.mxu1  ;;  %v2904_v62 = vld [vmem:[#allocation3 + $0x80] sm:$0xff] }
 0x2de   : > { %2864 = vst.msk [vmem:[#allocation3 + $0x90] sm:$0xff] %vm272_vm1, %v2843_v54  ;;  %v3161_v58 = vadd.f32 %v3109_v56, %v2901_v55 }
 0x2df   : > { %v5049_v59 = vpop.f32.mrf.mxu0  ;;  %v2816_v61 = vpop.f32.mrf.mxu1 }
 0x2e0   : > { %3182 = vst.msk [vmem:[#allocation3 + $0x68] sm:$0xff] %vm272_vm1, %v3161_v58  ;;  %v2844_v63 = vadd.f32 %v2816_v61, %v2584_v60  ;;  %v3217_v60 = vld [vmem:[#allocation3 + $0x30] sm:$0xff] }
 0x2e1   : > { %v3114_v2 = vpop.f32.mrf.mxu0  ;;  %v4994_v3 = vpop.f32.mrf.mxu1  ;;  %v2905_v25 = vld [vmem:[#allocation3 + $0x88] sm:$0xff] }
 0x2e2   : > { %2865 = vst.msk [vmem:[#allocation3 + $0x98] sm:$0xff] %vm272_vm1, %v2844_v63  ;;  %v3162_v4 = vadd.f32 %v3114_v2, %v2902_v1 }
 0x2e3   : > { %v5052_v5 = vpop.f32.mrf.mxu0  ;;  %v2821_v7 = vpop.f32.mrf.mxu1 }
 0x2e4   : > { %3183 = vst.msk [vmem:[#allocation3 + $0x70] sm:$0xff] %vm272_vm1, %v3162_v4  ;;  %v2845_v9 = vadd.f32 %v2821_v7, %v2585_v6  ;;  %v3218_v6 = vld [vmem:[#allocation3 + $0x38] sm:$0xff] }
 0x2e5   : > { %v3119_v11 = vpop.f32.mrf.mxu0  ;;  %v4997_v45 = vpop.f32.mrf.mxu1  ;;  %v2906_v31 = vld [vmem:[#allocation3 + $0x90] sm:$0xff] }
 0x2e6   : > { %2866 = vst.msk [vmem:[#allocation3 + $0xa0] sm:$0xff] %vm272_vm1, %v2845_v9  ;;  %v3163_v13 = vadd.f32 %v3119_v11, %v2903_v10  ;;  %v6675_v10 = vld [vmem:[%s6824_s3] ss:$0 sm:$0xff] }
 0x2e7   : > { %v5055_v14 = vpop.f32.mrf.mxu0  ;;  %v3367_v16 = vpop.f32.mrf.mxu1 }
 0x2e8   : > { %3184 = vst.msk [vmem:[#allocation3 + $0x78] sm:$0xff] %vm272_vm1, %v3163_v13  ;;  %v3471_v17 = vadd.f32 %v3367_v16, %v3211_v15  ;;  %v6681_v15 = vld [vmem:[%s6825_s4] ss:$0 sm:$0xff] }
 0x2e9   : > { %v3124_v18 = vpop.f32.mrf.mxu0  ;;  %v5083_v19 = vpop.f32.mrf.mxu1  ;;  %v2907_v38 = vld [vmem:[#allocation3 + $0x98] sm:$0xff] }
 0x2ea   : > { %3492 = vst.msk [vmem:[#allocation3] sm:$0xff] %vm272_vm1, %v3471_v17  ;;  %v3164_v20 = vadd.f32 %v3124_v18, %v2904_v62  ;;  %v3219_v62 = vld [vmem:[#allocation3 + $0x40] sm:$0xff] }
 0x2eb   : > { %v5058_v21 = vpop.f32.mrf.mxu0  ;;  %v3372_v23 = vpop.f32.mrf.mxu1 }
 0x2ec   : > { %3185 = vst.msk [vmem:[#allocation3 + $0x80] sm:$0xff] %vm272_vm1, %v3164_v20  ;;  %v3472_v24 = vadd.f32 %v3372_v23, %v3212_v22 }
 0x2ed   : > { %v3129_v26 = vpop.f32.mrf.mxu0  ;;  %v5086_v8 = vpop.f32.mrf.mxu1  ;;  %v2908_v47 = vld [vmem:[#allocation3 + $0xa0] sm:$0xff] }
 0x2ee   : > { %3493 = vst.msk [vmem:[#allocation3 + $0x8] sm:$0xff] %vm272_vm1, %v3472_v24  ;;  %v3165_v27 = vadd.f32 %v3129_v26, %v2905_v25 }
 0x2ef   : > { %v5061_v28 = vpop.f32.mrf.mxu0  ;;  %v3377_v30 = vpop.f32.mrf.mxu1 }
 0x2f0   : > { %3186 = vst.msk [vmem:[#allocation3 + $0x88] sm:$0xff] %vm272_vm1, %v3165_v27  ;;  %v3473_v0 = vadd.f32 %v3377_v30, %v3213_v29  ;;  %v3220_v27 = vld [vmem:[#allocation3 + $0x48] sm:$0xff] }
 0x2f1   : > { %v3134_v32 = vpop.f32.mrf.mxu0  ;;  %v5089_v33 = vpop.f32.mrf.mxu1  ;;  %v3534_v55 = vld [vmem:[#allocation3] sm:$0xff] }
 0x2f2   : > { %3494 = vst.msk [vmem:[#allocation3 + $0x10] sm:$0xff] %vm272_vm1, %v3473_v0  ;;  %v3166_v34 = vadd.f32 %v3134_v32, %v2906_v31 }
 0x2f3   : > { %v5064_v35 = vpop.f32.mrf.mxu0  ;;  %v3382_v36 = vpop.f32.mrf.mxu1 }
 0x2f4   : > { %3187 = vst.msk [vmem:[#allocation3 + $0x90] sm:$0xff] %vm272_vm1, %v3166_v34  ;;  %v3474_v37 = vadd.f32 %v3382_v36, %v3214_v12  ;;  %v3221_v36 = vld [vmem:[#allocation3 + $0x50] sm:$0xff] }
 0x2f5   : > { %v3139_v39 = vpop.f32.mrf.mxu0  ;;  %v5092_v40 = vpop.f32.mrf.mxu1  ;;  %v3535_v1 = vld [vmem:[#allocation3 + $0x8] sm:$0xff] }
 0x2f6   : > { %3495 = vst.msk [vmem:[#allocation3 + $0x18] sm:$0xff] %vm272_vm1, %v3474_v37  ;;  %v3167_v41 = vadd.f32 %v3139_v39, %v2907_v38 }
 0x2f7   : > { %v5067_v42 = vpop.f32.mrf.mxu0  ;;  %v3387_v44 = vpop.f32.mrf.mxu1 }
 0x2f8   : > { %3188 = vst.msk [vmem:[#allocation3 + $0x98] sm:$0xff] %vm272_vm1, %v3167_v41  ;;  %v3475_v46 = vadd.f32 %v3387_v44, %v3215_v43 }
 0x2f9   : > { %v3144_v48 = vpop.f32.mrf.mxu0  ;;  %v5095_v49 = vpop.f32.mrf.mxu1  ;;  %v3536_v11 = vld [vmem:[#allocation3 + $0x10] sm:$0xff] }
 0x2fa   : > { %3496 = vst.msk [vmem:[#allocation3 + $0x20] sm:$0xff] %vm272_vm1, %v3475_v46  ;;  %v3168_v50 = vadd.f32 %v3144_v48, %v2908_v47  ;;  %v3222_v48 = vld [vmem:[#allocation3 + $0x58] sm:$0xff] }
 0x2fb   : > { %v5070_v51 = vpop.f32.mrf.mxu0  ;;  %v3392_v53 = vpop.f32.mrf.mxu1 }
 0x2fc   : > { %3189 = vst.msk [vmem:[#allocation3 + $0xa0] sm:$0xff] %vm272_vm1, %v3168_v50  ;;  %v3476_v54 = vadd.f32 %v3392_v53, %v3216_v52 }
 0x2fd   : > { %v3690_v56 = vpop.f32.mrf.mxu0  ;;  %v5098_v57 = vpop.f32.mrf.mxu1  ;;  %v3537_v21 = vld [vmem:[#allocation3 + $0x18] sm:$0xff] }
 0x2fe   : > { %3497 = vst.msk [vmem:[#allocation3 + $0x28] sm:$0xff] %vm272_vm1, %v3476_v54  ;;  %v3794_v58 = vadd.f32 %v3690_v56, %v3534_v55 }
 0x2ff   : > { %v5156_v59 = vpop.f32.mrf.mxu0  ;;  %v3397_v61 = vpop.f32.mrf.mxu1 }
 0x300   : > { %3815 = vst.msk [vmem:[#allocation3] sm:$0xff] %vm272_vm1, %v3794_v58  ;;  %v3477_v63 = vadd.f32 %v3397_v61, %v3217_v60  ;;  %v3223_v60 = vld [vmem:[#allocation3 + $0x60] sm:$0xff] }
 0x301   : > { %v3695_v2 = vpop.f32.mrf.mxu0  ;;  %v5101_v3 = vpop.f32.mrf.mxu1  ;;  %v3538_v0 = vld [vmem:[#allocation3 + $0x20] sm:$0xff] }
 0x302   : > { %3498 = vst.msk [vmem:[#allocation3 + $0x30] sm:$0xff] %vm272_vm1, %v3477_v63  ;;  %v3795_v4 = vadd.f32 %v3695_v2, %v3535_v1 }
 0x303   : > { %v5159_v5 = vpop.f32.mrf.mxu0  ;;  %v3402_v7 = vpop.f32.mrf.mxu1 }
 0x304   : > { %3816 = vst.msk [vmem:[#allocation3 + $0x8] sm:$0xff] %vm272_vm1, %v3795_v4  ;;  %v3478_v9 = vadd.f32 %v3402_v7, %v3218_v6 }
 0x305   : > { %v3700_v45 = vpop.f32.mrf.mxu0  ;;  %v5104_v13 = vpop.f32.mrf.mxu1  ;;  %v3539_v40 = vld [vmem:[#allocation3 + $0x28] sm:$0xff] }
 0x306   : > { %3499 = vst.msk [vmem:[#allocation3 + $0x38] sm:$0xff] %vm272_vm1, %v3478_v9  ;;  %v3796_v14 = vadd.f32 %v3700_v45, %v3536_v11  ;;  %v3224_v45 = vld [vmem:[#allocation3 + $0x68] sm:$0xff] }
 0x307   : > { %v3838_v16 = vld [vmem:[#allocation3] sm:$0xff]  ;;  %v5162_v17 = vpop.f32.mrf.mxu0  ;;  %v3407_v18 = vpop.f32.mrf.mxu1 }
 0x308   : > { %v3846_v19 = vmul.f32 %v6675_v10, %v3838_v16  ;;  %3817 = vst.msk [vmem:[#allocation3 + $0x10] sm:$0xff] %vm272_vm1, %v3796_v14  ;;  %v3479_v20 = vadd.f32 %v3407_v18, %v3219_v62 }
 0x309   : > { %v3705_v22 = vpop.f32.mrf.mxu0  ;;  %v5107_v23 = vpop.f32.mrf.mxu1  ;;  %v3540_v52 = vld [vmem:[#allocation3 + $0x30] sm:$0xff] }
 0x30a   : > { %v3854_v24 = vadd.f32 %v6681_v15, %v3846_v19  ;;  %3500 = vst.msk [vmem:[#allocation3 + $0x40] sm:$0xff] %vm272_vm1, %v3479_v20  ;;  %v3797_v25 = vadd.f32 %v3705_v22, %v3537_v21  ;;  %v3225_v22 = vld [vmem:[#allocation3 + $0x70] sm:$0xff] }
 0x30b   : > { %v3839_v26 = vld [vmem:[#allocation3 + $0x8] sm:$0xf]  ;;  %v5165_v8 = vpop.f32.mrf.mxu0  ;;  %v3412_v28 = vpop.f32.mrf.mxu1 }
 0x30c   : > { %3856 = vst.msk [vmem:[%s6690_s26] sm:$0xff] %vm272_vm1, %v3854_v24  ;;  %v3847_v29 = vmul.f32 %v6675_v10, %v3839_v26  ;;  %3818 = vst.msk [vmem:[#allocation3 + $0x18] sm:$0xff] %vm272_vm1, %v3797_v25  ;;  %v3480_v30 = vadd.f32 %v3412_v28, %v3220_v27 }
 0x30d   : > { %v3710_v31 = vpop.f32.mrf.mxu0  ;;  %v5110_v32 = vpop.f32.mrf.mxu1  ;;  %v3541_v3 = vld [vmem:[#allocation3 + $0x38] sm:$0xff] }
 0x30e   : > { %v3855_v33 = vadd.f32 %v6681_v15, %v3847_v29  ;;  %3501 = vst.msk [vmem:[#allocation3 + $0x48] sm:$0xff] %vm272_vm1, %v3480_v30  ;;  %v3798_v34 = vadd.f32 %v3710_v31, %v3538_v0 }
 0x30f   : > { %v3858_v35 = vld [vmem:[#allocation3 + $0xe] sm:$0xff]  ;;  %v5168_v12 = vpop.f32.mrf.mxu0  ;;  %v3417_v37 = vpop.f32.mrf.mxu1 }
 0x310   : > { %3857 = vst.msk [vmem:[%s6690_s26 + $0x8] sm:$0xf] %vm297_vm3, %v3855_v33  ;;  %v3860_v38 = vmul.f32 %v6675_v10, %v3858_v35  ;;  %v3481_v39 = vadd.f32 %v3417_v37, %v3221_v36  ;;  %v3226_v33 = vld [vmem:[#allocation3 + $0x78] sm:$0xff] }
 0x311   : > { %3819 = vst.msk [vmem:[#allocation3 + $0x20] sm:$0xff] %vm272_vm1, %v3798_v34  ;;  %v3715_v41 = vpop.f32.mrf.mxu0  ;;  %v5113_v42 = vpop.f32.mrf.mxu1  ;;  %v3542_v16 = vld [vmem:[#allocation3 + $0x40] sm:$0xff] }
 0x312   : > { %v3862_v43 = vadd.f32 %v6681_v15, %v3860_v38  ;;  %3502 = vst.msk [vmem:[#allocation3 + $0x50] sm:$0xff] %vm272_vm1, %v3481_v39  ;;  %v3799_v44 = vadd.f32 %v3715_v41, %v3539_v40 }
 0x313   : > { %v3859_v46 = vld [vmem:[#allocation3 + $0x16] sm:$0xf]  ;;  %v5171_v47 = vpop.f32.mrf.mxu0  ;;  %v3422_v49 = vpop.f32.mrf.mxu1 }
 0x314   : > { %3864 = vst.msk [vmem:[%s6690_s26 + $0xc] sm:$0xff] %vm272_vm1, %v3862_v43  ;;  %v3861_v50 = vmul.f32 %v6675_v10, %v3859_v46  ;;  %3820 = vst.msk [vmem:[#allocation3 + $0x28] sm:$0xff] %vm272_vm1, %v3799_v44  ;;  %v3482_v51 = vadd.f32 %v3422_v49, %v3222_v48  ;;  %v3227_v43 = vld [vmem:[#allocation3 + $0x80] sm:$0xff] }
 0x315   : > { %v3720_v53 = vpop.f32.mrf.mxu0  ;;  %v5116_v54 = vpop.f32.mrf.mxu1  ;;  %v3543_v8 = vld [vmem:[#allocation3 + $0x48] sm:$0xff] }
 0x316   : > { %v3863_v55 = vadd.f32 %v6681_v15, %v3861_v50  ;;  %3503 = vst.msk [vmem:[#allocation3 + $0x58] sm:$0xff] %vm272_vm1, %v3482_v51  ;;  %v3800_v56 = vadd.f32 %v3720_v53, %v3540_v52 }
 0x317   : > { %v5174_v59 = vpop.f32.mrf.mxu0  ;;  %v3427_v61 = vpop.f32.mrf.mxu1 }
 0x318   : > { %v3866_v57 = vld [vmem:[#allocation3 + $0x1c] sm:$0xff]  ;;  %v3867_v58 = vld [vmem:[#allocation3 + $0x24] sm:$0xf]  ;;  %3865 = vst.msk [vmem:[%s6690_s26 + $0x14] sm:$0xf] %vm297_vm3, %v3863_v55  ;;  %v3483_v2 = vadd.f32 %v3427_v61, %v3223_v60  ;;  %v3228_v55 = vld [vmem:[#allocation3 + $0x88] sm:$0xff] }
 0x319   : > { %v3868_v63 = vmul.f32 %v6675_v10, %v3866_v57  ;;  %v3869_v1 = vmul.f32 %v6675_v10, %v3867_v58  ;;  %3821 = vst.msk [vmem:[#allocation3 + $0x30] sm:$0xff] %vm272_vm1, %v3800_v56  ;;  %v3725_v4 = vpop.f32.mrf.mxu0  ;;  %v5119_v5 = vpop.f32.mrf.mxu1  ;;  %v3544_v36 = vld [vmem:[#allocation3 + $0x50] sm:$0xff] }
 0x31a   : > { %3504 = vst.msk [vmem:[#allocation3 + $0x60] sm:$0xff] %vm272_vm1, %v3483_v2  ;;  %v3801_v9 = vadd.f32 %v3725_v4, %v3541_v3  ;;  %v3229_v4 = vld [vmem:[#allocation3 + $0x90] sm:$0xff] }
 0x31b   : > { %v3870_v6 = vadd.f32 %v6681_v15, %v3868_v63  ;;  %v3871_v7 = vadd.f32 %v6681_v15, %v3869_v1  ;;  %v5177_v11 = vpop.f32.mrf.mxu0  ;;  %v3432_v13 = vpop.f32.mrf.mxu1 }
 0x31c   : > { %3822 = vst.msk [vmem:[#allocation3 + $0x38] sm:$0xff] %vm272_vm1, %v3801_v9  ;;  %v3484_v14 = vadd.f32 %v3432_v13, %v3224_v45 }
 0x31d   : > { %3872 = vst.msk [vmem:[%s6690_s26 + $0x18] sm:$0xff] %vm272_vm1, %v3870_v6  ;;  %v3730_v17 = vpop.f32.mrf.mxu0  ;;  %v5122_v62 = vpop.f32.mrf.mxu1  ;;  %v3545_v48 = vld [vmem:[#allocation3 + $0x58] sm:$0xff] }
 0x31e   : > { %3873 = vst.msk [vmem:[%s6690_s26 + $0x20] sm:$0xf] %vm297_vm3, %v3871_v7  ;;  %v3802_v18 = vadd.f32 %v3730_v17, %v3542_v16 }
 0x31f   : > { %3505 = vst.msk [vmem:[#allocation3 + $0x68] sm:$0xff] %vm272_vm1, %v3484_v14  ;;  %v5180_v21 = vpop.f32.mrf.mxu0  ;;  %v3437_v23 = vpop.f32.mrf.mxu1 }
 0x320   : > { %v3874_v19 = vld [vmem:[#allocation3 + $0x2a] sm:$0xff]  ;;  %v3875_v20 = vld [vmem:[#allocation3 + $0x32] sm:$0xf]  ;;  %3823 = vst.msk [vmem:[#allocation3 + $0x40] sm:$0xff] %vm272_vm1, %v3802_v18  ;;  %v3485_v26 = vadd.f32 %v3437_v23, %v3225_v22  ;;  %v3230_v18 = vld [vmem:[#allocation3 + $0x98] sm:$0xff] }
 0x321   : > { %v3876_v24 = vmul.f32 %v6675_v10, %v3874_v19  ;;  %v3877_v25 = vmul.f32 %v6675_v10, %v3875_v20  ;;  %v3735_v27 = vpop.f32.mrf.mxu0  ;;  %v5125_v28 = vpop.f32.mrf.mxu1  ;;  %v3546_v59 = vld [vmem:[#allocation3 + $0x60] sm:$0xff] }
 0x322   : > { %3506 = vst.msk [vmem:[#allocation3 + $0x70] sm:$0xff] %vm272_vm1, %v3485_v26  ;;  %v3803_v0 = vadd.f32 %v3735_v27, %v3543_v8 }
 0x323   : > { %v3878_v29 = vadd.f32 %v6681_v15, %v3876_v24  ;;  %v3879_v30 = vadd.f32 %v6681_v15, %v3877_v25  ;;  %v3882_v31 = vld [vmem:[#allocation3 + $0x38] sm:$0xff]  ;;  %v5183_v32 = vpop.f32.mrf.mxu0  ;;  %v3442_v34 = vpop.f32.mrf.mxu1 }
 0x324   : > { %v3884_v35 = vmul.f32 %v6675_v10, %v3882_v31  ;;  %3824 = vst.msk [vmem:[#allocation3 + $0x48] sm:$0xff] %vm272_vm1, %v3803_v0  ;;  %v3486_v12 = vadd.f32 %v3442_v34, %v3226_v33 }
 0x325   : > { %3880 = vst.msk [vmem:[%s6690_s26 + $0x24] sm:$0xff] %vm272_vm1, %v3878_v29  ;;  %v3740_v37 = vpop.f32.mrf.mxu0  ;;  %v5128_v38 = vpop.f32.mrf.mxu1  ;;  %v3231_v29 = vld [vmem:[#allocation3 + $0xa0] sm:$0xff] }
 0x326   : > { %3881 = vst.msk [vmem:[%s6690_s26 + $0x2c] sm:$0xf] %vm297_vm3, %v3879_v30  ;;  %v3886_v39 = vadd.f32 %v6681_v15, %v3884_v35  ;;  %v3804_v40 = vadd.f32 %v3740_v37, %v3544_v36  ;;  %v3547_v9 = vld [vmem:[#allocation3 + $0x68] sm:$0xff] }
 0x327   : > { %3507 = vst.msk [vmem:[#allocation3 + $0x78] sm:$0xff] %vm272_vm1, %v3486_v12  ;;  %v3883_v41 = vld [vmem:[#allocation3 + $0x40] sm:$0xf]  ;;  %v5186_v42 = vpop.f32.mrf.mxu0  ;;  %v3447_v44 = vpop.f32.mrf.mxu1 }
 0x328   : > { %3888 = vst.msk [vmem:[%s6690_s26 + $0x30] sm:$0xff] %vm272_vm1, %v3886_v39  ;;  %v3885_v46 = vmul.f32 %v6675_v10, %v3883_v41  ;;  %3825 = vst.msk [vmem:[#allocation3 + $0x50] sm:$0xff] %vm272_vm1, %v3804_v40  ;;  %v3487_v47 = vadd.f32 %v3447_v44, %v3227_v43 }
 0x329   : > { %v3745_v49 = vpop.f32.mrf.mxu0  ;;  %v5131_v50 = vpop.f32.mrf.mxu1  ;;  %v3548_v23 = vld [vmem:[#allocation3 + $0x70] sm:$0xff] }
 0x32a   : > { %v3887_v51 = vadd.f32 %v6681_v15, %v3885_v46  ;;  %3508 = vst.msk [vmem:[#allocation3 + $0x80] sm:$0xff] %vm272_vm1, %v3487_v47  ;;  %v3805_v52 = vadd.f32 %v3745_v49, %v3545_v48 }
 0x32b   : > { %v3890_v53 = vld [vmem:[#allocation3 + $0x46] sm:$0xff]  ;;  %v5189_v54 = vpop.f32.mrf.mxu0  ;;  %v3452_v56 = vpop.f32.mrf.mxu1 }
 0x32c   : > { %3889 = vst.msk [vmem:[%s6690_s26 + $0x38] sm:$0xf] %vm297_vm3, %v3887_v51  ;;  %v3892_v57 = vmul.f32 %v6675_v10, %v3890_v53  ;;  %v3488_v58 = vadd.f32 %v3452_v56, %v3228_v55 }
 0x32d   : > { %3826 = vst.msk [vmem:[#allocation3 + $0x58] sm:$0xff] %vm272_vm1, %v3805_v52  ;;  %v3750_v60 = vpop.f32.mrf.mxu0  ;;  %v5134_v61 = vpop.f32.mrf.mxu1 }
 0x32e   : > { %v3894_v63 = vadd.f32 %v6681_v15, %v3892_v57  ;;  %3509 = vst.msk [vmem:[#allocation3 + $0x88] sm:$0xff] %vm272_vm1, %v3488_v58  ;;  %v3806_v1 = vadd.f32 %v3750_v60, %v3546_v59  ;;  %v3549_v31 = vld [vmem:[#allocation3 + $0x78] sm:$0xff] }
 0x32f   : > { %v3891_v2 = vld [vmem:[#allocation3 + $0x4e] sm:$0xf]  ;;  %v5192_v3 = vpop.f32.mrf.mxu0  ;;  %v3457_v5 = vpop.f32.mrf.mxu1 }
 0x330   : > { %3896 = vst.msk [vmem:[%s6690_s26 + $0x3c] sm:$0xff] %vm272_vm1, %v3894_v63  ;;  %v3893_v6 = vmul.f32 %v6675_v10, %v3891_v2  ;;  %3827 = vst.msk [vmem:[#allocation3 + $0x60] sm:$0xff] %vm272_vm1, %v3806_v1  ;;  %v3489_v7 = vadd.f32 %v3457_v5, %v3229_v4 }
 0x331   : > { %v3755_v11 = vpop.f32.mrf.mxu0  ;;  %v5137_v45 = vpop.f32.mrf.mxu1  ;;  %v3550_v39 = vld [vmem:[#allocation3 + $0x80] sm:$0xff] }
 0x332   : > { %v3895_v13 = vadd.f32 %v6681_v15, %v3893_v6  ;;  %3510 = vst.msk [vmem:[#allocation3 + $0x90] sm:$0xff] %vm272_vm1, %v3489_v7  ;;  %v3807_v14 = vadd.f32 %v3755_v11, %v3547_v9 }
 0x333   : > { %v5195_v62 = vpop.f32.mrf.mxu0  ;;  %v3462_v19 = vpop.f32.mrf.mxu1 }
 0x334   : > { %v3898_v16 = vld [vmem:[#allocation3 + $0x54] sm:$0xff]  ;;  %v3899_v17 = vld [vmem:[#allocation3 + $0x5c] sm:$0xf]  ;;  %3897 = vst.msk [vmem:[%s6690_s26 + $0x44] sm:$0xf] %vm297_vm3, %v3895_v13  ;;  %v3490_v22 = vadd.f32 %v3462_v19, %v3230_v18 }
 0x335   : > { %v3900_v20 = vmul.f32 %v6675_v10, %v3898_v16  ;;  %v3901_v21 = vmul.f32 %v6675_v10, %v3899_v17  ;;  %3828 = vst.msk [vmem:[#allocation3 + $0x68] sm:$0xff] %vm272_vm1, %v3807_v14  ;;  %v3760_v24 = vpop.f32.mrf.mxu0  ;;  %v5140_v25 = vpop.f32.mrf.mxu1  ;;  %v3551_v48 = vld [vmem:[#allocation3 + $0x88] sm:$0xff] }
 0x336   : > { %3511 = vst.msk [vmem:[#allocation3 + $0x98] sm:$0xff] %vm272_vm1, %v3490_v22  ;;  %v3808_v27 = vadd.f32 %v3760_v24, %v3548_v23 }
 0x337   : > { %v3902_v26 = vadd.f32 %v6681_v15, %v3900_v20  ;;  %v3903_v8 = vadd.f32 %v6681_v15, %v3901_v21  ;;  %v5198_v28 = vpop.f32.mrf.mxu0  ;;  %v3467_v30 = vpop.f32.mrf.mxu1 }
 0x338   : > { %3829 = vst.msk [vmem:[#allocation3 + $0x70] sm:$0xff] %vm272_vm1, %v3808_v27  ;;  %v3491_v0 = vadd.f32 %v3467_v30, %v3231_v29 }
 0x339   : > { %3904 = vst.msk [vmem:[%s6690_s26 + $0x48] sm:$0xff] %vm272_vm1, %v3902_v26  ;;  %v3765_v32 = vpop.f32.mrf.mxu0  ;;  %v5143_v33 = vpop.f32.mrf.mxu1  ;;  %v3552_v55 = vld [vmem:[#allocation3 + $0x90] sm:$0xff] }
 0x33a   : > { %3905 = vst.msk [vmem:[%s6690_s26 + $0x50] sm:$0xf] %vm297_vm3, %v3903_v8  ;;  %v3809_v34 = vadd.f32 %v3765_v32, %v3549_v31 }
 0x33b   : > { %3512 = vst.msk [vmem:[#allocation3 + $0xa0] sm:$0xff] %vm272_vm1, %v3491_v0  ;;  %v5201_v36 = vpop.f32.mrf.mxu0 }
 0x33c   : > { %v3906_v35 = vld [vmem:[#allocation3 + $0x62] sm:$0xff]  ;;  %v3907_v12 = vld [vmem:[#allocation3 + $0x6a] sm:$0xf]  ;;  %3830 = vst.msk [vmem:[#allocation3 + $0x78] sm:$0xff] %vm272_vm1, %v3809_v34 }
 0x33d   : > { %v3908_v37 = vmul.f32 %v6675_v10, %v3906_v35  ;;  %v3909_v38 = vmul.f32 %v6675_v10, %v3907_v12  ;;  %v3770_v40 = vpop.f32.mrf.mxu0  ;;  %v3553_v63 = vld [vmem:[#allocation3 + $0x98] sm:$0xff] }
 0x33e   : > { %v3810_v43 = vadd.f32 %v3770_v40, %v3550_v39 }
 0x33f   : > { %v3910_v41 = vadd.f32 %v6681_v15, %v3908_v37  ;;  %v3911_v42 = vadd.f32 %v6681_v15, %v3909_v38  ;;  %v3914_v44 = vld [vmem:[#allocation3 + $0x70] sm:$0xff]  ;;  %v5204_v46 = vpop.f32.mrf.mxu0 }
 0x340   : > { %v3916_v47 = vmul.f32 %v6675_v10, %v3914_v44  ;;  %3831 = vst.msk [vmem:[#allocation3 + $0x80] sm:$0xff] %vm272_vm1, %v3810_v43 }
 0x341   : > { %3912 = vst.msk [vmem:[%s6690_s26 + $0x54] sm:$0xff] %vm272_vm1, %v3910_v41  ;;  %v3775_v49 = vpop.f32.mrf.mxu0 }
 0x342   : > { %3913 = vst.msk [vmem:[%s6690_s26 + $0x5c] sm:$0xf] %vm297_vm3, %v3911_v42  ;;  %v3918_v50 = vadd.f32 %v6681_v15, %v3916_v47  ;;  %v3811_v51 = vadd.f32 %v3775_v49, %v3551_v48  ;;  %v3554_v7 = vld [vmem:[#allocation3 + $0xa0] sm:$0xff] }
 0x343   : > { %v3915_v52 = vld [vmem:[#allocation3 + $0x78] sm:$0xf]  ;;  %v5207_v53 = vpop.f32.mrf.mxu0 }
 0x344   : > { %3920 = vst.msk [vmem:[%s6690_s26 + $0x60] sm:$0xff] %vm272_vm1, %v3918_v50  ;;  %v3917_v54 = vmul.f32 %v6675_v10, %v3915_v52  ;;  %3832 = vst.msk [vmem:[#allocation3 + $0x88] sm:$0xff] %vm272_vm1, %v3811_v51 }
 0x345   : > { %v3780_v56 = vpop.f32.mrf.mxu0 }
 0x346   : > { %v3919_v57 = vadd.f32 %v6681_v15, %v3917_v54  ;;  %v3812_v58 = vadd.f32 %v3780_v56, %v3552_v55 }
 0x347   : > { %v3922_v59 = vld [vmem:[#allocation3 + $0x7e] sm:$0xff]  ;;  %v5210_v60 = vpop.f32.mrf.mxu0 }
 0x348   : > { %3921 = vst.msk [vmem:[%s6690_s26 + $0x68] sm:$0xf] %vm297_vm3, %v3919_v57  ;;  %v3924_v61 = vmul.f32 %v6675_v10, %v3922_v59 }
 0x349   : > { %3833 = vst.msk [vmem:[#allocation3 + $0x90] sm:$0xff] %vm272_vm1, %v3812_v58  ;;  %v3785_v1 = vpop.f32.mrf.mxu0 }
 0x34a   : > { %v3926_v2 = vadd.f32 %v6681_v15, %v3924_v61  ;;  %v3813_v3 = vadd.f32 %v3785_v1, %v3553_v63 }
 0x34b   : > { %v3923_v4 = vld [vmem:[#allocation3 + $0x86] sm:$0xf]  ;;  %v5213_v5 = vpop.f32.mrf.mxu0 }
 0x34c   : > { %3928 = vst.msk [vmem:[%s6690_s26 + $0x6c] sm:$0xff] %vm272_vm1, %v3926_v2  ;;  %v3925_v6 = vmul.f32 %v6675_v10, %v3923_v4  ;;  %3834 = vst.msk [vmem:[#allocation3 + $0x98] sm:$0xff] %vm272_vm1, %v3813_v3 }
 0x34d   : > { %v3790_v9 = vpop.f32.mrf.mxu0 }
 0x34e   : > { %v3927_v11 = vadd.f32 %v6681_v15, %v3925_v6  ;;  %v3814_v45 = vadd.f32 %v3790_v9, %v3554_v7 }
 0x34f   : > { %v5216_v16 = vpop.f32.mrf.mxu0 }
 0x350   : > { %v3930_v13 = vld [vmem:[#allocation3 + $0x8c] sm:$0xff]  ;;  %v3931_v14 = vld [vmem:[#allocation3 + $0x94] sm:$0xf]  ;;  %3929 = vst.msk [vmem:[%s6690_s26 + $0x74] sm:$0xf] %vm297_vm3, %v3927_v11 }
 0x351   : > { %v3932_v17 = vmul.f32 %v6675_v10, %v3930_v13  ;;  %v3933_v62 = vmul.f32 %v6675_v10, %v3931_v14  ;;  %3835 = vst.msk [vmem:[#allocation3 + $0xa0] sm:$0xff] %vm272_vm1, %v3814_v45 }
 0x353   : > { %v3934_v18 = vadd.f32 %v6681_v15, %v3932_v17  ;;  %v3935_v19 = vadd.f32 %v6681_v15, %v3933_v62 }
 0x355   : > { %3936 = vst.msk [vmem:[%s6690_s26 + $0x78] sm:$0xff] %vm272_vm1, %v3934_v18 }
 0x356   : > { %3937 = vst.msk [vmem:[%s6690_s26 + $0x80] sm:$0xf] %vm297_vm3, %v3935_v19 }
 0x358   : > { %v3938_v20 = vld [vmem:[#allocation3 + $0x9a] sm:$0xff]  ;;  %v3939_v21 = vld [vmem:[#allocation3 + $0xa2] sm:$0xf] }
 0x359   : > { %v3940_v22 = vmul.f32 %v6675_v10, %v3938_v20  ;;  %v3941_v23 = vmul.f32 %v6675_v10, %v3939_v21 }
 0x35b   : > { %v3942_v24 = vadd.f32 %v6681_v15, %v3940_v22  ;;  %v3943_v25 = vadd.f32 %v6681_v15, %v3941_v23 }
 0x35d   : > { %3944 = vst.msk [vmem:[%s6690_s26 + $0x84] sm:$0xff] %vm272_vm1, %v3942_v24 }
 0x35e   : > { %3945 = vst.msk [vmem:[%s6690_s26 + $0x8c] sm:$0xf] %vm297_vm3, %v3943_v25 }
 0x35f PF: > { %s15_s18 = sadd.s32 1, %s5249_s18  }
 0x360   : > { %p12_p4 = scmp.ge.s32.totalorder %s15_s18, 4  }
 0x362   :  { %14 = sbr.rel (!%p12_p4) target bundleno = 1 (0x1), region = 84 }

</bundles_post_ra>
